<compile_context>
chip_gen: v7x
topology: tpu7x:2x2x1
jax: 0.10.0
libtpu: 0.0.40
codegen_flags: <defaults>
</compile_context>

<pallas_src>
import math

import jax
import jax.numpy as jnp
from jax.experimental import pallas as pl
from jax.experimental.pallas import tpu as pltpu


# ----------------------------- shared math ---------------------------------- #

def _layernorm(x, gamma, beta, eps=1e-5):
    # PyTorch nn.LayerNorm: biased variance over the last dim, f32 throughout.
    mu = jnp.mean(x, axis=-1, keepdims=True)
    var = jnp.mean((x - mu) ** 2, axis=-1, keepdims=True)
    return (x - mu) * jax.lax.rsqrt(var + eps) * gamma + beta


def _gelu_exact(x):
    # nn.GELU default (erf-based, not tanh approximation), f32.
    return 0.5 * x * (1.0 + jax.lax.erf(x * (1.0 / math.sqrt(2.0))))


def _bf16_dot(x, w_bf16):
    # bf16 MXU operands, f32 accumulation.
    return jnp.dot(x.astype(jnp.bfloat16), w_bf16,
                   preferred_element_type=jnp.float32)


# ------------------------------ in-kernel MHA ------------------------------- #

def _mha_core(q, k, v, wo_ref):
    """Multi-head attention core, batched over the batch tile.

    q: (Bt, Lq, D) f32 (unscaled), k/v: (Bt, Lk, D) f32,
    wo_ref: (nhead, hd, D) bf16 output-projection weight (row blocks).
    Returns (Bt*Lq, D) f32 (output-projection bias NOT added).
    """
    Bt, Lq, D = q.shape
    nhead, hd, _ = wo_ref.shape
    q = q * (1.0 / math.sqrt(hd))                      # scale hoisted out of head loop
    out = jnp.zeros((Bt * Lq, D), jnp.float32)
    for h in range(nhead):                             # static unroll; lane slices only
        sl = slice(h * hd, (h + 1) * hd)
        qh = q[:, :, sl].astype(jnp.bfloat16)
        kh = k[:, :, sl].astype(jnp.bfloat16)
        vh = v[:, :, sl].astype(jnp.bfloat16)
        s = jnp.einsum('bqd,bkd->bqk', qh, kh,
                       preferred_element_type=jnp.float32)          # (Bt, Lq, Lk) f32
        s = s - jnp.max(s, axis=-1, keepdims=True)
        p = jnp.exp(s)
        p = p * pl.reciprocal(jnp.sum(p, axis=-1, keepdims=True), approx=True)
        o = jnp.einsum('bqk,bkd->bqd', p.astype(jnp.bfloat16), vh,
                       preferred_element_type=jnp.float32)          # (Bt, Lq, hd) f32
        # fold this head straight into the output projection (no concatenate)
        out = out + jnp.dot(o.reshape(Bt * Lq, hd).astype(jnp.bfloat16),
                            wo_ref[h], preferred_element_type=jnp.float32)
    return out


# -------------------------------- the kernel -------------------------------- #

def _decoder_block_kernel(tgt_ref, mem_ref,
                          ln_kv_ref, w_ckv_ref, b_ckv_ref,
                          ln1_ref, w_cq_ref, b_cq_ref, wo_c_ref, bo_c_ref,
                          ln2_ref, win_s_ref, bin_s_ref, wo_s_ref, bo_s_ref,
                          ln3_ref, w1_ref, b1_ref, w2_ref, b2_ref,
                          out_ref):
    Bt, Lq, D = tgt_ref.shape
    _, Lm, C = mem_ref.shape

    tgt = tgt_ref[...]                                  # (Bt, Lq, D) f32
    x0 = tgt.reshape(Bt * Lq, D)
    mem = mem_ref[...].reshape(Bt * Lm, C)

    # --- cross-attention branch (use_context=True) ---
    ln_kv = ln_kv_ref[...]
    mem_n = _layernorm(mem, ln_kv[0:1, :], ln_kv[1:2, :])            # norm1_kv
    # to_k/to_v folded with the cross-attn k/v in_proj (wrapper) -> one matmul
    kv = _bf16_dot(mem_n, w_ckv_ref[...]) + b_ckv_ref[...]           # (Bt*Lm, 2D)
    k_c = kv[:, :D].reshape(Bt, Lm, D)
    v_c = kv[:, D:].reshape(Bt, Lm, D)

    ln1 = ln1_ref[...]
    q_in = _layernorm(x0, ln1[0:1, :], ln1[1:2, :])                  # norm1
    q_c = (_bf16_dot(q_in, w_cq_ref[...]) + b_cq_ref[...]).reshape(Bt, Lq, D)
    x = x0 + _mha_core(q_c, k_c, v_c, wo_c_ref) + bo_c_ref[...]      # drop_path == id

    # --- self-attention branch ---
    ln2 = ln2_ref[...]
    xn = _layernorm(x, ln2[0:1, :], ln2[1:2, :])                     # norm2
    # fused QKV; bin_s already carries the exact +1e-8 query shift (wrapper)
    qkv = _bf16_dot(xn, win_s_ref[...]) + bin_s_ref[...]             # (Bt*Lq, 3D)
    q_s = qkv[:, 0 * D:1 * D].reshape(Bt, Lq, D)
    k_s = qkv[:, 1 * D:2 * D].reshape(Bt, Lq, D)
    v_s = qkv[:, 2 * D:3 * D].reshape(Bt, Lq, D)
    x = x + _mha_core(q_s, k_s, v_s, wo_s_ref) + bo_s_ref[...]

    # --- MLP branch ---
    ln3 = ln3_ref[...]
    xn = _layernorm(x, ln3[0:1, :], ln3[1:2, :])                     # norm3
    h = _gelu_exact(_bf16_dot(xn, w1_ref[...]) + b1_ref[...])
    m = _bf16_dot(h, w2_ref[...]) + b2_ref[...]
    out_ref[...] = (x + m).reshape(Bt, Lq, D).astype(out_ref.dtype)  # DropPath == id


# ------------------------- wrapper / parameter prep ------------------------- #

def _prepare_kernel_params(params, d_model, nhead):
    """Fold constants outside the kernel (done once, in f32), cast matmul
    weights to bf16. Layout/biases stay f32."""
    D = d_model
    hd = D // nhead
    w_kv, b_kv = params["w_kv"], params["b_kv"]          # to_k ++ to_v
    win_c, bin_c = params["win_c"], params["bin_c"]      # cross-attn in_proj
    win_s, bin_s = params["win_s"], params["bin_s"]      # self-attn in_proj

    # Fold to_k -> cross-attn Wk, to_v -> cross-attn Wv (exact algebra).
    w_ck = w_kv[:, :D] @ win_c[:, D:2 * D]
    b_ck = b_kv[:, :D] @ win_c[:, D:2 * D] + bin_c[:, D:2 * D]
    w_cv = w_kv[:, D:] @ win_c[:, 2 * D:]
    b_cv = b_kv[:, D:] @ win_c[:, 2 * D:] + bin_c[:, 2 * D:]
    w_ckv = jnp.concatenate([w_ck, w_cv], axis=1).astype(jnp.bfloat16)   # (C, 2D)
    b_ckv = jnp.concatenate([b_ck, b_cv], axis=1)                        # (1, 2D) f32

    # Fold the +1e-8 self-attn query shift into the q-slice of the bias.
    bin_s_adj = bin_s.at[:, :D].add(1e-8 * jnp.sum(win_s[:, :D], axis=0))

    # Output projections stored head-major (nhead, hd, D) for cheap per-head use.
    wo_c3 = params["wo_c"].reshape(nhead, hd, D).astype(jnp.bfloat16)
    wo_s3 = params["wo_s"].reshape(nhead, hd, D).astype(jnp.bfloat16)

    return [
        params["ln_kv"], w_ckv, b_ckv,
        params["ln1"], win_c[:, :D].astype(jnp.bfloat16), bin_c[:, :D],
        wo_c3, params["bo_c"],
        params["ln2"], win_s.astype(jnp.bfloat16), bin_s_adj,
        wo_s3, params["bo_s"],
        params["ln3"], params["w1"].astype(jnp.bfloat16), params["b1"],
        params["w2"].astype(jnp.bfloat16), params["b2"],
    ]


def _pick_batch_tile(B, Lq):
    # Largest divisor of B keeping the flattened slab (bt*Lq rows) modest.
    target = max(1, 256 // max(Lq, 1))
    bt = 1
    for d in range(1, B + 1):
        if B % d == 0 and d <= target:
            bt = d
    return bt


def decoder_block(tgt, memory, params, nhead, block_b=None):
    B, Lq, D = tgt.shape
    _, Lm, C = memory.shape
    if block_b is None:
        block_b = _pick_batch_tile(B, Lq)
    assert B % block_b == 0
    nb = B // block_b

    kparams = _prepare_kernel_params(params, D, nhead)

    def io_spec(L, E):
        return pl.BlockSpec((block_b, L, E), lambda b: (b, 0, 0))

    def w_spec(arr):
        # weights: whole array resident in VMEM, grid-invariant index map
        return pl.BlockSpec(arr.shape, lambda b, _nd=arr.ndim: (0,) * _nd)

    return pl.pallas_call(
        _decoder_block_kernel,
        out_shape=jax.ShapeDtypeStruct((B, Lq, D), tgt.dtype),
        grid=(nb,),
        in_specs=[io_spec(Lq, D), io_spec(Lm, C)] + [w_spec(w) for w in kparams],
        out_specs=io_spec(Lq, D),
        compiler_params=pltpu.CompilerParams(dimension_semantics=("parallel",)),
    )(tgt, memory, *kparams)


# ------------------------- pure-JAX reference (check) ----------------------- #

def decoder_block_ref(tgt, memory, params, nhead):
    """Faithful (unfused, f32) re-statement of the PyTorch module in eval mode."""
    D = tgt.shape[-1]
    hd = D // nhead
    scale = 1.0 / math.sqrt(hd)

    def mha(q_in, k_in, v_in, w_in, b_in, w_out, b_out):
        q = q_in @ w_in[:, :D] + b_in[:, :D]
        k = k_in @ w_in[:, D:2 * D] + b_in[:, D:2 * D]
        v = v_in @ w_in[:, 2 * D:] + b_in[:, 2 * D:]
        outs = []
        for h in range(nhead):
            sl = slice(h * hd, (h + 1) * hd)
            s = (q[:, sl] * scale) @ k[:, sl].T
            p = jax.nn.softmax(s, axis=-1)
            outs.append(p @ v[:, sl])
        return jnp.concatenate(outs, axis=-1) @ w_out + b_out

    def one(t, m):
        mem_n = _layernorm(m, params["ln_kv"][0:1], params["ln_kv"][1:2])
        k = mem_n @ params["w_kv"][:, :D] + params["b_kv"][:, :D]
        v = mem_n @ params["w_kv"][:, D:] + params["b_kv"][:, D:]
        q_in = _layernorm(t, params["ln1"][0:1], params["ln1"][1:2])
        x = t + mha(q_in, k, v, params["win_c"], params["bin_c"],
                    params["wo_c"], params["bo_c"])
        xn = _layernorm(x, params["ln2"][0:1], params["ln2"][1:2])
        x = x + mha(xn + 1e-8, xn, xn, params["win_s"], params["bin_s"],
                    params["wo_s"], params["bo_s"])
        xn = _layernorm(x, params["ln3"][0:1], params["ln3"][1:2])
        h = _gelu_exact(xn @ params["w1"] + params["b1"])
        return x + (h @ params["w2"] + params["b2"])

    return jax.vmap(one)(tgt, memory)


# --------------------------- deterministic params --------------------------- #

def init_params(key, d_model, context_dim, mlp_ratio=4.0):
    H = int(mlp_ratio * d_model)
    ks = jax.random.split(key, 18)

    def w(k, shape, scale=0.02):
        return (scale * jax.random.normal(k, shape)).astype(jnp.float32)

    def ln(k, dim):
        g = 1.0 + 0.1 * jax.random.normal(k, (dim,))
        b = 0.05 * jax.random.normal(jax.random.fold_in(k, 1), (dim,))
        return jnp.stack([g, b]).astype(jnp.float32)     # (2, dim): row0=gamma, row1=beta

    return {
        "ln_kv": ln(ks[0], context_dim),
        "w_kv": w(ks[1], (context_dim, 2 * d_model)),     # to_k ++ to_v (transposed)
        "b_kv": w(ks[2], (1, 2 * d_model)),
        "ln1": ln(ks[3], d_model),
        "win_c": w(ks[4], (d_model, 3 * d_model)),        # cross-attn in_proj (transposed)
        "bin_c": w(ks[5], (1, 3 * d_model)),
        "wo_c": w(ks[6], (d_model, d_model)),             # cross-attn out_proj (transposed)
        "bo_c": w(ks[7], (1, d_model)),
        "ln2": ln(ks[8], d_model),
        "win_s": w(ks[9], (d_model, 3 * d_model)),        # self-attn in_proj (transposed)
        "bin_s": w(ks[10], (1, 3 * d_model)),
        "wo_s": w(ks[11], (d_model, d_model)),
        "bo_s": w(ks[12], (1, d_model)),
        "ln3": ln(ks[13], d_model),
        "w1": w(ks[14], (d_model, H)),                    # mlp.fc1 (transposed)
        "b1": w(ks[15], (1, H)),
        "w2": w(ks[16], (H, d_model)),                    # mlp.fc2 (transposed)
        "b2": w(ks[17], (1, d_model)),
    }


# ----------------------------------- main ----------------------------------- #

if __name__ == "__main__":
    B, Lq, Lm = 2, 8, 16
    d_model, nhead, context_dim, mlp_ratio = 32, 4, 64, 4.0

    root = jax.random.PRNGKey(0)
    k_tgt, k_mem, k_par = jax.random.split(root, 3)
    tgt = jax.random.normal(k_tgt, (B, Lq, d_model), dtype=jnp.float32)
    memory = jax.random.normal(k_mem, (B, Lm, context_dim), dtype=jnp.float32)
    params = init_params(k_par, d_model, context_dim, mlp_ratio)

    out = jax.block_until_ready(decoder_block(tgt, memory, params, nhead))
    ref = jax.block_until_ready(decoder_block_ref(tgt, memory, params, nhead))

    max_diff = float(jnp.max(jnp.abs(out - ref)))
    assert out.shape == (B, Lq, d_model), out.shape
    # bf16 matmul operands + approx softmax reciprocal vs. pure-f32 reference
    assert max_diff < 2e-2, f"kernel/reference mismatch: max|diff|={max_diff}"

    print("KERNEL_OK")
</pallas_src>

<mosaic_0001>
module attributes {stable_mosaic.version = 11 : i64} {
  func.func @_decoder_block_kernel(%arg0: i32, %arg1: memref<2x8x32xf32, #tpu.memory_space<vmem>>, %arg2: memref<2x16x64xf32, #tpu.memory_space<vmem>>, %arg3: memref<2x64xf32, #tpu.memory_space<vmem>>, %arg4: memref<64x64xbf16, #tpu.memory_space<vmem>>, %arg5: memref<1x64xf32, #tpu.memory_space<vmem>>, %arg6: memref<2x32xf32, #tpu.memory_space<vmem>>, %arg7: memref<32x32xbf16, #tpu.memory_space<vmem>>, %arg8: memref<1x32xf32, #tpu.memory_space<vmem>>, %arg9: memref<4x8x32xbf16, #tpu.memory_space<vmem>>, %arg10: memref<1x32xf32, #tpu.memory_space<vmem>>, %arg11: memref<2x32xf32, #tpu.memory_space<vmem>>, %arg12: memref<32x96xbf16, #tpu.memory_space<vmem>>, %arg13: memref<1x96xf32, #tpu.memory_space<vmem>>, %arg14: memref<4x8x32xbf16, #tpu.memory_space<vmem>>, %arg15: memref<1x32xf32, #tpu.memory_space<vmem>>, %arg16: memref<2x32xf32, #tpu.memory_space<vmem>>, %arg17: memref<32x128xbf16, #tpu.memory_space<vmem>>, %arg18: memref<1x128xf32, #tpu.memory_space<vmem>>, %arg19: memref<128x32xbf16, #tpu.memory_space<vmem>>, %arg20: memref<1x32xf32, #tpu.memory_space<vmem>>, %arg21: memref<2x8x32xf32, #tpu.memory_space<vmem>>) attributes {dimension_semantics = [#tpu.dimension_semantics<parallel>], iteration_bounds = array<i64: 1>, scalar_prefetch = 0 : i64, scratch_operands = 0 : i64, tpu.core_type = #tpu.core_type<tc>, window_params = [{transform_indices = @transform_0, window_bounds = array<i64: 2, 8, 32>}, {transform_indices = @transform_1, window_bounds = array<i64: 2, 16, 64>}, {pipeline_mode = #tpu.pipeline_mode<synchronous>, transform_indices = @transform_2, window_bounds = array<i64: 2, 64>}, {pipeline_mode = #tpu.pipeline_mode<synchronous>, transform_indices = @transform_3, window_bounds = array<i64: 64, 64>}, {pipeline_mode = #tpu.pipeline_mode<synchronous>, transform_indices = @transform_4, window_bounds = array<i64: 1, 64>}, {pipeline_mode = #tpu.pipeline_mode<synchronous>, transform_indices = @transform_5, window_bounds = array<i64: 2, 32>}, {pipeline_mode = #tpu.pipeline_mode<synchronous>, transform_indices = @transform_6, window_bounds = array<i64: 32, 32>}, {pipeline_mode = #tpu.pipeline_mode<synchronous>, transform_indices = @transform_7, window_bounds = array<i64: 1, 32>}, {pipeline_mode = #tpu.pipeline_mode<synchronous>, transform_indices = @transform_8, window_bounds = array<i64: 4, 8, 32>}, {pipeline_mode = #tpu.pipeline_mode<synchronous>, transform_indices = @transform_9, window_bounds = array<i64: 1, 32>}, {pipeline_mode = #tpu.pipeline_mode<synchronous>, transform_indices = @transform_10, window_bounds = array<i64: 2, 32>}, {pipeline_mode = #tpu.pipeline_mode<synchronous>, transform_indices = @transform_11, window_bounds = array<i64: 32, 96>}, {pipeline_mode = #tpu.pipeline_mode<synchronous>, transform_indices = @transform_12, window_bounds = array<i64: 1, 96>}, {pipeline_mode = #tpu.pipeline_mode<synchronous>, transform_indices = @transform_13, window_bounds = array<i64: 4, 8, 32>}, {pipeline_mode = #tpu.pipeline_mode<synchronous>, transform_indices = @transform_14, window_bounds = array<i64: 1, 32>}, {pipeline_mode = #tpu.pipeline_mode<synchronous>, transform_indices = @transform_15, window_bounds = array<i64: 2, 32>}, {pipeline_mode = #tpu.pipeline_mode<synchronous>, transform_indices = @transform_16, window_bounds = array<i64: 32, 128>}, {pipeline_mode = #tpu.pipeline_mode<synchronous>, transform_indices = @transform_17, window_bounds = array<i64: 1, 128>}, {pipeline_mode = #tpu.pipeline_mode<synchronous>, transform_indices = @transform_18, window_bounds = array<i64: 128, 32>}, {pipeline_mode = #tpu.pipeline_mode<synchronous>, transform_indices = @transform_19, window_bounds = array<i64: 1, 32>}, {transform_indices = @transform_20, window_bounds = array<i64: 2, 8, 32>}]} {
    %c0 = arith.constant 0 : index
    %c0_0 = arith.constant 0 : index
    %c0_1 = arith.constant 0 : index
    %0 = vector.load %arg1[%c0, %c0_0, %c0_1] : memref<2x8x32xf32, #tpu.memory_space<vmem>>, vector<2x8x32xf32>
    %1 = vector.shape_cast %0 : vector<2x8x32xf32> to vector<16x32xf32>
    %c0_2 = arith.constant 0 : index
    %c0_3 = arith.constant 0 : index
    %c0_4 = arith.constant 0 : index
    %2 = vector.load %arg2[%c0_2, %c0_3, %c0_4] : memref<2x16x64xf32, #tpu.memory_space<vmem>>, vector<2x16x64xf32>
    %3 = vector.shape_cast %2 : vector<2x16x64xf32> to vector<32x64xf32>
    %c0_5 = arith.constant 0 : index
    %c0_6 = arith.constant 0 : index
    %4 = vector.load %arg3[%c0_5, %c0_6] : memref<2x64xf32, #tpu.memory_space<vmem>>, vector<2x64xf32>
    %5 = vector.extract_strided_slice %4 {offsets = [0, 0], sizes = [1, 64], strides = [1, 1]} : vector<2x64xf32> to vector<1x64xf32>
    %6 = vector.extract_strided_slice %4 {offsets = [1, 0], sizes = [1, 64], strides = [1, 1]} : vector<2x64xf32> to vector<1x64xf32>
    %cst = arith.constant dense<0.000000e+00> : vector<32xf32>
    %7 = vector.multi_reduction <add>, %3, %cst [1] : vector<32x64xf32> to vector<32xf32>
    %8 = vector.shape_cast %7 : vector<32xf32> to vector<32x1xf32>
    %cst_7 = arith.constant 6.400000e+01 : f32
    %9 = vector.broadcast %cst_7 : f32 to vector<32x1xf32>
    %10 = arith.divf %8, %9 : vector<32x1xf32>
    %11 = vector.broadcast %10 : vector<32x1xf32> to vector<32x64xf32>
    %12 = arith.subf %3, %11 : vector<32x64xf32>
    %13 = arith.mulf %12, %12 : vector<32x64xf32>
    %cst_8 = arith.constant dense<0.000000e+00> : vector<32xf32>
    %14 = vector.multi_reduction <add>, %13, %cst_8 [1] : vector<32x64xf32> to vector<32xf32>
    %15 = vector.shape_cast %14 : vector<32xf32> to vector<32x1xf32>
    %cst_9 = arith.constant 6.400000e+01 : f32
    %16 = vector.broadcast %cst_9 : f32 to vector<32x1xf32>
    %17 = arith.divf %15, %16 : vector<32x1xf32>
    %18 = vector.broadcast %10 : vector<32x1xf32> to vector<32x64xf32>
    %19 = arith.subf %3, %18 : vector<32x64xf32>
    %cst_10 = arith.constant 9.99999974E-6 : f32
    %20 = vector.broadcast %cst_10 : f32 to vector<32x1xf32>
    %21 = arith.addf %17, %20 : vector<32x1xf32>
    %22 = math.rsqrt %21 : vector<32x1xf32>
    %23 = vector.broadcast %22 : vector<32x1xf32> to vector<32x64xf32>
    %24 = arith.mulf %19, %23 : vector<32x64xf32>
    %25 = vector.broadcast %5 : vector<1x64xf32> to vector<32x64xf32>
    %26 = arith.mulf %24, %25 : vector<32x64xf32>
    %27 = vector.broadcast %6 : vector<1x64xf32> to vector<32x64xf32>
    %28 = arith.addf %26, %27 : vector<32x64xf32>
    %c0_11 = arith.constant 0 : index
    %c0_12 = arith.constant 0 : index
    %29 = vector.load %arg4[%c0_11, %c0_12] : memref<64x64xbf16, #tpu.memory_space<vmem>>, vector<64x64xbf16>
    %30 = arith.truncf %28 : vector<32x64xf32> to vector<32x64xbf16>
    %cst_13 = arith.constant dense<0.000000e+00> : vector<32x64xf32>
    %31 = tpu.matmul %30, %29, %cst_13 {dimension_numbers = #tpu.dot_dimension_numbers<[1], [0], [0], [1], [0, 0, 1, 1], [], []>} : vector<32x64xbf16>, vector<64x64xbf16>, vector<32x64xf32> -> vector<32x64xf32>
    %c0_14 = arith.constant 0 : index
    %c0_15 = arith.constant 0 : index
    %32 = vector.load %arg5[%c0_14, %c0_15] : memref<1x64xf32, #tpu.memory_space<vmem>>, vector<1x64xf32>
    %33 = vector.broadcast %32 : vector<1x64xf32> to vector<32x64xf32>
    %34 = arith.addf %31, %33 : vector<32x64xf32>
    %35 = vector.extract_strided_slice %34 {offsets = [0, 0], sizes = [32, 32], strides = [1, 1]} : vector<32x64xf32> to vector<32x32xf32>
    %36 = vector.shape_cast %35 : vector<32x32xf32> to vector<2x16x32xf32>
    %37 = vector.extract_strided_slice %34 {offsets = [0, 32], sizes = [32, 32], strides = [1, 1]} : vector<32x64xf32> to vector<32x32xf32>
    %38 = vector.shape_cast %37 : vector<32x32xf32> to vector<2x16x32xf32>
    %c0_16 = arith.constant 0 : index
    %c0_17 = arith.constant 0 : index
    %39 = vector.load %arg6[%c0_16, %c0_17] : memref<2x32xf32, #tpu.memory_space<vmem>>, vector<2x32xf32>
    %40 = vector.extract_strided_slice %39 {offsets = [0, 0], sizes = [1, 32], strides = [1, 1]} : vector<2x32xf32> to vector<1x32xf32>
    %41 = vector.extract_strided_slice %39 {offsets = [1, 0], sizes = [1, 32], strides = [1, 1]} : vector<2x32xf32> to vector<1x32xf32>
    %cst_18 = arith.constant dense<0.000000e+00> : vector<16xf32>
    %42 = vector.multi_reduction <add>, %1, %cst_18 [1] : vector<16x32xf32> to vector<16xf32>
    %43 = vector.shape_cast %42 : vector<16xf32> to vector<16x1xf32>
    %cst_19 = arith.constant 3.200000e+01 : f32
    %44 = vector.broadcast %cst_19 : f32 to vector<16x1xf32>
    %45 = arith.divf %43, %44 : vector<16x1xf32>
    %46 = vector.broadcast %45 : vector<16x1xf32> to vector<16x32xf32>
    %47 = arith.subf %1, %46 : vector<16x32xf32>
    %48 = arith.mulf %47, %47 : vector<16x32xf32>
    %cst_20 = arith.constant dense<0.000000e+00> : vector<16xf32>
    %49 = vector.multi_reduction <add>, %48, %cst_20 [1] : vector<16x32xf32> to vector<16xf32>
    %50 = vector.shape_cast %49 : vector<16xf32> to vector<16x1xf32>
    %cst_21 = arith.constant 3.200000e+01 : f32
    %51 = vector.broadcast %cst_21 : f32 to vector<16x1xf32>
    %52 = arith.divf %50, %51 : vector<16x1xf32>
    %53 = vector.broadcast %45 : vector<16x1xf32> to vector<16x32xf32>
    %54 = arith.subf %1, %53 : vector<16x32xf32>
    %cst_22 = arith.constant 9.99999974E-6 : f32
    %55 = vector.broadcast %cst_22 : f32 to vector<16x1xf32>
    %56 = arith.addf %52, %55 : vector<16x1xf32>
    %57 = math.rsqrt %56 : vector<16x1xf32>
    %58 = vector.broadcast %57 : vector<16x1xf32> to vector<16x32xf32>
    %59 = arith.mulf %54, %58 : vector<16x32xf32>
    %60 = vector.broadcast %40 : vector<1x32xf32> to vector<16x32xf32>
    %61 = arith.mulf %59, %60 : vector<16x32xf32>
    %62 = vector.broadcast %41 : vector<1x32xf32> to vector<16x32xf32>
    %63 = arith.addf %61, %62 : vector<16x32xf32>
    %c0_23 = arith.constant 0 : index
    %c0_24 = arith.constant 0 : index
    %64 = vector.load %arg7[%c0_23, %c0_24] : memref<32x32xbf16, #tpu.memory_space<vmem>>, vector<32x32xbf16>
    %65 = arith.truncf %63 : vector<16x32xf32> to vector<16x32xbf16>
    %cst_25 = arith.constant dense<0.000000e+00> : vector<16x32xf32>
    %66 = tpu.matmul %65, %64, %cst_25 {dimension_numbers = #tpu.dot_dimension_numbers<[1], [0], [0], [1], [0, 0, 1, 1], [], []>} : vector<16x32xbf16>, vector<32x32xbf16>, vector<16x32xf32> -> vector<16x32xf32>
    %c0_26 = arith.constant 0 : index
    %c0_27 = arith.constant 0 : index
    %67 = vector.load %arg8[%c0_26, %c0_27] : memref<1x32xf32, #tpu.memory_space<vmem>>, vector<1x32xf32>
    %68 = vector.broadcast %67 : vector<1x32xf32> to vector<16x32xf32>
    %69 = arith.addf %66, %68 : vector<16x32xf32>
    %70 = vector.shape_cast %69 : vector<16x32xf32> to vector<2x8x32xf32>
    %cst_28 = arith.constant 0.353553385 : f32
    %71 = vector.broadcast %cst_28 : f32 to vector<2x8x32xf32>
    %72 = arith.mulf %70, %71 : vector<2x8x32xf32>
    %cst_29 = arith.constant 0.000000e+00 : f32
    %73 = vector.broadcast %cst_29 : f32 to vector<16x32xf32>
    %74 = vector.extract_strided_slice %72 {offsets = [0, 0, 0], sizes = [2, 8, 8], strides = [1, 1, 1]} : vector<2x8x32xf32> to vector<2x8x8xf32>
    %75 = arith.truncf %74 : vector<2x8x8xf32> to vector<2x8x8xbf16>
    %76 = vector.extract_strided_slice %36 {offsets = [0, 0, 0], sizes = [2, 16, 8], strides = [1, 1, 1]} : vector<2x16x32xf32> to vector<2x16x8xf32>
    %77 = arith.truncf %76 : vector<2x16x8xf32> to vector<2x16x8xbf16>
    %78 = vector.extract_strided_slice %38 {offsets = [0, 0, 0], sizes = [2, 16, 8], strides = [1, 1, 1]} : vector<2x16x32xf32> to vector<2x16x8xf32>
    %79 = arith.truncf %78 : vector<2x16x8xf32> to vector<2x16x8xbf16>
    "tpu.trace_start"() <{level = 10 : i32, message = "bqd,bkd->bqk"}> : () -> ()
    %cst_30 = arith.constant dense<0.000000e+00> : vector<2x8x16xf32>
    %80 = tpu.matmul %75, %77, %cst_30 {dimension_numbers = #tpu.dot_dimension_numbers<[2], [2], [1], [1], [0, 0, 0, 1, 1, 1], [0], [0]>} : vector<2x8x8xbf16>, vector<2x16x8xbf16>, vector<2x8x16xf32> -> vector<2x8x16xf32>
    "tpu.trace_stop"() : () -> ()
    %cst_31 = arith.constant dense<0xFF800000> : vector<2x8xf32>
    %81 = vector.multi_reduction <maximumf>, %80, %cst_31 [2] : vector<2x8x16xf32> to vector<2x8xf32>
    %82 = vector.shape_cast %81 : vector<2x8xf32> to vector<2x8x1xf32>
    %83 = vector.broadcast %82 : vector<2x8x1xf32> to vector<2x8x16xf32>
    %84 = arith.subf %80, %83 : vector<2x8x16xf32>
    %85 = math.exp %84 : vector<2x8x16xf32>
    %cst_32 = arith.constant dense<0.000000e+00> : vector<2x8xf32>
    %86 = vector.multi_reduction <add>, %85, %cst_32 [2] : vector<2x8x16xf32> to vector<2x8xf32>
    %87 = vector.shape_cast %86 : vector<2x8xf32> to vector<2x8x1xf32>
    %88 = tpu.reciprocal %87 {approx = true} : vector<2x8x1xf32> -> vector<2x8x1xf32>
    %89 = vector.broadcast %88 : vector<2x8x1xf32> to vector<2x8x16xf32>
    %90 = arith.mulf %85, %89 : vector<2x8x16xf32>
    %91 = arith.truncf %90 : vector<2x8x16xf32> to vector<2x8x16xbf16>
    "tpu.trace_start"() <{level = 10 : i32, message = "bqk,bkd->bqd"}> : () -> ()
    %cst_33 = arith.constant dense<0.000000e+00> : vector<2x8x8xf32>
    %92 = tpu.matmul %91, %79, %cst_33 {dimension_numbers = #tpu.dot_dimension_numbers<[2], [1], [1], [2], [0, 0, 0, 1, 1, 2], [0], [0]>} : vector<2x8x16xbf16>, vector<2x16x8xbf16>, vector<2x8x8xf32> -> vector<2x8x8xf32>
    "tpu.trace_stop"() : () -> ()
    %93 = vector.shape_cast %92 : vector<2x8x8xf32> to vector<16x8xf32>
    %94 = arith.truncf %93 : vector<16x8xf32> to vector<16x8xbf16>
    %c0_34 = arith.constant 0 : index
    %c0_35 = arith.constant 0 : index
    %c0_36 = arith.constant 0 : index
    %95 = vector.load %arg9[%c0_34, %c0_35, %c0_36] : memref<4x8x32xbf16, #tpu.memory_space<vmem>>, vector<1x8x32xbf16>
    %96 = vector.shape_cast %95 : vector<1x8x32xbf16> to vector<8x32xbf16>
    %cst_37 = arith.constant dense<0.000000e+00> : vector<16x32xf32>
    %97 = tpu.matmul %94, %96, %cst_37 {dimension_numbers = #tpu.dot_dimension_numbers<[1], [0], [0], [1], [0, 0, 1, 1], [], []>} : vector<16x8xbf16>, vector<8x32xbf16>, vector<16x32xf32> -> vector<16x32xf32>
    %98 = arith.addf %73, %97 : vector<16x32xf32>
    %99 = vector.extract_strided_slice %72 {offsets = [0, 0, 8], sizes = [2, 8, 8], strides = [1, 1, 1]} : vector<2x8x32xf32> to vector<2x8x8xf32>
    %100 = arith.truncf %99 : vector<2x8x8xf32> to vector<2x8x8xbf16>
    %101 = vector.extract_strided_slice %36 {offsets = [0, 0, 8], sizes = [2, 16, 8], strides = [1, 1, 1]} : vector<2x16x32xf32> to vector<2x16x8xf32>
    %102 = arith.truncf %101 : vector<2x16x8xf32> to vector<2x16x8xbf16>
    %103 = vector.extract_strided_slice %38 {offsets = [0, 0, 8], sizes = [2, 16, 8], strides = [1, 1, 1]} : vector<2x16x32xf32> to vector<2x16x8xf32>
    %104 = arith.truncf %103 : vector<2x16x8xf32> to vector<2x16x8xbf16>
    "tpu.trace_start"() <{level = 10 : i32, message = "bqd,bkd->bqk"}> : () -> ()
    %cst_38 = arith.constant dense<0.000000e+00> : vector<2x8x16xf32>
    %105 = tpu.matmul %100, %102, %cst_38 {dimension_numbers = #tpu.dot_dimension_numbers<[2], [2], [1], [1], [0, 0, 0, 1, 1, 1], [0], [0]>} : vector<2x8x8xbf16>, vector<2x16x8xbf16>, vector<2x8x16xf32> -> vector<2x8x16xf32>
    "tpu.trace_stop"() : () -> ()
    %cst_39 = arith.constant dense<0xFF800000> : vector<2x8xf32>
    %106 = vector.multi_reduction <maximumf>, %105, %cst_39 [2] : vector<2x8x16xf32> to vector<2x8xf32>
    %107 = vector.shape_cast %106 : vector<2x8xf32> to vector<2x8x1xf32>
    %108 = vector.broadcast %107 : vector<2x8x1xf32> to vector<2x8x16xf32>
    %109 = arith.subf %105, %108 : vector<2x8x16xf32>
    %110 = math.exp %109 : vector<2x8x16xf32>
    %cst_40 = arith.constant dense<0.000000e+00> : vector<2x8xf32>
    %111 = vector.multi_reduction <add>, %110, %cst_40 [2] : vector<2x8x16xf32> to vector<2x8xf32>
    %112 = vector.shape_cast %111 : vector<2x8xf32> to vector<2x8x1xf32>
    %113 = tpu.reciprocal %112 {approx = true} : vector<2x8x1xf32> -> vector<2x8x1xf32>
    %114 = vector.broadcast %113 : vector<2x8x1xf32> to vector<2x8x16xf32>
    %115 = arith.mulf %110, %114 : vector<2x8x16xf32>
    %116 = arith.truncf %115 : vector<2x8x16xf32> to vector<2x8x16xbf16>
    "tpu.trace_start"() <{level = 10 : i32, message = "bqk,bkd->bqd"}> : () -> ()
    %cst_41 = arith.constant dense<0.000000e+00> : vector<2x8x8xf32>
    %117 = tpu.matmul %116, %104, %cst_41 {dimension_numbers = #tpu.dot_dimension_numbers<[2], [1], [1], [2], [0, 0, 0, 1, 1, 2], [0], [0]>} : vector<2x8x16xbf16>, vector<2x16x8xbf16>, vector<2x8x8xf32> -> vector<2x8x8xf32>
    "tpu.trace_stop"() : () -> ()
    %118 = vector.shape_cast %117 : vector<2x8x8xf32> to vector<16x8xf32>
    %119 = arith.truncf %118 : vector<16x8xf32> to vector<16x8xbf16>
    %c1 = arith.constant 1 : index
    %c0_42 = arith.constant 0 : index
    %c0_43 = arith.constant 0 : index
    %120 = vector.load %arg9[%c1, %c0_42, %c0_43] : memref<4x8x32xbf16, #tpu.memory_space<vmem>>, vector<1x8x32xbf16>
    %121 = vector.shape_cast %120 : vector<1x8x32xbf16> to vector<8x32xbf16>
    %cst_44 = arith.constant dense<0.000000e+00> : vector<16x32xf32>
    %122 = tpu.matmul %119, %121, %cst_44 {dimension_numbers = #tpu.dot_dimension_numbers<[1], [0], [0], [1], [0, 0, 1, 1], [], []>} : vector<16x8xbf16>, vector<8x32xbf16>, vector<16x32xf32> -> vector<16x32xf32>
    %123 = arith.addf %98, %122 : vector<16x32xf32>
    %124 = vector.extract_strided_slice %72 {offsets = [0, 0, 16], sizes = [2, 8, 8], strides = [1, 1, 1]} : vector<2x8x32xf32> to vector<2x8x8xf32>
    %125 = arith.truncf %124 : vector<2x8x8xf32> to vector<2x8x8xbf16>
    %126 = vector.extract_strided_slice %36 {offsets = [0, 0, 16], sizes = [2, 16, 8], strides = [1, 1, 1]} : vector<2x16x32xf32> to vector<2x16x8xf32>
    %127 = arith.truncf %126 : vector<2x16x8xf32> to vector<2x16x8xbf16>
    %128 = vector.extract_strided_slice %38 {offsets = [0, 0, 16], sizes = [2, 16, 8], strides = [1, 1, 1]} : vector<2x16x32xf32> to vector<2x16x8xf32>
    %129 = arith.truncf %128 : vector<2x16x8xf32> to vector<2x16x8xbf16>
    "tpu.trace_start"() <{level = 10 : i32, message = "bqd,bkd->bqk"}> : () -> ()
    %cst_45 = arith.constant dense<0.000000e+00> : vector<2x8x16xf32>
    %130 = tpu.matmul %125, %127, %cst_45 {dimension_numbers = #tpu.dot_dimension_numbers<[2], [2], [1], [1], [0, 0, 0, 1, 1, 1], [0], [0]>} : vector<2x8x8xbf16>, vector<2x16x8xbf16>, vector<2x8x16xf32> -> vector<2x8x16xf32>
    "tpu.trace_stop"() : () -> ()
    %cst_46 = arith.constant dense<0xFF800000> : vector<2x8xf32>
    %131 = vector.multi_reduction <maximumf>, %130, %cst_46 [2] : vector<2x8x16xf32> to vector<2x8xf32>
    %132 = vector.shape_cast %131 : vector<2x8xf32> to vector<2x8x1xf32>
    %133 = vector.broadcast %132 : vector<2x8x1xf32> to vector<2x8x16xf32>
    %134 = arith.subf %130, %133 : vector<2x8x16xf32>
    %135 = math.exp %134 : vector<2x8x16xf32>
    %cst_47 = arith.constant dense<0.000000e+00> : vector<2x8xf32>
    %136 = vector.multi_reduction <add>, %135, %cst_47 [2] : vector<2x8x16xf32> to vector<2x8xf32>
    %137 = vector.shape_cast %136 : vector<2x8xf32> to vector<2x8x1xf32>
    %138 = tpu.reciprocal %137 {approx = true} : vector<2x8x1xf32> -> vector<2x8x1xf32>
    %139 = vector.broadcast %138 : vector<2x8x1xf32> to vector<2x8x16xf32>
    %140 = arith.mulf %135, %139 : vector<2x8x16xf32>
    %141 = arith.truncf %140 : vector<2x8x16xf32> to vector<2x8x16xbf16>
    "tpu.trace_start"() <{level = 10 : i32, message = "bqk,bkd->bqd"}> : () -> ()
    %cst_48 = arith.constant dense<0.000000e+00> : vector<2x8x8xf32>
    %142 = tpu.matmul %141, %129, %cst_48 {dimension_numbers = #tpu.dot_dimension_numbers<[2], [1], [1], [2], [0, 0, 0, 1, 1, 2], [0], [0]>} : vector<2x8x16xbf16>, vector<2x16x8xbf16>, vector<2x8x8xf32> -> vector<2x8x8xf32>
    "tpu.trace_stop"() : () -> ()
    %143 = vector.shape_cast %142 : vector<2x8x8xf32> to vector<16x8xf32>
    %144 = arith.truncf %143 : vector<16x8xf32> to vector<16x8xbf16>
    %c2 = arith.constant 2 : index
    %c0_49 = arith.constant 0 : index
    %c0_50 = arith.constant 0 : index
    %145 = vector.load %arg9[%c2, %c0_49, %c0_50] : memref<4x8x32xbf16, #tpu.memory_space<vmem>>, vector<1x8x32xbf16>
    %146 = vector.shape_cast %145 : vector<1x8x32xbf16> to vector<8x32xbf16>
    %cst_51 = arith.constant dense<0.000000e+00> : vector<16x32xf32>
    %147 = tpu.matmul %144, %146, %cst_51 {dimension_numbers = #tpu.dot_dimension_numbers<[1], [0], [0], [1], [0, 0, 1, 1], [], []>} : vector<16x8xbf16>, vector<8x32xbf16>, vector<16x32xf32> -> vector<16x32xf32>
    %148 = arith.addf %123, %147 : vector<16x32xf32>
    %149 = vector.extract_strided_slice %72 {offsets = [0, 0, 24], sizes = [2, 8, 8], strides = [1, 1, 1]} : vector<2x8x32xf32> to vector<2x8x8xf32>
    %150 = arith.truncf %149 : vector<2x8x8xf32> to vector<2x8x8xbf16>
    %151 = vector.extract_strided_slice %36 {offsets = [0, 0, 24], sizes = [2, 16, 8], strides = [1, 1, 1]} : vector<2x16x32xf32> to vector<2x16x8xf32>
    %152 = arith.truncf %151 : vector<2x16x8xf32> to vector<2x16x8xbf16>
    %153 = vector.extract_strided_slice %38 {offsets = [0, 0, 24], sizes = [2, 16, 8], strides = [1, 1, 1]} : vector<2x16x32xf32> to vector<2x16x8xf32>
    %154 = arith.truncf %153 : vector<2x16x8xf32> to vector<2x16x8xbf16>
    "tpu.trace_start"() <{level = 10 : i32, message = "bqd,bkd->bqk"}> : () -> ()
    %cst_52 = arith.constant dense<0.000000e+00> : vector<2x8x16xf32>
    %155 = tpu.matmul %150, %152, %cst_52 {dimension_numbers = #tpu.dot_dimension_numbers<[2], [2], [1], [1], [0, 0, 0, 1, 1, 1], [0], [0]>} : vector<2x8x8xbf16>, vector<2x16x8xbf16>, vector<2x8x16xf32> -> vector<2x8x16xf32>
    "tpu.trace_stop"() : () -> ()
    %cst_53 = arith.constant dense<0xFF800000> : vector<2x8xf32>
    %156 = vector.multi_reduction <maximumf>, %155, %cst_53 [2] : vector<2x8x16xf32> to vector<2x8xf32>
    %157 = vector.shape_cast %156 : vector<2x8xf32> to vector<2x8x1xf32>
    %158 = vector.broadcast %157 : vector<2x8x1xf32> to vector<2x8x16xf32>
    %159 = arith.subf %155, %158 : vector<2x8x16xf32>
    %160 = math.exp %159 : vector<2x8x16xf32>
    %cst_54 = arith.constant dense<0.000000e+00> : vector<2x8xf32>
    %161 = vector.multi_reduction <add>, %160, %cst_54 [2] : vector<2x8x16xf32> to vector<2x8xf32>
    %162 = vector.shape_cast %161 : vector<2x8xf32> to vector<2x8x1xf32>
    %163 = tpu.reciprocal %162 {approx = true} : vector<2x8x1xf32> -> vector<2x8x1xf32>
    %164 = vector.broadcast %163 : vector<2x8x1xf32> to vector<2x8x16xf32>
    %165 = arith.mulf %160, %164 : vector<2x8x16xf32>
    %166 = arith.truncf %165 : vector<2x8x16xf32> to vector<2x8x16xbf16>
    "tpu.trace_start"() <{level = 10 : i32, message = "bqk,bkd->bqd"}> : () -> ()
    %cst_55 = arith.constant dense<0.000000e+00> : vector<2x8x8xf32>
    %167 = tpu.matmul %166, %154, %cst_55 {dimension_numbers = #tpu.dot_dimension_numbers<[2], [1], [1], [2], [0, 0, 0, 1, 1, 2], [0], [0]>} : vector<2x8x16xbf16>, vector<2x16x8xbf16>, vector<2x8x8xf32> -> vector<2x8x8xf32>
    "tpu.trace_stop"() : () -> ()
    %168 = vector.shape_cast %167 : vector<2x8x8xf32> to vector<16x8xf32>
    %169 = arith.truncf %168 : vector<16x8xf32> to vector<16x8xbf16>
    %c3 = arith.constant 3 : index
    %c0_56 = arith.constant 0 : index
    %c0_57 = arith.constant 0 : index
    %170 = vector.load %arg9[%c3, %c0_56, %c0_57] : memref<4x8x32xbf16, #tpu.memory_space<vmem>>, vector<1x8x32xbf16>
    %171 = vector.shape_cast %170 : vector<1x8x32xbf16> to vector<8x32xbf16>
    %cst_58 = arith.constant dense<0.000000e+00> : vector<16x32xf32>
    %172 = tpu.matmul %169, %171, %cst_58 {dimension_numbers = #tpu.dot_dimension_numbers<[1], [0], [0], [1], [0, 0, 1, 1], [], []>} : vector<16x8xbf16>, vector<8x32xbf16>, vector<16x32xf32> -> vector<16x32xf32>
    %173 = arith.addf %148, %172 : vector<16x32xf32>
    %174 = arith.addf %1, %173 : vector<16x32xf32>
    %c0_59 = arith.constant 0 : index
    %c0_60 = arith.constant 0 : index
    %175 = vector.load %arg10[%c0_59, %c0_60] : memref<1x32xf32, #tpu.memory_space<vmem>>, vector<1x32xf32>
    %176 = vector.broadcast %175 : vector<1x32xf32> to vector<16x32xf32>
    %177 = arith.addf %174, %176 : vector<16x32xf32>
    %c0_61 = arith.constant 0 : index
    %c0_62 = arith.constant 0 : index
    %178 = vector.load %arg11[%c0_61, %c0_62] : memref<2x32xf32, #tpu.memory_space<vmem>>, vector<2x32xf32>
    %179 = vector.extract_strided_slice %178 {offsets = [0, 0], sizes = [1, 32], strides = [1, 1]} : vector<2x32xf32> to vector<1x32xf32>
    %180 = vector.extract_strided_slice %178 {offsets = [1, 0], sizes = [1, 32], strides = [1, 1]} : vector<2x32xf32> to vector<1x32xf32>
    %cst_63 = arith.constant dense<0.000000e+00> : vector<16xf32>
    %181 = vector.multi_reduction <add>, %177, %cst_63 [1] : vector<16x32xf32> to vector<16xf32>
    %182 = vector.shape_cast %181 : vector<16xf32> to vector<16x1xf32>
    %cst_64 = arith.constant 3.200000e+01 : f32
    %183 = vector.broadcast %cst_64 : f32 to vector<16x1xf32>
    %184 = arith.divf %182, %183 : vector<16x1xf32>
    %185 = vector.broadcast %184 : vector<16x1xf32> to vector<16x32xf32>
    %186 = arith.subf %177, %185 : vector<16x32xf32>
    %187 = arith.mulf %186, %186 : vector<16x32xf32>
    %cst_65 = arith.constant dense<0.000000e+00> : vector<16xf32>
    %188 = vector.multi_reduction <add>, %187, %cst_65 [1] : vector<16x32xf32> to vector<16xf32>
    %189 = vector.shape_cast %188 : vector<16xf32> to vector<16x1xf32>
    %cst_66 = arith.constant 3.200000e+01 : f32
    %190 = vector.broadcast %cst_66 : f32 to vector<16x1xf32>
    %191 = arith.divf %189, %190 : vector<16x1xf32>
    %192 = vector.broadcast %184 : vector<16x1xf32> to vector<16x32xf32>
    %193 = arith.subf %177, %192 : vector<16x32xf32>
    %cst_67 = arith.constant 9.99999974E-6 : f32
    %194 = vector.broadcast %cst_67 : f32 to vector<16x1xf32>
    %195 = arith.addf %191, %194 : vector<16x1xf32>
    %196 = math.rsqrt %195 : vector<16x1xf32>
    %197 = vector.broadcast %196 : vector<16x1xf32> to vector<16x32xf32>
    %198 = arith.mulf %193, %197 : vector<16x32xf32>
    %199 = vector.broadcast %179 : vector<1x32xf32> to vector<16x32xf32>
    %200 = arith.mulf %198, %199 : vector<16x32xf32>
    %201 = vector.broadcast %180 : vector<1x32xf32> to vector<16x32xf32>
    %202 = arith.addf %200, %201 : vector<16x32xf32>
    %c0_68 = arith.constant 0 : index
    %c0_69 = arith.constant 0 : index
    %203 = vector.load %arg12[%c0_68, %c0_69] : memref<32x96xbf16, #tpu.memory_space<vmem>>, vector<32x96xbf16>
    %204 = arith.truncf %202 : vector<16x32xf32> to vector<16x32xbf16>
    %cst_70 = arith.constant dense<0.000000e+00> : vector<16x96xf32>
    %205 = tpu.matmul %204, %203, %cst_70 {dimension_numbers = #tpu.dot_dimension_numbers<[1], [0], [0], [1], [0, 0, 1, 1], [], []>} : vector<16x32xbf16>, vector<32x96xbf16>, vector<16x96xf32> -> vector<16x96xf32>
    %c0_71 = arith.constant 0 : index
    %c0_72 = arith.constant 0 : index
    %206 = vector.load %arg13[%c0_71, %c0_72] : memref<1x96xf32, #tpu.memory_space<vmem>>, vector<1x96xf32>
    %207 = vector.broadcast %206 : vector<1x96xf32> to vector<16x96xf32>
    %208 = arith.addf %205, %207 : vector<16x96xf32>
    %209 = vector.extract_strided_slice %208 {offsets = [0, 0], sizes = [16, 32], strides = [1, 1]} : vector<16x96xf32> to vector<16x32xf32>
    %210 = vector.shape_cast %209 : vector<16x32xf32> to vector<2x8x32xf32>
    %211 = vector.extract_strided_slice %208 {offsets = [0, 32], sizes = [16, 32], strides = [1, 1]} : vector<16x96xf32> to vector<16x32xf32>
    %212 = vector.shape_cast %211 : vector<16x32xf32> to vector<2x8x32xf32>
    %213 = vector.extract_strided_slice %208 {offsets = [0, 64], sizes = [16, 32], strides = [1, 1]} : vector<16x96xf32> to vector<16x32xf32>
    %214 = vector.shape_cast %213 : vector<16x32xf32> to vector<2x8x32xf32>
    %cst_73 = arith.constant 0.353553385 : f32
    %215 = vector.broadcast %cst_73 : f32 to vector<2x8x32xf32>
    %216 = arith.mulf %210, %215 : vector<2x8x32xf32>
    %cst_74 = arith.constant 0.000000e+00 : f32
    %217 = vector.broadcast %cst_74 : f32 to vector<16x32xf32>
    %218 = vector.extract_strided_slice %216 {offsets = [0, 0, 0], sizes = [2, 8, 8], strides = [1, 1, 1]} : vector<2x8x32xf32> to vector<2x8x8xf32>
    %219 = arith.truncf %218 : vector<2x8x8xf32> to vector<2x8x8xbf16>
    %220 = vector.extract_strided_slice %212 {offsets = [0, 0, 0], sizes = [2, 8, 8], strides = [1, 1, 1]} : vector<2x8x32xf32> to vector<2x8x8xf32>
    %221 = arith.truncf %220 : vector<2x8x8xf32> to vector<2x8x8xbf16>
    %222 = vector.extract_strided_slice %214 {offsets = [0, 0, 0], sizes = [2, 8, 8], strides = [1, 1, 1]} : vector<2x8x32xf32> to vector<2x8x8xf32>
    %223 = arith.truncf %222 : vector<2x8x8xf32> to vector<2x8x8xbf16>
    "tpu.trace_start"() <{level = 10 : i32, message = "bqd,bkd->bqk"}> : () -> ()
    %cst_75 = arith.constant dense<0.000000e+00> : vector<2x8x8xf32>
    %224 = tpu.matmul %219, %221, %cst_75 {dimension_numbers = #tpu.dot_dimension_numbers<[2], [2], [1], [1], [0, 0, 0, 1, 1, 1], [0], [0]>} : vector<2x8x8xbf16>, vector<2x8x8xbf16>, vector<2x8x8xf32> -> vector<2x8x8xf32>
    "tpu.trace_stop"() : () -> ()
    %cst_76 = arith.constant dense<0xFF800000> : vector<2x8xf32>
    %225 = vector.multi_reduction <maximumf>, %224, %cst_76 [2] : vector<2x8x8xf32> to vector<2x8xf32>
    %226 = vector.shape_cast %225 : vector<2x8xf32> to vector<2x8x1xf32>
    %227 = vector.broadcast %226 : vector<2x8x1xf32> to vector<2x8x8xf32>
    %228 = arith.subf %224, %227 : vector<2x8x8xf32>
    %229 = math.exp %228 : vector<2x8x8xf32>
    %cst_77 = arith.constant dense<0.000000e+00> : vector<2x8xf32>
    %230 = vector.multi_reduction <add>, %229, %cst_77 [2] : vector<2x8x8xf32> to vector<2x8xf32>
    %231 = vector.shape_cast %230 : vector<2x8xf32> to vector<2x8x1xf32>
    %232 = tpu.reciprocal %231 {approx = true} : vector<2x8x1xf32> -> vector<2x8x1xf32>
    %233 = vector.broadcast %232 : vector<2x8x1xf32> to vector<2x8x8xf32>
    %234 = arith.mulf %229, %233 : vector<2x8x8xf32>
    %235 = arith.truncf %234 : vector<2x8x8xf32> to vector<2x8x8xbf16>
    "tpu.trace_start"() <{level = 10 : i32, message = "bqk,bkd->bqd"}> : () -> ()
    %cst_78 = arith.constant dense<0.000000e+00> : vector<2x8x8xf32>
    %236 = tpu.matmul %235, %223, %cst_78 {dimension_numbers = #tpu.dot_dimension_numbers<[2], [1], [1], [2], [0, 0, 0, 1, 1, 2], [0], [0]>} : vector<2x8x8xbf16>, vector<2x8x8xbf16>, vector<2x8x8xf32> -> vector<2x8x8xf32>
    "tpu.trace_stop"() : () -> ()
    %237 = vector.shape_cast %236 : vector<2x8x8xf32> to vector<16x8xf32>
    %238 = arith.truncf %237 : vector<16x8xf32> to vector<16x8xbf16>
    %c0_79 = arith.constant 0 : index
    %c0_80 = arith.constant 0 : index
    %c0_81 = arith.constant 0 : index
    %239 = vector.load %arg14[%c0_79, %c0_80, %c0_81] : memref<4x8x32xbf16, #tpu.memory_space<vmem>>, vector<1x8x32xbf16>
    %240 = vector.shape_cast %239 : vector<1x8x32xbf16> to vector<8x32xbf16>
    %cst_82 = arith.constant dense<0.000000e+00> : vector<16x32xf32>
    %241 = tpu.matmul %238, %240, %cst_82 {dimension_numbers = #tpu.dot_dimension_numbers<[1], [0], [0], [1], [0, 0, 1, 1], [], []>} : vector<16x8xbf16>, vector<8x32xbf16>, vector<16x32xf32> -> vector<16x32xf32>
    %242 = arith.addf %217, %241 : vector<16x32xf32>
    %243 = vector.extract_strided_slice %216 {offsets = [0, 0, 8], sizes = [2, 8, 8], strides = [1, 1, 1]} : vector<2x8x32xf32> to vector<2x8x8xf32>
    %244 = arith.truncf %243 : vector<2x8x8xf32> to vector<2x8x8xbf16>
    %245 = vector.extract_strided_slice %212 {offsets = [0, 0, 8], sizes = [2, 8, 8], strides = [1, 1, 1]} : vector<2x8x32xf32> to vector<2x8x8xf32>
    %246 = arith.truncf %245 : vector<2x8x8xf32> to vector<2x8x8xbf16>
    %247 = vector.extract_strided_slice %214 {offsets = [0, 0, 8], sizes = [2, 8, 8], strides = [1, 1, 1]} : vector<2x8x32xf32> to vector<2x8x8xf32>
    %248 = arith.truncf %247 : vector<2x8x8xf32> to vector<2x8x8xbf16>
    "tpu.trace_start"() <{level = 10 : i32, message = "bqd,bkd->bqk"}> : () -> ()
    %cst_83 = arith.constant dense<0.000000e+00> : vector<2x8x8xf32>
    %249 = tpu.matmul %244, %246, %cst_83 {dimension_numbers = #tpu.dot_dimension_numbers<[2], [2], [1], [1], [0, 0, 0, 1, 1, 1], [0], [0]>} : vector<2x8x8xbf16>, vector<2x8x8xbf16>, vector<2x8x8xf32> -> vector<2x8x8xf32>
    "tpu.trace_stop"() : () -> ()
    %cst_84 = arith.constant dense<0xFF800000> : vector<2x8xf32>
    %250 = vector.multi_reduction <maximumf>, %249, %cst_84 [2] : vector<2x8x8xf32> to vector<2x8xf32>
    %251 = vector.shape_cast %250 : vector<2x8xf32> to vector<2x8x1xf32>
    %252 = vector.broadcast %251 : vector<2x8x1xf32> to vector<2x8x8xf32>
    %253 = arith.subf %249, %252 : vector<2x8x8xf32>
    %254 = math.exp %253 : vector<2x8x8xf32>
    %cst_85 = arith.constant dense<0.000000e+00> : vector<2x8xf32>
    %255 = vector.multi_reduction <add>, %254, %cst_85 [2] : vector<2x8x8xf32> to vector<2x8xf32>
    %256 = vector.shape_cast %255 : vector<2x8xf32> to vector<2x8x1xf32>
    %257 = tpu.reciprocal %256 {approx = true} : vector<2x8x1xf32> -> vector<2x8x1xf32>
    %258 = vector.broadcast %257 : vector<2x8x1xf32> to vector<2x8x8xf32>
    %259 = arith.mulf %254, %258 : vector<2x8x8xf32>
    %260 = arith.truncf %259 : vector<2x8x8xf32> to vector<2x8x8xbf16>
    "tpu.trace_start"() <{level = 10 : i32, message = "bqk,bkd->bqd"}> : () -> ()
    %cst_86 = arith.constant dense<0.000000e+00> : vector<2x8x8xf32>
    %261 = tpu.matmul %260, %248, %cst_86 {dimension_numbers = #tpu.dot_dimension_numbers<[2], [1], [1], [2], [0, 0, 0, 1, 1, 2], [0], [0]>} : vector<2x8x8xbf16>, vector<2x8x8xbf16>, vector<2x8x8xf32> -> vector<2x8x8xf32>
    "tpu.trace_stop"() : () -> ()
    %262 = vector.shape_cast %261 : vector<2x8x8xf32> to vector<16x8xf32>
    %263 = arith.truncf %262 : vector<16x8xf32> to vector<16x8xbf16>
    %c1_87 = arith.constant 1 : index
    %c0_88 = arith.constant 0 : index
    %c0_89 = arith.constant 0 : index
    %264 = vector.load %arg14[%c1_87, %c0_88, %c0_89] : memref<4x8x32xbf16, #tpu.memory_space<vmem>>, vector<1x8x32xbf16>
    %265 = vector.shape_cast %264 : vector<1x8x32xbf16> to vector<8x32xbf16>
    %cst_90 = arith.constant dense<0.000000e+00> : vector<16x32xf32>
    %266 = tpu.matmul %263, %265, %cst_90 {dimension_numbers = #tpu.dot_dimension_numbers<[1], [0], [0], [1], [0, 0, 1, 1], [], []>} : vector<16x8xbf16>, vector<8x32xbf16>, vector<16x32xf32> -> vector<16x32xf32>
    %267 = arith.addf %242, %266 : vector<16x32xf32>
    %268 = vector.extract_strided_slice %216 {offsets = [0, 0, 16], sizes = [2, 8, 8], strides = [1, 1, 1]} : vector<2x8x32xf32> to vector<2x8x8xf32>
    %269 = arith.truncf %268 : vector<2x8x8xf32> to vector<2x8x8xbf16>
    %270 = vector.extract_strided_slice %212 {offsets = [0, 0, 16], sizes = [2, 8, 8], strides = [1, 1, 1]} : vector<2x8x32xf32> to vector<2x8x8xf32>
    %271 = arith.truncf %270 : vector<2x8x8xf32> to vector<2x8x8xbf16>
    %272 = vector.extract_strided_slice %214 {offsets = [0, 0, 16], sizes = [2, 8, 8], strides = [1, 1, 1]} : vector<2x8x32xf32> to vector<2x8x8xf32>
    %273 = arith.truncf %272 : vector<2x8x8xf32> to vector<2x8x8xbf16>
    "tpu.trace_start"() <{level = 10 : i32, message = "bqd,bkd->bqk"}> : () -> ()
    %cst_91 = arith.constant dense<0.000000e+00> : vector<2x8x8xf32>
    %274 = tpu.matmul %269, %271, %cst_91 {dimension_numbers = #tpu.dot_dimension_numbers<[2], [2], [1], [1], [0, 0, 0, 1, 1, 1], [0], [0]>} : vector<2x8x8xbf16>, vector<2x8x8xbf16>, vector<2x8x8xf32> -> vector<2x8x8xf32>
    "tpu.trace_stop"() : () -> ()
    %cst_92 = arith.constant dense<0xFF800000> : vector<2x8xf32>
    %275 = vector.multi_reduction <maximumf>, %274, %cst_92 [2] : vector<2x8x8xf32> to vector<2x8xf32>
    %276 = vector.shape_cast %275 : vector<2x8xf32> to vector<2x8x1xf32>
    %277 = vector.broadcast %276 : vector<2x8x1xf32> to vector<2x8x8xf32>
    %278 = arith.subf %274, %277 : vector<2x8x8xf32>
    %279 = math.exp %278 : vector<2x8x8xf32>
    %cst_93 = arith.constant dense<0.000000e+00> : vector<2x8xf32>
    %280 = vector.multi_reduction <add>, %279, %cst_93 [2] : vector<2x8x8xf32> to vector<2x8xf32>
    %281 = vector.shape_cast %280 : vector<2x8xf32> to vector<2x8x1xf32>
    %282 = tpu.reciprocal %281 {approx = true} : vector<2x8x1xf32> -> vector<2x8x1xf32>
    %283 = vector.broadcast %282 : vector<2x8x1xf32> to vector<2x8x8xf32>
    %284 = arith.mulf %279, %283 : vector<2x8x8xf32>
    %285 = arith.truncf %284 : vector<2x8x8xf32> to vector<2x8x8xbf16>
    "tpu.trace_start"() <{level = 10 : i32, message = "bqk,bkd->bqd"}> : () -> ()
    %cst_94 = arith.constant dense<0.000000e+00> : vector<2x8x8xf32>
    %286 = tpu.matmul %285, %273, %cst_94 {dimension_numbers = #tpu.dot_dimension_numbers<[2], [1], [1], [2], [0, 0, 0, 1, 1, 2], [0], [0]>} : vector<2x8x8xbf16>, vector<2x8x8xbf16>, vector<2x8x8xf32> -> vector<2x8x8xf32>
    "tpu.trace_stop"() : () -> ()
    %287 = vector.shape_cast %286 : vector<2x8x8xf32> to vector<16x8xf32>
    %288 = arith.truncf %287 : vector<16x8xf32> to vector<16x8xbf16>
    %c2_95 = arith.constant 2 : index
    %c0_96 = arith.constant 0 : index
    %c0_97 = arith.constant 0 : index
    %289 = vector.load %arg14[%c2_95, %c0_96, %c0_97] : memref<4x8x32xbf16, #tpu.memory_space<vmem>>, vector<1x8x32xbf16>
    %290 = vector.shape_cast %289 : vector<1x8x32xbf16> to vector<8x32xbf16>
    %cst_98 = arith.constant dense<0.000000e+00> : vector<16x32xf32>
    %291 = tpu.matmul %288, %290, %cst_98 {dimension_numbers = #tpu.dot_dimension_numbers<[1], [0], [0], [1], [0, 0, 1, 1], [], []>} : vector<16x8xbf16>, vector<8x32xbf16>, vector<16x32xf32> -> vector<16x32xf32>
    %292 = arith.addf %267, %291 : vector<16x32xf32>
    %293 = vector.extract_strided_slice %216 {offsets = [0, 0, 24], sizes = [2, 8, 8], strides = [1, 1, 1]} : vector<2x8x32xf32> to vector<2x8x8xf32>
    %294 = arith.truncf %293 : vector<2x8x8xf32> to vector<2x8x8xbf16>
    %295 = vector.extract_strided_slice %212 {offsets = [0, 0, 24], sizes = [2, 8, 8], strides = [1, 1, 1]} : vector<2x8x32xf32> to vector<2x8x8xf32>
    %296 = arith.truncf %295 : vector<2x8x8xf32> to vector<2x8x8xbf16>
    %297 = vector.extract_strided_slice %214 {offsets = [0, 0, 24], sizes = [2, 8, 8], strides = [1, 1, 1]} : vector<2x8x32xf32> to vector<2x8x8xf32>
    %298 = arith.truncf %297 : vector<2x8x8xf32> to vector<2x8x8xbf16>
    "tpu.trace_start"() <{level = 10 : i32, message = "bqd,bkd->bqk"}> : () -> ()
    %cst_99 = arith.constant dense<0.000000e+00> : vector<2x8x8xf32>
    %299 = tpu.matmul %294, %296, %cst_99 {dimension_numbers = #tpu.dot_dimension_numbers<[2], [2], [1], [1], [0, 0, 0, 1, 1, 1], [0], [0]>} : vector<2x8x8xbf16>, vector<2x8x8xbf16>, vector<2x8x8xf32> -> vector<2x8x8xf32>
    "tpu.trace_stop"() : () -> ()
    %cst_100 = arith.constant dense<0xFF800000> : vector<2x8xf32>
    %300 = vector.multi_reduction <maximumf>, %299, %cst_100 [2] : vector<2x8x8xf32> to vector<2x8xf32>
    %301 = vector.shape_cast %300 : vector<2x8xf32> to vector<2x8x1xf32>
    %302 = vector.broadcast %301 : vector<2x8x1xf32> to vector<2x8x8xf32>
    %303 = arith.subf %299, %302 : vector<2x8x8xf32>
    %304 = math.exp %303 : vector<2x8x8xf32>
    %cst_101 = arith.constant dense<0.000000e+00> : vector<2x8xf32>
    %305 = vector.multi_reduction <add>, %304, %cst_101 [2] : vector<2x8x8xf32> to vector<2x8xf32>
    %306 = vector.shape_cast %305 : vector<2x8xf32> to vector<2x8x1xf32>
    %307 = tpu.reciprocal %306 {approx = true} : vector<2x8x1xf32> -> vector<2x8x1xf32>
    %308 = vector.broadcast %307 : vector<2x8x1xf32> to vector<2x8x8xf32>
    %309 = arith.mulf %304, %308 : vector<2x8x8xf32>
    %310 = arith.truncf %309 : vector<2x8x8xf32> to vector<2x8x8xbf16>
    "tpu.trace_start"() <{level = 10 : i32, message = "bqk,bkd->bqd"}> : () -> ()
    %cst_102 = arith.constant dense<0.000000e+00> : vector<2x8x8xf32>
    %311 = tpu.matmul %310, %298, %cst_102 {dimension_numbers = #tpu.dot_dimension_numbers<[2], [1], [1], [2], [0, 0, 0, 1, 1, 2], [0], [0]>} : vector<2x8x8xbf16>, vector<2x8x8xbf16>, vector<2x8x8xf32> -> vector<2x8x8xf32>
    "tpu.trace_stop"() : () -> ()
    %312 = vector.shape_cast %311 : vector<2x8x8xf32> to vector<16x8xf32>
    %313 = arith.truncf %312 : vector<16x8xf32> to vector<16x8xbf16>
    %c3_103 = arith.constant 3 : index
    %c0_104 = arith.constant 0 : index
    %c0_105 = arith.constant 0 : index
    %314 = vector.load %arg14[%c3_103, %c0_104, %c0_105] : memref<4x8x32xbf16, #tpu.memory_space<vmem>>, vector<1x8x32xbf16>
    %315 = vector.shape_cast %314 : vector<1x8x32xbf16> to vector<8x32xbf16>
    %cst_106 = arith.constant dense<0.000000e+00> : vector<16x32xf32>
    %316 = tpu.matmul %313, %315, %cst_106 {dimension_numbers = #tpu.dot_dimension_numbers<[1], [0], [0], [1], [0, 0, 1, 1], [], []>} : vector<16x8xbf16>, vector<8x32xbf16>, vector<16x32xf32> -> vector<16x32xf32>
    %317 = arith.addf %292, %316 : vector<16x32xf32>
    %318 = arith.addf %177, %317 : vector<16x32xf32>
    %c0_107 = arith.constant 0 : index
    %c0_108 = arith.constant 0 : index
    %319 = vector.load %arg15[%c0_107, %c0_108] : memref<1x32xf32, #tpu.memory_space<vmem>>, vector<1x32xf32>
    %320 = vector.broadcast %319 : vector<1x32xf32> to vector<16x32xf32>
    %321 = arith.addf %318, %320 : vector<16x32xf32>
    %c0_109 = arith.constant 0 : index
    %c0_110 = arith.constant 0 : index
    %322 = vector.load %arg16[%c0_109, %c0_110] : memref<2x32xf32, #tpu.memory_space<vmem>>, vector<2x32xf32>
    %323 = vector.extract_strided_slice %322 {offsets = [0, 0], sizes = [1, 32], strides = [1, 1]} : vector<2x32xf32> to vector<1x32xf32>
    %324 = vector.extract_strided_slice %322 {offsets = [1, 0], sizes = [1, 32], strides = [1, 1]} : vector<2x32xf32> to vector<1x32xf32>
    %cst_111 = arith.constant dense<0.000000e+00> : vector<16xf32>
    %325 = vector.multi_reduction <add>, %321, %cst_111 [1] : vector<16x32xf32> to vector<16xf32>
    %326 = vector.shape_cast %325 : vector<16xf32> to vector<16x1xf32>
    %cst_112 = arith.constant 3.200000e+01 : f32
    %327 = vector.broadcast %cst_112 : f32 to vector<16x1xf32>
    %328 = arith.divf %326, %327 : vector<16x1xf32>
    %329 = vector.broadcast %328 : vector<16x1xf32> to vector<16x32xf32>
    %330 = arith.subf %321, %329 : vector<16x32xf32>
    %331 = arith.mulf %330, %330 : vector<16x32xf32>
    %cst_113 = arith.constant dense<0.000000e+00> : vector<16xf32>
    %332 = vector.multi_reduction <add>, %331, %cst_113 [1] : vector<16x32xf32> to vector<16xf32>
    %333 = vector.shape_cast %332 : vector<16xf32> to vector<16x1xf32>
    %cst_114 = arith.constant 3.200000e+01 : f32
    %334 = vector.broadcast %cst_114 : f32 to vector<16x1xf32>
    %335 = arith.divf %333, %334 : vector<16x1xf32>
    %336 = vector.broadcast %328 : vector<16x1xf32> to vector<16x32xf32>
    %337 = arith.subf %321, %336 : vector<16x32xf32>
    %cst_115 = arith.constant 9.99999974E-6 : f32
    %338 = vector.broadcast %cst_115 : f32 to vector<16x1xf32>
    %339 = arith.addf %335, %338 : vector<16x1xf32>
    %340 = math.rsqrt %339 : vector<16x1xf32>
    %341 = vector.broadcast %340 : vector<16x1xf32> to vector<16x32xf32>
    %342 = arith.mulf %337, %341 : vector<16x32xf32>
    %343 = vector.broadcast %323 : vector<1x32xf32> to vector<16x32xf32>
    %344 = arith.mulf %342, %343 : vector<16x32xf32>
    %345 = vector.broadcast %324 : vector<1x32xf32> to vector<16x32xf32>
    %346 = arith.addf %344, %345 : vector<16x32xf32>
    %c0_116 = arith.constant 0 : index
    %c0_117 = arith.constant 0 : index
    %347 = vector.load %arg17[%c0_116, %c0_117] : memref<32x128xbf16, #tpu.memory_space<vmem>>, vector<32x128xbf16>
    %348 = arith.truncf %346 : vector<16x32xf32> to vector<16x32xbf16>
    %cst_118 = arith.constant dense<0.000000e+00> : vector<16x128xf32>
    %349 = tpu.matmul %348, %347, %cst_118 {dimension_numbers = #tpu.dot_dimension_numbers<[1], [0], [0], [1], [0, 0, 1, 1], [], []>} : vector<16x32xbf16>, vector<32x128xbf16>, vector<16x128xf32> -> vector<16x128xf32>
    %c0_119 = arith.constant 0 : index
    %c0_120 = arith.constant 0 : index
    %350 = vector.load %arg18[%c0_119, %c0_120] : memref<1x128xf32, #tpu.memory_space<vmem>>, vector<1x128xf32>
    %351 = vector.broadcast %350 : vector<1x128xf32> to vector<16x128xf32>
    %352 = arith.addf %349, %351 : vector<16x128xf32>
    %cst_121 = arith.constant 5.000000e-01 : f32
    %353 = vector.broadcast %cst_121 : f32 to vector<16x128xf32>
    %354 = arith.mulf %353, %352 : vector<16x128xf32>
    %cst_122 = arith.constant 0.707106769 : f32
    %355 = vector.broadcast %cst_122 : f32 to vector<16x128xf32>
    %356 = arith.mulf %352, %355 : vector<16x128xf32>
    %357 = math.erf %356 : vector<16x128xf32>
    %cst_123 = arith.constant 1.000000e+00 : f32
    %358 = vector.broadcast %cst_123 : f32 to vector<16x128xf32>
    %359 = arith.addf %358, %357 : vector<16x128xf32>
    %360 = arith.mulf %354, %359 : vector<16x128xf32>
    %c0_124 = arith.constant 0 : index
    %c0_125 = arith.constant 0 : index
    %361 = vector.load %arg19[%c0_124, %c0_125] : memref<128x32xbf16, #tpu.memory_space<vmem>>, vector<128x32xbf16>
    %362 = arith.truncf %360 : vector<16x128xf32> to vector<16x128xbf16>
    %cst_126 = arith.constant dense<0.000000e+00> : vector<16x32xf32>
    %363 = tpu.matmul %362, %361, %cst_126 {dimension_numbers = #tpu.dot_dimension_numbers<[1], [0], [0], [1], [0, 0, 1, 1], [], []>} : vector<16x128xbf16>, vector<128x32xbf16>, vector<16x32xf32> -> vector<16x32xf32>
    %c0_127 = arith.constant 0 : index
    %c0_128 = arith.constant 0 : index
    %364 = vector.load %arg20[%c0_127, %c0_128] : memref<1x32xf32, #tpu.memory_space<vmem>>, vector<1x32xf32>
    %365 = vector.broadcast %364 : vector<1x32xf32> to vector<16x32xf32>
    %366 = arith.addf %363, %365 : vector<16x32xf32>
    %367 = arith.addf %321, %366 : vector<16x32xf32>
    %368 = vector.shape_cast %367 : vector<16x32xf32> to vector<2x8x32xf32>
    %c0_129 = arith.constant 0 : index
    %c0_130 = arith.constant 0 : index
    %c0_131 = arith.constant 0 : index
    %369 = vector.load %arg21[%c0_129, %c0_130, %c0_131] : memref<2x8x32xf32, #tpu.memory_space<vmem>>, vector<2x8x32xf32>
    tpu.vector_store %arg21[%c0_129, %c0_130, %c0_131], %368 {strides = array<i32>} : memref<2x8x32xf32, #tpu.memory_space<vmem>>, vector<2x8x32xf32>,
    return
  }
  func.func @transform_0(%arg0: i32) -> (i32, i32, i32) {
    %c0_i32 = arith.constant 0 : i32
    %c0_i32_0 = arith.constant 0 : i32
    %c0_i32_1 = arith.constant 0 : i32
    return %arg0, %c0_i32, %c0_i32_0 : i32, i32, i32
  }
  func.func @transform_1(%arg0: i32) -> (i32, i32, i32) {
    %c0_i32 = arith.constant 0 : i32
    %c0_i32_0 = arith.constant 0 : i32
    %c0_i32_1 = arith.constant 0 : i32
    return %arg0, %c0_i32, %c0_i32_0 : i32, i32, i32
  }
  func.func @transform_2(%arg0: i32) -> (i32, i32) {
    %c0_i32 = arith.constant 0 : i32
    %c0_i32_0 = arith.constant 0 : i32
    %c0_i32_1 = arith.constant 0 : i32
    return %c0_i32, %c0_i32_0 : i32, i32
  }
  func.func @transform_3(%arg0: i32) -> (i32, i32) {
    %c0_i32 = arith.constant 0 : i32
    %c0_i32_0 = arith.constant 0 : i32
    %c0_i32_1 = arith.constant 0 : i32
    return %c0_i32, %c0_i32_0 : i32, i32
  }
  func.func @transform_4(%arg0: i32) -> (i32, i32) {
    %c0_i32 = arith.constant 0 : i32
    %c0_i32_0 = arith.constant 0 : i32
    %c0_i32_1 = arith.constant 0 : i32
    return %c0_i32, %c0_i32_0 : i32, i32
  }
  func.func @transform_5(%arg0: i32) -> (i32, i32) {
    %c0_i32 = arith.constant 0 : i32
    %c0_i32_0 = arith.constant 0 : i32
    %c0_i32_1 = arith.constant 0 : i32
    return %c0_i32, %c0_i32_0 : i32, i32
  }
  func.func @transform_6(%arg0: i32) -> (i32, i32) {
    %c0_i32 = arith.constant 0 : i32
    %c0_i32_0 = arith.constant 0 : i32
    %c0_i32_1 = arith.constant 0 : i32
    return %c0_i32, %c0_i32_0 : i32, i32
  }
  func.func @transform_7(%arg0: i32) -> (i32, i32) {
    %c0_i32 = arith.constant 0 : i32
    %c0_i32_0 = arith.constant 0 : i32
    %c0_i32_1 = arith.constant 0 : i32
    return %c0_i32, %c0_i32_0 : i32, i32
  }
  func.func @transform_8(%arg0: i32) -> (i32, i32, i32) {
    %c0_i32 = arith.constant 0 : i32
    %c0_i32_0 = arith.constant 0 : i32
    %c0_i32_1 = arith.constant 0 : i32
    %c0_i32_2 = arith.constant 0 : i32
    return %c0_i32, %c0_i32_0, %c0_i32_1 : i32, i32, i32
  }
  func.func @transform_9(%arg0: i32) -> (i32, i32) {
    %c0_i32 = arith.constant 0 : i32
    %c0_i32_0 = arith.constant 0 : i32
    %c0_i32_1 = arith.constant 0 : i32
    return %c0_i32, %c0_i32_0 : i32, i32
  }
  func.func @transform_10(%arg0: i32) -> (i32, i32) {
    %c0_i32 = arith.constant 0 : i32
    %c0_i32_0 = arith.constant 0 : i32
    %c0_i32_1 = arith.constant 0 : i32
    return %c0_i32, %c0_i32_0 : i32, i32
  }
  func.func @transform_11(%arg0: i32) -> (i32, i32) {
    %c0_i32 = arith.constant 0 : i32
    %c0_i32_0 = arith.constant 0 : i32
    %c0_i32_1 = arith.constant 0 : i32
    return %c0_i32, %c0_i32_0 : i32, i32
  }
  func.func @transform_12(%arg0: i32) -> (i32, i32) {
    %c0_i32 = arith.constant 0 : i32
    %c0_i32_0 = arith.constant 0 : i32
    %c0_i32_1 = arith.constant 0 : i32
    return %c0_i32, %c0_i32_0 : i32, i32
  }
  func.func @transform_13(%arg0: i32) -> (i32, i32, i32) {
    %c0_i32 = arith.constant 0 : i32
    %c0_i32_0 = arith.constant 0 : i32
    %c0_i32_1 = arith.constant 0 : i32
    %c0_i32_2 = arith.constant 0 : i32
    return %c0_i32, %c0_i32_0, %c0_i32_1 : i32, i32, i32
  }
  func.func @transform_14(%arg0: i32) -> (i32, i32) {
    %c0_i32 = arith.constant 0 : i32
    %c0_i32_0 = arith.constant 0 : i32
    %c0_i32_1 = arith.constant 0 : i32
    return %c0_i32, %c0_i32_0 : i32, i32
  }
  func.func @transform_15(%arg0: i32) -> (i32, i32) {
    %c0_i32 = arith.constant 0 : i32
    %c0_i32_0 = arith.constant 0 : i32
    %c0_i32_1 = arith.constant 0 : i32
    return %c0_i32, %c0_i32_0 : i32, i32
  }
  func.func @transform_16(%arg0: i32) -> (i32, i32) {
    %c0_i32 = arith.constant 0 : i32
    %c0_i32_0 = arith.constant 0 : i32
    %c0_i32_1 = arith.constant 0 : i32
    return %c0_i32, %c0_i32_0 : i32, i32
  }
  func.func @transform_17(%arg0: i32) -> (i32, i32) {
    %c0_i32 = arith.constant 0 : i32
    %c0_i32_0 = arith.constant 0 : i32
    %c0_i32_1 = arith.constant 0 : i32
    return %c0_i32, %c0_i32_0 : i32, i32
  }
  func.func @transform_18(%arg0: i32) -> (i32, i32) {
    %c0_i32 = arith.constant 0 : i32
    %c0_i32_0 = arith.constant 0 : i32
    %c0_i32_1 = arith.constant 0 : i32
    return %c0_i32, %c0_i32_0 : i32, i32
  }
  func.func @transform_19(%arg0: i32) -> (i32, i32) {
    %c0_i32 = arith.constant 0 : i32
    %c0_i32_0 = arith.constant 0 : i32
    %c0_i32_1 = arith.constant 0 : i32
    return %c0_i32, %c0_i32_0 : i32, i32
  }
  func.func @transform_20(%arg0: i32) -> (i32, i32, i32) {
    %c0_i32 = arith.constant 0 : i32
    %c0_i32_0 = arith.constant 0 : i32
    %c0_i32_1 = arith.constant 0 : i32
    return %arg0, %c0_i32, %c0_i32_0 : i32, i32, i32
  }
}

</mosaic_0001>

<bundles_post_ra>
// kernel: tpu_custom_call.1
= control target key start
LH: loop header
LB: loop body
LE: loop exit
PB: predicated region body
PF: predicated region fallthrough
CT: control target
= control target key end

     0   :  { %s4670_s0 = inlined_call_operand.vmem [shape: f32[2,8,32], index: 0, kind: input, shape index: {}]   ;;  %s4671_s1 = inlined_call_operand.vmem [shape: f32[2,16,64], index: 1, kind: input, shape index: {}]   ;;  %s4672_s2 = inlined_call_operand.hbm [shape: f32[2,64], index: 2, kind: input, shape index: {}]   ;;  %s4673_s3 = inlined_call_operand.vmem [shape: bf16[64,64], index: 3, kind: input, shape index: {}]   ;;  %s4674_s4 = inlined_call_operand.vmem [shape: f32[1,64], index: 4, kind: input, shape index: {}]   ;;  %s4675_s5 = inlined_call_operand.hbm [shape: f32[2,32], index: 5, kind: input, shape index: {}]   ;;  %s4676_s6 = inlined_call_operand.hbm [shape: bf16[32,32], index: 6, kind: input, shape index: {}]   ;;  %s4677_s7 = inlined_call_operand.hbm [shape: f32[1,32], index: 7, kind: input, shape index: {}]   ;;  %s4678_s8 = inlined_call_operand.hbm [shape: bf16[4,8,32], index: 8, kind: input, shape index: {}]   ;;  %s4679_s9 = inlined_call_operand.hbm [shape: f32[1,32], index: 9, kind: input, shape index: {}]   ;;  %s4680_s10 = inlined_call_operand.hbm [shape: f32[2,32], index: 10, kind: input, shape index: {}]   ;;  %s4681_s11 = inlined_call_operand.vmem [shape: bf16[32,96], index: 11, kind: input, shape index: {}]   ;;  %s4682_s12 = inlined_call_operand.hbm [shape: f32[1,96], index: 12, kind: input, shape index: {}]   ;;  %s4683_s13 = inlined_call_operand.vmem [shape: bf16[4,8,32], index: 13, kind: input, shape index: {}]   ;;  %s4684_s14 = inlined_call_operand.vmem [shape: f32[1,32], index: 14, kind: input, shape index: {}]   ;;  %s4685_s15 = inlined_call_operand.vmem [shape: f32[2,32], index: 15, kind: input, shape index: {}]   ;;  %s4686_s16 = inlined_call_operand.hbm [shape: bf16[32,128], index: 16, kind: input, shape index: {}]   ;;  %s4687_s17 = inlined_call_operand.vmem [shape: f32[1,128], index: 17, kind: input, shape index: {}]   ;;  %s4688_s18 = inlined_call_operand.vmem [shape: bf16[128,32], index: 18, kind: input, shape index: {}]   ;;  %s4689_s19 = inlined_call_operand.vmem [shape: f32[1,32], index: 19, kind: input, shape index: {}]   ;;  %s4690_s20 = inlined_call_operand.hbm [shape: f32[2,8,32], index: 20, kind: output, shape index: {}]  }
   0x1   :  { %4695 = sst [smem:[#allocation24_spill]] %s4670_s0 }
   0x2   :  { %4696 = sst [smem:[#allocation25_spill]] %s4671_s1 }
   0x3   :  { %4697 = sst [smem:[#allocation26_spill]] %s4672_s2 }
   0x4   :  { %4698 = sst [smem:[#allocation27_spill]] %s4673_s3 }
   0x5   :  { %4699 = sst [smem:[#allocation28_spill]] %s4674_s4 }
   0x6   :  { %25 = vsyncpa [#allocation3], 0 }
   0x7   :  { %26 = vsyncpa [#allocation6], 0 }
   0x8   :  { %27 = vsyncpa [#allocation9], 0 }
   0x9   :  { %28 = vsyncpa [#allocation12], 0 }
   0xa   :  { %29 = vsyncpa [#allocation15], 0 }
   0xb   :  { %30 = vsyncpa [#allocation4], 0  ;;  %s3843_s1 = smov [#allocation5]   ;;  %s3844_s23 = smov [#allocation8]  }
   0xc   :  { %s55_s22 = sshll.u32 %s3843_s1, 4  ;;  %s77_s24 = sshll.u32 %s3844_s23, 4  ;;  %s56_s22 = int_to_ptr.vmem [resolvable:$true] %s55_s22  ;;  %s78_s24 = int_to_ptr.vmem [resolvable:$true] %s77_s24 }
   0xd   :  { %s3611_s3 = scalar_lea.hbm %s4675_s5, 32 }
   0xe   :  { %p3612_p0 = scmp.ne.s32.totalorder %s4675_s5, %s3611_s3  ;;  %p3615_p1 = scmp.lt.u32.totalorder %s3611_s3, %s4675_s5 }
  0x10   :  { %p3617_p2 = pnand %p3615_p1, %p3612_p0 }
  0x12   :  { %3620 = shalt.err (!%p3617_p2)
}
  0x13   :  { %s3621_s29 = scalar_lea.vmem %s56_s22, 32  ;;  %p3626_p4 = scmp.lt.s32.totalorder %s56_s22, %s56_s22 }
  0x14   :  { %p3622_p3 = scmp.ne.s32.totalorder %s56_s22, %s3621_s29  ;;  %p3627_p5 = scmp.lt.s32.totalorder %s3621_s29, %s3621_s29 }
  0x16   :  { %p3628_p6 = por %p3627_p5, %p3626_p4 }
  0x18   :  { %p3629_p7 = pnand %p3628_p6, %p3622_p3 }
  0x1a   :  { %3632 = shalt.err (!%p3629_p7)
}
  0x1b   :  { %58 = dma.hbm_to_vmem [thread:$0]  %s4675_s5, 32, %s56_s22, [#allocation6]  }
  0x1c   :  { %s3633_s23 = scalar_lea.hbm %s4677_s7, 16 }
  0x1d   :  { %p3634_p8 = scmp.ne.s32.totalorder %s4677_s7, %s3633_s23  ;;  %p3637_p9 = scmp.lt.u32.totalorder %s3633_s23, %s4677_s7 }
  0x1f   :  { %p3639_p10 = pnand %p3637_p9, %p3634_p8 }
  0x21   :  { %3642 = shalt.err (!%p3639_p10)
}
  0x22   :  { %s3643_s27 = scalar_lea.vmem %s78_s24, 16  ;;  %s3647_s28 = scalar_lea.vmem %s78_s24, 32 }
  0x23   :  { %p3644_p11 = scmp.ne.s32.totalorder %s78_s24, %s3643_s27  ;;  %p3648_p12 = scmp.lt.s32.totalorder %s78_s24, %s78_s24 }
  0x24   :  { %p3649_p13 = scmp.lt.s32.totalorder %s3647_s28, %s3643_s27 }
  0x26   :  { %p3650_p0 = por %p3649_p13, %p3648_p12 }
  0x28   :  { %p3651_p1 = pnand %p3650_p0, %p3644_p11 }
  0x2a   :  { %3654 = shalt.err (!%p3651_p1)
}
  0x2b   :  { %80 = dma.hbm_to_vmem [thread:$0]  %s4677_s7, 16, %s78_s24, [#allocation9]  }
  0x2c   :  { %s3845_s4 = smov [#allocation11]   ;;  %s3846_s30 = smov [#allocation14]  }
  0x2d   :  { %s99_s29 = sshll.u32 %s3845_s4, 4  ;;  %s121_s0 = sshll.u32 %s3846_s30, 4  ;;  %s100_s29 = int_to_ptr.vmem [resolvable:$true] %s99_s29  ;;  %s122_s0 = int_to_ptr.vmem [resolvable:$true] %s121_s0 }
  0x2e   :  { %s3655_s23 = scalar_lea.hbm %s4679_s9, 16 }
  0x2f   :  { %p3656_p2 = scmp.ne.s32.totalorder %s4679_s9, %s3655_s23  ;;  %p3659_p3 = scmp.lt.u32.totalorder %s3655_s23, %s4679_s9 }
  0x31   :  { %p3661_p4 = pnand %p3659_p3, %p3656_p2 }
  0x33   :  { %3664 = shalt.err (!%p3661_p4)
}
  0x34   :  { %s3665_s7 = scalar_lea.vmem %s100_s29, 16  ;;  %s3669_s24 = scalar_lea.vmem %s100_s29, 32 }
  0x35   :  { %p3666_p5 = scmp.ne.s32.totalorder %s100_s29, %s3665_s7  ;;  %p3670_p6 = scmp.lt.s32.totalorder %s100_s29, %s100_s29 }
  0x36   :  { %p3671_p7 = scmp.lt.s32.totalorder %s3669_s24, %s3665_s7 }
  0x38   :  { %p3672_p8 = por %p3671_p7, %p3670_p6 }
  0x3a   :  { %p3673_p9 = pnand %p3672_p8, %p3666_p5 }
  0x3c   :  { %3676 = shalt.err (!%p3673_p9)
}
  0x3d   :  { %102 = dma.hbm_to_vmem [thread:$0]  %s4679_s9, 16, %s100_s29, [#allocation12]  }
  0x3e   :  { %s3677_s4 = scalar_lea.hbm %s4682_s12, 16 }
  0x3f   :  { %p3678_p10 = scmp.ne.s32.totalorder %s4682_s12, %s3677_s4  ;;  %p3681_p11 = scmp.lt.u32.totalorder %s3677_s4, %s4682_s12 }
  0x41   :  { %p3683_p12 = pnand %p3681_p11, %p3678_p10 }
  0x43   :  { %3686 = shalt.err (!%p3683_p12)
}
  0x44   :  { %s3687_s2 = scalar_lea.vmem %s122_s0, 16  ;;  %s3691_s25 = scalar_lea.vmem %s122_s0, 32 }
  0x45   :  { %p3688_p13 = scmp.ne.s32.totalorder %s122_s0, %s3687_s2  ;;  %p3692_p0 = scmp.lt.s32.totalorder %s122_s0, %s122_s0 }
  0x46   :  { %p3693_p1 = scmp.lt.s32.totalorder %s3691_s25, %s3687_s2 }
  0x48   :  { %p3694_p2 = por %p3693_p1, %p3692_p0 }
  0x4a   :  { %p3695_p3 = pnand %p3694_p2, %p3688_p13 }
  0x4c   :  { %3698 = shalt.err (!%p3695_p3)
}
  0x4d   :  { %124 = dma.hbm_to_vmem [thread:$0]  %s4682_s12, 16, %s122_s0, [#allocation15]  }
  0x4e   :  { %s3847_s3 = smov [#allocation2]   ;;  %s3848_s7 = smov [#allocation7]  }
  0x4f   :  { %s41_s26 = sshll.u32 %s3847_s3, 4  ;;  %s64_s24 = sshll.u32 %s3848_s7, 4  ;;  %s42_s26 = int_to_ptr.vmem [resolvable:$true] %s41_s26  ;;  %s4022_s24 = int_to_ptr.vmem [resolvable:$true] %s64_s24 }
  0x50   :  { %s4700_s5 = sld [smem:[#allocation26_spill]] }
  0x56   :  { %s3699_s22 = scalar_lea.hbm %s4700_s5, 32 }
  0x57   :  { %p3700_p4 = scmp.ne.s32.totalorder %s4700_s5, %s3699_s22  ;;  %p3703_p5 = scmp.lt.u32.totalorder %s3699_s22, %s4700_s5 }
  0x59   :  { %p3705_p6 = pnand %p3703_p5, %p3700_p4 }
  0x5b   :  { %3708 = shalt.err (!%p3705_p6)
}
  0x5c   :  { %s3709_s12 = scalar_lea.vmem %s42_s26, 32  ;;  %p3714_p8 = scmp.lt.s32.totalorder %s42_s26, %s42_s26 }
  0x5d   :  { %p3710_p7 = scmp.ne.s32.totalorder %s42_s26, %s3709_s12  ;;  %p3715_p9 = scmp.lt.s32.totalorder %s3709_s12, %s3709_s12 }
  0x5f   :  { %p3716_p10 = por %p3715_p9, %p3714_p8 }
  0x61   :  { %p3717_p11 = pnand %p3716_p10, %p3710_p7 }
  0x63   :  { %3720 = shalt.err (!%p3717_p11)
}
  0x64   :  { %44 = dma.hbm_to_vmem [thread:$0]  %s4700_s5, 32, %s42_s26, [#allocation3]  }
  0x65   :  { %s3721_s9 = scalar_lea.hbm %s4676_s6, 256 }
  0x66   :  { %p3722_p12 = scmp.ne.s32.totalorder %s4676_s6, %s3721_s9  ;;  %p3725_p13 = scmp.lt.u32.totalorder %s3721_s9, %s4676_s6 }
  0x68   :  { %p3727_p0 = pnand %p3725_p13, %p3722_p12 }
  0x6a   :  { %3730 = shalt.err (!%p3727_p0)
}
  0x6b   :  { %s3731_s28 = scalar_lea.vmem %s4022_s24, 256  ;;  %p3736_p2 = scmp.lt.s32.totalorder %s4022_s24, %s4022_s24 }
  0x6c   :  { %p3732_p1 = scmp.ne.s32.totalorder %s4022_s24, %s3731_s28  ;;  %p3737_p3 = scmp.lt.s32.totalorder %s3731_s28, %s3731_s28 }
  0x6e   :  { %p3738_p4 = por %p3737_p3, %p3736_p2 }
  0x70   :  { %p3739_p5 = pnand %p3738_p4, %p3732_p1 }
  0x72   :  { %3742 = shalt.err (!%p3739_p5)
}
  0x73   :  { %s3849_s26 = smov 64   ;;  %s3850_s5 = smov 4  }
  0x74   :  { %70 = dma.hbm_to_vmem [thread:$0]  %s4676_s6, 256, %s4022_s24, [#allocation6], %s3849_s26, %s3849_s26, %s3850_s5  }
  0x75   :  { %s3851_s30 = smov [#allocation10]   ;;  %s3852_s1 = smov [#allocation13]  }
  0x76   :  { %s86_s21 = sshll.u32 %s3851_s30, 4  ;;  %s109_s12 = sshll.u32 %s3852_s1, 4  ;;  %s87_s21 = int_to_ptr.vmem [resolvable:$true] %s86_s21  ;;  %s110_s12 = int_to_ptr.vmem [resolvable:$true] %s109_s12 }
  0x77   :  { %s3743_s2 = scalar_lea.hbm %s4678_s8, 256 }
  0x78   :  { %p3744_p6 = scmp.ne.s32.totalorder %s4678_s8, %s3743_s2  ;;  %p3747_p7 = scmp.lt.u32.totalorder %s3743_s2, %s4678_s8 }
  0x7a   :  { %p3749_p8 = pnand %p3747_p7, %p3744_p6 }
  0x7c   :  { %3752 = shalt.err (!%p3749_p8)
}
  0x7d   :  { %s3753_s6 = scalar_lea.vmem %s87_s21, 256  ;;  %p3758_p10 = scmp.lt.s32.totalorder %s87_s21, %s87_s21 }
  0x7e   :  { %p3754_p9 = scmp.ne.s32.totalorder %s87_s21, %s3753_s6  ;;  %p3759_p11 = scmp.lt.s32.totalorder %s3753_s6, %s3753_s6 }
  0x80   :  { %p3760_p12 = por %p3759_p11, %p3758_p10 }
  0x82   :  { %p3761_p13 = pnand %p3760_p12, %p3754_p9 }
  0x84   :  { %3764 = shalt.err (!%p3761_p13)
}
  0x85   :  { %92 = dma.hbm_to_vmem [thread:$0]  %s4678_s8, 256, %s87_s21, [#allocation9], %s3849_s26, %s3849_s26, %s3850_s5  }
  0x86   :  { %s3765_s22 = scalar_lea.hbm %s4680_s10, 32 }
  0x87   :  { %p3766_p0 = scmp.ne.s32.totalorder %s4680_s10, %s3765_s22  ;;  %p3769_p1 = scmp.lt.u32.totalorder %s3765_s22, %s4680_s10 }
  0x89   :  { %p3771_p2 = pnand %p3769_p1, %p3766_p0 }
  0x8b   :  { %3774 = shalt.err (!%p3771_p2)
}
  0x8c   :  { %s3775_s23 = scalar_lea.vmem %s110_s12, 32  ;;  %p3780_p4 = scmp.lt.s32.totalorder %s110_s12, %s110_s12 }
  0x8d   :  { %p3776_p3 = scmp.ne.s32.totalorder %s110_s12, %s3775_s23  ;;  %p3781_p5 = scmp.lt.s32.totalorder %s3775_s23, %s3775_s23 }
  0x8f   :  { %p3782_p6 = por %p3781_p5, %p3780_p4 }
  0x91   :  { %p3783_p7 = pnand %p3782_p6, %p3776_p3 }
  0x93   :  { %3786 = shalt.err (!%p3783_p7)
}
  0x94   :  { %112 = dma.hbm_to_vmem [thread:$0]  %s4680_s10, 32, %s110_s12, [#allocation12]  }
  0x95   :  { %s3853_s2 = smov [#allocation16]   ;;  %s3787_s3 = scalar_lea.hbm %s4686_s16, 256 }
  0x96   :  { %s136_s25 = sshll.u32 %s3853_s2, 4  ;;  %p3788_p8 = scmp.ne.s32.totalorder %s4686_s16, %s3787_s3  ;;  %s137_s25 = int_to_ptr.vmem [resolvable:$true] %s136_s25 }
  0x97   :  { %p3791_p9 = scmp.lt.u32.totalorder %s3787_s3, %s4686_s16 }
  0x99   :  { %p3793_p10 = pnand %p3791_p9, %p3788_p8 }
  0x9b   :  { %3796 = shalt.err (!%p3793_p10)
}
  0x9c   :  { %s3797_s28 = scalar_lea.vmem %s137_s25, 256  ;;  %p3802_p12 = scmp.lt.s32.totalorder %s137_s25, %s137_s25 }
  0x9d   :  { %p3798_p11 = scmp.ne.s32.totalorder %s137_s25, %s3797_s28  ;;  %p3803_p13 = scmp.lt.s32.totalorder %s3797_s28, %s3797_s28 }
  0x9f   :  { %p3804_p0 = por %p3803_p13, %p3802_p12 }
  0xa1   :  { %p3805_p1 = pnand %p3804_p0, %p3798_p11 }
  0xa3   :  { %3808 = shalt.err (!%p3805_p1)
}
  0xa4   :  { %142 = dma.hbm_to_vmem [thread:$0]  %s4686_s16, 256, %s137_s25, [#allocation15], %s3849_s26, %s3849_s26, %s3850_s5  }
  0xa5   :  { %3831 = dma.done.wait [#allocation3], 32  }
  0xa6   :  { %3832 = vsyncadd [#allocation3], 4294967264 }
  0xa7   :  { %3833 = dma.done.wait [#allocation6], 288  }
  0xa8   :  { %3834 = vsyncadd [#allocation6], 4294967008 }
  0xa9   :  { %3835 = dma.done.wait [#allocation9], 272  }
  0xaa   :  { %3836 = vsyncadd [#allocation9], 4294967024 }
  0xab   :  { %3837 = dma.done.wait [#allocation12], 48  }
  0xac   :  { %3838 = vsyncadd [#allocation12], 4294967248 }
  0xad   :  { %3839 = dma.done.wait [#allocation15], 272  }
  0xae   :  { %3840 = vsyncadd [#allocation15], 4294967024  ;;  %vm184_vm0 = vcmask 523264   ;;  %vm351_vm1 = vcmask 261120   ;;  %s4701_s30 = sld [smem:[#allocation25_spill]]  ;;  %s4702_s25 = sld [smem:[#allocation24_spill]]  ;;  %v238_v52 = vlaneseq }
  0xaf   :  { %s4703_s24 = sld [smem:[#allocation27_spill]]  ;;  %v3854_v46 = vmov 0.0   ;;  %vm3855_vm2 = vmmov 0   ;;  %s4704_s1 = sld [smem:[#allocation28_spill]]  ;;  %vm465_vm3 = vcmask 64512   ;;  %vm558_vm4 = vcmask 130048  }
  0xb0   :  { %3201 = vmatprep.subr.bf16.mxu1 %v3854_v46  ;;  %3203 = vmatprep.mubr.msk.bf16.mxu1 %vm3855_vm2, %v3854_v46  ;;  %v239_v58 = vshrl.u32 %v238_v52, 7  ;;  %v3011_v52 = vld [vmem:[#allocation8] ss:$0 sm:$0xff]  ;;  %s3856_s0 = smov 96   ;;  %s3857_s16 = smov 120   ;;  %vm903_vm5 = vcmask 1043456  }
  0xb1   :  { %s3858_s5 = smov 88   ;;  %s3859_s23 = smov 112  }
  0xb2   :  { %s3860_s8 = smov 80   ;;  %s3861_s21 = smov 104  }
  0xb3   :  { %s3862_s2 = smov 72   ;;  %s3864_s22 = smov 48  }
  0xb4   :  { %v179_v0 = vld [vmem:[%s4701_s30] sm:$0xff]  ;;  %v181_v1 = vld [vmem:[%s4701_s30 + $0x10] sm:$0xff]  ;;  %v180_v2 = vld [vmem:[%s4701_s30 + $0x8] sm:$0xff]  ;;  %s3866_s4 = smov [#allocation17]  }
  0xb5   :  { %v185_v3 = vsel %vm184_vm0, %v179_v0, 0.0  ;;  %v191_v4 = vsel %vm184_vm0, %v181_v1, 0.0  ;;  %v182_v5 = vld [vmem:[%s4701_s30 + $0x18] sm:$0xff]  ;;  %v177_v6 = vld [vmem:[%s4702_s25] sm:$0xff]  ;;  %v178_v7 = vld [vmem:[%s4702_s25 + $0x8] sm:$0xff]  ;;  %v188_v8 = vsel %vm184_vm0, %v180_v2, 0.0 }
  0xb6   :  { %186 = vadd.xlane.f32.xlu0 %v185_v3  ;;  %192 = vadd.xlane.f32.xlu1 %v191_v4  ;;  %v194_v9 = vsel %vm184_vm0, %v182_v5, 0.0  ;;  %v352_v10 = vsel %vm351_vm1, %v177_v6, 0.0  ;;  %v355_v11 = vsel %vm351_vm1, %v178_v7, 0.0  ;;  %v3503_v42 = vld [vmem:[%s4703_s24] sm:$0xff]   ;;  %v3504_v43 = vld [vmem:[%s4703_s24 + $0x8] sm:$0xff]   ;;  %v3505_v44 = vld [vmem:[%s4703_s24 + $0x10] sm:$0xff]  }
  0xb7   :  { %3181 = vmatprep.subr.bf16.mxu0 %v3503_v42  ;;  %v3506_v45 = vld [vmem:[%s4703_s24 + $0x18] sm:$0xff]   ;;  %v183_v3 = vld [vmem:[#allocation2] sm:$0x3]  ;;  %s2988_s30 = sshll.u32 %s3866_s4, 4  ;;  %s2989_s30 = int_to_ptr.vmem [resolvable:$true] %s2988_s30 }
  0xb8   :  { %3182 = vmatpush3.bf16.msra.mxu0 %v3503_v42  ;;  %p3814_p3 = scmp.lt.s32.totalorder %s2989_s30, %s2989_s30 }
  0xb9   :  { %3183 = vmatprep.subr.bf16.mxu0 %v3504_v43 }
  0xba   :  { %189 = vadd.xlane.f32.xlu0 %v188_v8  ;;  %195 = vadd.xlane.f32.xlu1 %v194_v9  ;;  %v4172_v8 = vsub.s32 1, %v239_v58 }
  0xbc   :  { %3184 = vmatpush3.bf16.msra.mxu0 %v3504_v43 }
  0xbd   :  { %3185 = vmatprep.subr.bf16.mxu0 %v3505_v44 }
  0xbe   :  { %353 = vadd.xlane.f32.xlu0 %v352_v10  ;;  %356 = vadd.xlane.f32.xlu1 %v355_v11 }
  0xc0   :  { %3186 = vmatpush3.bf16.msra.mxu0 %v3505_v44 }
  0xc1   :  { %3187 = vmatprep.subr.bf16.mxu0 %v3506_v45 }
  0xc4   :  { %3188 = vmatpush3.bf16.msra.mxu0 %v3506_v45 }
  0xc5   :  { %3193 = vmatprep.subr.bf16.mxu0 %v3854_v46 }
 0x143   :  { %v187_v12 = vpop.xlane.xlu0 %186  ;;  %v193_v13 = vpop.xlane.xlu1 %192 }
 0x144   :  { %v198_v14 = vmul.f32 0.015625, %v187_v12  ;;  %v200_v15 = vmul.f32 0.015625, %v193_v13  ;;  %v249_v13 = vrot.slane %v183_v3, %v4172_v8 }
 0x146   :  { %v4122_v16 = vsub.f32 %v179_v0, %v198_v14  ;;  %v4124_v17 = vsub.f32 %v181_v1, %v200_v15  ;;  %v4168_v0 = vsub.s32 0, %v239_v58 }
 0x147   :  { %v190_v18 = vpop.xlane.xlu0 %189  ;;  %v196_v19 = vpop.xlane.xlu1 %195 }
 0x148   :  { %v199_v20 = vmul.f32 0.015625, %v190_v18  ;;  %v201_v21 = vmul.f32 0.015625, %v196_v19  ;;  %v206_v22 = vmul.f32 %v4122_v16, %v4122_v16  ;;  %v208_v23 = vmul.f32 %v4124_v17, %v4124_v17 }
 0x14a   :  { %v4130_v24 = vsub.f32 %v180_v2, %v199_v20  ;;  %v4132_v25 = vsub.f32 %v182_v5, %v201_v21  ;;  %v210_v26 = vsel %vm184_vm0, %v206_v22, 0.0  ;;  %v216_v29 = vsel %vm184_vm0, %v208_v23, 0.0  ;;  %v350_v20 = vld [vmem:[#allocation5] sm:$0x3] }
 0x14b   :  { %211 = vadd.xlane.f32.xlu0 %v210_v26  ;;  %v354_v27 = vpop.xlane.xlu0 %353  ;;  %v357_v28 = vpop.xlane.xlu1 %356 }
 0x14c   :  { %v359_v30 = vmul.f32 0.03125, %v354_v27  ;;  %v207_v31 = vmul.f32 %v4130_v24, %v4130_v24  ;;  %v360_v32 = vmul.f32 0.03125, %v357_v28  ;;  %v209_v33 = vmul.f32 %v4132_v25, %v4132_v25 }
 0x14e   :  { %v4140_v34 = vsub.f32 %v177_v6, %v359_v30  ;;  %v213_v35 = vsel %vm184_vm0, %v207_v31, 0.0  ;;  %v4143_v36 = vsub.f32 %v178_v7, %v360_v32  ;;  %v219_v37 = vsel %vm184_vm0, %v209_v33, 0.0  ;;  %v3507_v32 = vld [vmem:[#allocation7] sm:$0xff]  }
 0x14f   :  { %214 = vadd.xlane.f32.xlu1 %v213_v35  ;;  %217 = vadd.xlane.f32.xlu0 %v216_v29  ;;  %v241_v7 = vrot.slane %v183_v3, %v4168_v0  ;;  %v382_v29 = vrot.slane %v350_v20, %v4168_v0 }
 0x150   :  { %v363_v38 = vmul.f32 %v4140_v34, %v4140_v34  ;;  %v364_v39 = vmul.f32 %v4143_v36, %v4143_v36 }
 0x152   :  { %v365_v40 = vsel %vm351_vm1, %v363_v38, 0.0  ;;  %v368_v41 = vsel %vm351_vm1, %v364_v39, 0.0  ;;  %v3508_v38 = vld [vmem:[#allocation7 + $0x8] sm:$0xff]  }
 0x153   :  { %220 = vadd.xlane.f32.xlu1 %v219_v37  ;;  %366 = vadd.xlane.f32.xlu0 %v365_v40  ;;  %v388_v37 = vrot.slane %v350_v20, %v4172_v8 }
 0x157   :  { %369 = vadd.xlane.f32.xlu1 %v368_v41  ;;  %v3004_v41 = vld [vmem:[%s4704_s1] ss:$0 sm:$0xff]  ;;  %s3865_s1 = smov 40  }
 0x1d8   :  { %v212_v47 = vpop.xlane.xlu0 %211 }
 0x1d9   :  { %v222_v48 = vmul.f32 0.015625, %v212_v47 }
 0x1db   :  { %v226_v49 = vadd.f32 1e-05, %v222_v48 }
 0x1dc   :  { %v215_v50 = vpop.xlane.xlu1 %214  ;;  %v218_v51 = vpop.xlane.xlu0 %217 }
 0x1dd   :  { %3521 = vrsqrt.f32 %v226_v49  ;;  %v223_v53 = vmul.f32 0.015625, %v215_v50  ;;  %v224_v54 = vmul.f32 0.015625, %v218_v51 }
 0x1df   :  { %v227_v55 = vadd.f32 1e-05, %v223_v53  ;;  %v228_v56 = vadd.f32 1e-05, %v224_v54 }
 0x1e0   :  { %v221_v57 = vpop.xlane.xlu1 %220  ;;  %v367_v59 = vpop.xlane.xlu0 %366 }
 0x1e1   :  { %3523 = vrsqrt.f32 %v227_v55  ;;  %v225_v60 = vmul.f32 0.015625, %v221_v57  ;;  %v371_v61 = vmul.f32 0.03125, %v367_v59 }
 0x1e2   :  { %3525 = vrsqrt.f32 %v228_v56 }
 0x1e3   :  { %v229_v62 = vadd.f32 1e-05, %v225_v60  ;;  %v373_v63 = vadd.f32 1e-05, %v371_v61 }
 0x1e4   :  { %v370_v1 = vpop.xlane.xlu1 %369 }
 0x1e5   :  { %3527 = vrsqrt.f32 %v229_v62  ;;  %v372_v2 = vmul.f32 0.03125, %v370_v1 }
 0x1e6   :  { %3529 = vrsqrt.f32 %v373_v63 }
 0x1e7   :  { %v3522_v4 = vpop.eup %3521  ;;  %v374_v5 = vadd.f32 1e-05, %v372_v2 }
 0x1e8   :  { %v234_v6 = vmul.f32 %v3522_v4, %v4122_v16 }
 0x1e9   :  { %3531 = vrsqrt.f32 %v374_v5 }
 0x1ea   :  { %v242_v12 = vmul.f32 %v241_v7, %v234_v6 }
 0x1eb   :  { %v3524_v9 = vpop.eup %3523 }
 0x1ec   :  { %v3526_v10 = vpop.eup %3525  ;;  %v235_v11 = vmul.f32 %v3524_v9, %v4130_v24  ;;  %v250_v16 = vadd.f32 %v249_v13, %v242_v12 }
 0x1ed   :  { %v236_v14 = vmul.f32 %v3526_v10, %v4124_v17 }
 0x1ee   :  { %v243_v15 = vmul.f32 %v241_v7, %v235_v11 }
 0x1ef   :  { %v3528_v18 = vpop.eup %3527  ;;  %v244_v22 = vmul.f32 %v241_v7, %v236_v14 }
 0x1f0   :  { %v237_v19 = vmul.f32 %v3528_v18, %v4132_v25  ;;  %v251_v21 = vadd.f32 %v249_v13, %v243_v15  ;;  %v3530_v23 = vpop.eup %3529 }
 0x1f1   :  { %v377_v24 = vmul.f32 %v3530_v23, %v4140_v34  ;;  %v252_v17 = vadd.f32 %v249_v13, %v244_v22 }
 0x1f2   :  { %v262_v26 = vpack.c.bf16 %v251_v21, %v250_v16  ;;  %v245_v27 = vmul.f32 %v241_v7, %v237_v19 }
 0x1f3   :  { %v3532_v28 = vpop.eup %3531  ;;  %v383_v35 = vmul.f32 %v382_v29, %v377_v24 }
 0x1f4   :  { %v378_v30 = vmul.f32 %v3532_v28, %v4143_v36  ;;  %3189 = vmatprep.mubr.msk.bf16.mxu0 %vm184_vm0, %v262_v26  ;;  %v253_v31 = vadd.f32 %v249_v13, %v245_v27 }
 0x1f5   :  { %v389_v36 = vadd.f32 %v388_v37, %v383_v35 }
 0x1f6   :  { %v384_v25 = vmul.f32 %v382_v29, %v378_v30  ;;  %v263_v33 = vpack.c.bf16 %v253_v31, %v252_v17 }
 0x1f8   :  { %3190 = vmatmul.mubr.msk.bf16.vlgmr.msra.gmra.mrb[0].mxu0 %vm184_vm0, %v263_v33  ;;  %v390_v34 = vadd.f32 %v388_v37, %v384_v25 }
 0x1f9   :  { %3194 = vmatpush3.bf16.msra.mxu0 %v3507_v32  ;;  %3197 = vmatprep.mubr.msk.bf16.mxu0 %vm3855_vm2, %v3854_v46 }
 0x1fa   :  { %3195 = vmatprep.subr.bf16.mxu0 %v3854_v46  ;;  %v395_v39 = vpack.c.bf16 %v390_v34, %v389_v36 }
 0x1fd   :  { %3196 = vmatpush3.bf16.msra.mxu0 %v3508_v38 }
 0x1fe   :  { %3207 = vmatprep.subr.bf16.mxu0 %v3854_v46 }
 0x200   :  { %3198 = vmatmul.mubr.msk.bf16.vlgmr.msra.gmra.mrb[4].mxu0 %vm351_vm1, %v395_v39 }
 0x201   :  { %3209 = vmatprep.mubr.msk.bf16.mxu0 %vm3855_vm2, %v3854_v46 }
 0x2cb   :  { %v3191_v40 = vpop.f32.mrb[0].mxu0 }
 0x2cc   :  { %v335_v42 = vpop.f32.mrb[1].mxu0  ;;  %v344_v44 = vadd.f32 %v3191_v40, %v3004_v41 }
 0x2cd   :  { %v3192_v43 = vpop.f32.mrb[2].mxu0  ;;  %v336_v48 = vadd.f32 %v3004_v41, %v335_v42 }
 0x2ce   :  { %v347_v45 = vadd.f32 %v3192_v43, %v3004_v41  ;;  %v338_v47 = vpop.f32.mrb[3].mxu0 }
 0x2cf   :  { %v339_v49 = vadd.f32 %v3004_v41, %v338_v47 }
 0x2d0   :  { %v4194_v50 = vpack.c.bf16 %v347_v45, %v344_v44 }
 0x2d1   :  { %v4196_v51 = vpack.c.bf16 %v339_v49, %v336_v48 }
 0x2d2   :  { %v516_v53 = vsel %vm465_vm3, %v4194_v50, 0 }
 0x2d3   :  { %v452_v54 = vpop.f32.mrb[4].mxu0  ;;  %3208 = vmatpush3.bf16.xpose.msra.mxu0 %v516_v53  ;;  %v470_v55 = vsel %vm465_vm3, %v4196_v51, 0 }
 0x2d4   :  { %v453_v56 = vadd.f32 %v3011_v52, %v452_v54  ;;  %v3199_v57 = vpop.f32.mrb[5].mxu0  ;;  %3202 = vmatpush3.bf16.xpose.msra.mxu1 %v470_v55  ;;  %3219 = vmatprep.subr.bf16.mxu0 %v3854_v46 }
 0x2d5   :  { %v455_v58 = vpop.f32.mrb[6].mxu0  ;;  %3213 = vmatprep.subr.bf16.mxu1 %v3854_v46 }
 0x2d6   :  { %v459_v59 = vmul.f32 0.35355338, %v453_v56  ;;  %v456_v60 = vadd.f32 %v3011_v52, %v455_v58  ;;  %v3200_v61 = vpop.f32.mrb[7].mxu0 }
 0x2d8   :  { %v4204_v62 = vpack.c.bf16 %v459_v59, %v459_v59  ;;  %v460_v63 = vmul.f32 0.35355338, %v456_v60 }
 0x2da   :  { %v4206_v1 = vpack.c.bf16 %v460_v63, %v460_v63 }
 0x2db   :  { %3204 = vmatmul.mubr.msk.bf16.vlgmr.msra.gmra.mrb[0].mxu1 %vm465_vm3, %v4204_v62 }
 0x2dc   :  { %3210 = vmatmul.mubr.msk.bf16.vlgmr.msra.gmra.mrb[8].mxu0 %vm465_vm3, %v4206_v1  ;;  %3215 = vmatprep.mubr.msk.bf16.mxu1 %vm3855_vm2, %v3854_v46 }
 0x2dd   :  { %3221 = vmatprep.mubr.msk.bf16.mxu0 %vm3855_vm2, %v3854_v46 }
 0x3ae   :  { %v506_v2 = vpop.f32.mrb[0].mxu1 }
 0x3af   :  { %v3205_v3 = vpop.f32.mrb[1].mxu1  ;;  %v552_v4 = vpop.f32.mrb[8].mxu0  ;;  %v559_v5 = vsel %vm558_vm4, %v506_v2, -inf }
 0x3b0   :  { %560 = vmax.xlane.f32.xlu0 %v559_v5  ;;  %v509_v6 = vpop.f32.mrb[2].mxu1  ;;  %v3211_v7 = vpop.f32.mrb[9].mxu0  ;;  %v562_v9 = vsel %vm558_vm4, %v552_v4, -inf }
 0x3b1   :  { %v3206_v10 = vpop.f32.mrb[3].mxu1  ;;  %563 = vmax.xlane.f32.xlu1 %v562_v9  ;;  %v555_v11 = vpop.f32.mrb[10].mxu0 }
 0x3b2   :  { %v3212_v12 = vpop.f32.mrb[11].mxu0 }
 0x3c2   :  { %631 = vrot.lane.b32.xlu1 %v4194_v50, %s3856_s0 }
 0x3c6   :  { %682 = vrot.lane.b32.xlu1 %v4196_v51, %s3857_s16 }
 0x43d   :  { %v561_v13 = vpop.xlane.xlu0 %560 }
 0x43e   :  { %v565_v14 = vsub.f32 %v506_v2, %v561_v13  ;;  %v564_v15 = vpop.xlane.xlu1 %563 }
 0x43f   :  { %v566_v18 = vsub.f32 %v552_v4, %v564_v15 }
 0x440   :  { %v567_v19 = vmul.f32 1.442695, %v565_v14 }
 0x441   :  { %v569_v20 = vmul.f32 1.442695, %v566_v18  ;;  %v899_v18 = vld [vmem:[#allocation10 + $0x4] sm:$0xf] }
 0x442   :  { %3533 = vpow2.f32 %v567_v19  ;;  %v632_v16 = vpop.permute.xlu1 %631 }
 0x443   :  { %3535 = vpow2.f32 %v569_v20  ;;  %3220 = vmatpush3.bf16.msra.mxu0 %v632_v16  ;;  %v905_v16 = vsel %vm903_vm5, %v899_v18, 0 }
 0x444   :  { %3231 = vmatprep.subr.bf16.mxu0 %v3854_v46 }
 0x446   :  { %v683_v27 = vpop.permute.xlu1 %682 }
 0x447   :  { %v688_v37 = vsel %vm465_vm3, %v683_v27, 0 }
 0x44c   :  { %v3534_v21 = vpop.eup %3533 }
 0x44d   :  { %v3536_v22 = vpop.eup %3535  ;;  %v571_v23 = vsel %vm558_vm4, %v3534_v21, 0.0 }
 0x44e   :  { %572 = vadd.xlane.f32.xlu0 %v571_v23  ;;  %v574_v26 = vsel %vm558_vm4, %v3536_v22, 0.0 }
 0x44f   :  { %575 = vadd.xlane.f32.xlu1 %v574_v26 }
 0x460   :  { %733 = vrot.lane.b32.xlu1 %v4194_v50, %s3857_s16 }
 0x464   :  { %584 = vrot.lane.b32.xlu0 %v4196_v51, %s3856_s0  ;;  %731 = vrot.lane.b32.xlu1 %v4206_v1, %s3857_s16 }
 0x468   :  { %680 = vrot.lane.b32.xlu0 %v4204_v62, %s3857_s16 }
 0x4db   :  { %v573_v28 = vpop.xlane.xlu0 %572 }
 0x4dc   :  { %3537 = vrcp.f32 %v573_v28  ;;  %v576_v29 = vpop.xlane.xlu1 %575 }
 0x4dd   :  { %3539 = vrcp.f32 %v576_v29 }
 0x4df   :  { %v585_v24 = vpop.permute.xlu0 %584 }
 0x4e0   :  { %3214 = vmatpush3.bf16.msra.mxu1 %v585_v24  ;;  %v734_v25 = vpop.permute.xlu1 %733 }
 0x4e1   :  { %3225 = vmatprep.subr.bf16.mxu1 %v3854_v46  ;;  %v739_v38 = vsel %vm465_vm3, %v734_v25, 0 }
 0x4e3   :  { %v681_v34 = vpop.permute.xlu0 %680 }
 0x4e4   :  { %v732_v36 = vpop.permute.xlu1 %731 }
 0x4e6   :  { %v3538_v30 = vpop.eup %3537 }
 0x4e7   :  { %v3540_v17 = vpop.eup %3539  ;;  %v579_v31 = vmul.f32 %v3538_v30, %v3534_v21 }
 0x4e8   :  { %v580_v32 = vmul.f32 %v3540_v17, %v3536_v22  ;;  %v678_v22 = vld [vmem:[#allocation10] sm:$0xf] }
 0x4e9   :  { %v581_v33 = vpack.c.bf16 %v579_v31, %v579_v31  ;;  %v952_v27 = vsel %vm903_vm5, %v678_v22, 0 }
 0x4ea   :  { %v582_v35 = vpack.c.bf16 %v580_v32, %v580_v32 }
 0x4eb   :  { %3216 = vmatmul.mubr.msk.bf16.vlgmr.msra.gmra.mrb[4].mxu1 %vm558_vm4, %v581_v33 }
 0x4ec   :  { %3226 = vmatpush3.bf16.xpose.msra.mxu1 %v688_v37  ;;  %3222 = vmatmul.mubr.msk.bf16.vlgmr.msra.gmra.mrb[12].mxu0 %vm558_vm4, %v582_v35 }
 0x4ed   :  { %3232 = vmatpush3.bf16.xpose.msra.mxu0 %v739_v38  ;;  %3227 = vmatprep.mubr.msk.bf16.mxu1 %vm3855_vm2, %v3854_v46 }
 0x4ee   :  { %3233 = vmatprep.mubr.msk.bf16.mxu0 %vm3855_vm2, %v3854_v46  ;;  %3243 = vmatprep.subr.bf16.mxu0 %v3854_v46 }
 0x4ef   :  { %3237 = vmatprep.subr.bf16.mxu1 %v3854_v46 }
 0x4f3   :  { %3228 = vmatmul.mubr.msk.bf16.vlgmr.msra.gmra.mrb[8].mxu1 %vm465_vm3, %v681_v34 }
 0x4f4   :  { %3234 = vmatmul.mubr.msk.bf16.vlgmr.msra.gmra.mrb[16].mxu0 %vm465_vm3, %v732_v36  ;;  %3239 = vmatprep.mubr.msk.bf16.mxu1 %vm3855_vm2, %v3854_v46 }
 0x4f5   :  { %3245 = vmatprep.mubr.msk.bf16.mxu0 %vm3855_vm2, %v3854_v46 }
 0x5be   :  { %v4250_v39 = vpop.f32.mrb[4].mxu1 }
 0x5bf   :  { %v3217_v40 = vpop.f32.mrb[5].mxu1  ;;  %v4252_v41 = vpop.f32.mrb[12].mxu0 }
 0x5c0   :  { %v677_v42 = vpack.c.bf16 %v4252_v41, %v4250_v39  ;;  %v627_v43 = vpop.f32.mrb[6].mxu1  ;;  %v3223_v44 = vpop.f32.mrb[13].mxu0 }
 0x5c1   :  { %v3218_v45 = vpop.f32.mrb[7].mxu1  ;;  %v674_v47 = vpop.f32.mrb[14].mxu0 }
 0x5c2   :  { %v3224_v48 = vpop.f32.mrb[15].mxu0 }
 0x5c6   :  { %v724_v49 = vpop.f32.mrb[8].mxu1 }
 0x5c7   :  { %v3229_v52 = vpop.f32.mrb[9].mxu1  ;;  %v775_v53 = vpop.f32.mrb[16].mxu0  ;;  %v781_v54 = vsel %vm558_vm4, %v724_v49, -inf }
 0x5c8   :  { %782 = vmax.xlane.f32.xlu0 %v781_v54  ;;  %v727_v55 = vpop.f32.mrb[10].mxu1  ;;  %v3235_v56 = vpop.f32.mrb[17].mxu0  ;;  %v784_v57 = vsel %vm558_vm4, %v775_v53, -inf }
 0x5c9   :  { %v3230_v58 = vpop.f32.mrb[11].mxu1  ;;  %785 = vmax.xlane.f32.xlu1 %v784_v57  ;;  %v778_v59 = vpop.f32.mrb[18].mxu0 }
 0x5ca   :  { %v3236_v60 = vpop.f32.mrb[19].mxu0 }
 0x5da   :  { %851 = vrot.lane.b32.xlu1 %v4194_v50, %s3858_s5 }
 0x5de   :  { %997 = vrot.lane.b32.xlu1 %v4196_v51, %s3859_s23 }
 0x5e2   :  { %1047 = vrot.lane.b32.xlu1 %v4194_v50, %s3859_s23 }
 0x5e6   :  { %1045 = vrot.lane.b32.xlu1 %v4206_v1, %s3859_s23 }
 0x655   :  { %v783_v61 = vpop.xlane.xlu0 %782 }
 0x656   :  { %v787_v63 = vsub.f32 %v724_v49, %v783_v61  ;;  %v786_v2 = vpop.xlane.xlu1 %785 }
 0x657   :  { %v788_v3 = vsub.f32 %v775_v53, %v786_v2 }
 0x658   :  { %v789_v4 = vmul.f32 1.442695, %v787_v63 }
 0x659   :  { %v791_v5 = vmul.f32 1.442695, %v788_v3 }
 0x65a   :  { %3541 = vpow2.f32 %v789_v4  ;;  %v852_v6 = vpop.permute.xlu1 %851 }
 0x65b   :  { %3244 = vmatpush3.bf16.msra.mxu0 %v852_v6  ;;  %3543 = vpow2.f32 %v791_v5 }
 0x65c   :  { %3255 = vmatprep.subr.bf16.mxu0 %v3854_v46 }
 0x65e   :  { %v998_v28 = vpop.permute.xlu1 %997 }
 0x65f   :  { %v1003_v34 = vsel %vm465_vm3, %v998_v28, 0 }
 0x662   :  { %v1048_v29 = vpop.permute.xlu1 %1047 }
 0x663   :  { %v1053_v24 = vsel %vm465_vm3, %v1048_v29, 0 }
 0x664   :  { %v3542_v7 = vpop.eup %3541 }
 0x665   :  { %v793_v9 = vsel %vm558_vm4, %v3542_v7, 0.0  ;;  %v3544_v10 = vpop.eup %3543 }
 0x666   :  { %794 = vadd.xlane.f32.xlu0 %v793_v9  ;;  %v796_v11 = vsel %vm558_vm4, %v3544_v10, 0.0  ;;  %v1046_v30 = vpop.permute.xlu1 %1045 }
 0x66a   :  { %797 = vadd.xlane.f32.xlu0 %v796_v11 }
 0x680   :  { %805 = vrot.lane.b32.xlu0 %v4196_v51, %s3858_s5 }
 0x684   :  { %995 = vrot.lane.b32.xlu0 %v4204_v62, %s3859_s23 }
 0x6f3   :  { %v795_v12 = vpop.xlane.xlu0 %794 }
 0x6f4   :  { %3545 = vrcp.f32 %v795_v12 }
 0x6f7   :  { %v798_v13 = vpop.xlane.xlu0 %797 }
 0x6f8   :  { %3547 = vrcp.f32 %v798_v13 }
 0x6fb   :  { %v806_v14 = vpop.permute.xlu0 %805 }
 0x6fc   :  { %3238 = vmatpush3.bf16.msra.mxu1 %v806_v14 }
 0x6fd   :  { %3249 = vmatprep.subr.bf16.mxu1 %v3854_v46 }
 0x6fe   :  { %v3546_v15 = vpop.eup %3545 }
 0x6ff   :  { %v801_v19 = vmul.f32 %v3546_v15, %v3542_v7  ;;  %v996_v41 = vpop.permute.xlu0 %995 }
 0x701   :  { %v803_v20 = vpack.c.bf16 %v801_v19, %v801_v19 }
 0x702   :  { %v3548_v21 = vpop.eup %3547 }
 0x703   :  { %v802_v23 = vmul.f32 %v3548_v21, %v3544_v10  ;;  %3240 = vmatmul.mubr.msk.bf16.vlgmr.msra.gmra.mrb[12].mxu1 %vm558_vm4, %v803_v20 }
 0x704   :  { %3250 = vmatpush3.bf16.msra.mxu1 %v905_v16  ;;  %3251 = vmatprep.mubr.msk.bf16.mxu1 %vm3855_vm2, %v3854_v46 }
 0x705   :  { %v804_v26 = vpack.c.bf16 %v802_v23, %v802_v23  ;;  %3261 = vmatprep.subr.bf16.mxu1 %v3854_v46 }
 0x707   :  { %3246 = vmatmul.mubr.msk.bf16.vlgmr.msra.gmra.mrb[20].mxu0 %vm558_vm4, %v804_v26 }
 0x708   :  { %3256 = vmatpush3.bf16.msra.mxu0 %v952_v27  ;;  %3257 = vmatprep.mubr.msk.bf16.mxu0 %vm3855_vm2, %v3854_v46 }
 0x709   :  { %3267 = vmatprep.subr.bf16.mxu0 %v3854_v46 }
 0x70f   :  { %3258 = vmatmul.mubr.msk.bf16.vlgmr.msra.gmra.mrb[24].mxu0 %vm465_vm3, %v677_v42 }
 0x710   :  { %3269 = vmatprep.mubr.msk.bf16.mxu0 %vm3855_vm2, %v3854_v46 }
 0x711   :  { %3268 = vmatpush3.bf16.xpose.msra.mxu0 %v1053_v24 }
 0x712   :  { %3279 = vmatprep.subr.bf16.mxu0 %v3854_v46 }
 0x718   :  { %3270 = vmatmul.mubr.msk.bf16.vlgmr.msra.gmra.mrb[28].mxu0 %vm465_vm3, %v1046_v30  ;;  %v1213_v30 = vld [vmem:[#allocation10 + $0x8] sm:$0xf] }
 0x719   :  { %3281 = vmatprep.mubr.msk.bf16.mxu0 %vm3855_vm2, %v3854_v46 }
 0x7d6   :  { %v845_v17 = vpop.f32.mrb[12].mxu1 }
 0x7d7   :  { %v3241_v31 = vpop.f32.mrb[13].mxu1 }
 0x7d8   :  { %v848_v32 = vpop.f32.mrb[14].mxu1 }
 0x7d9   :  { %v3242_v25 = vpop.f32.mrb[15].mxu1 }
 0x7da   :  { %v891_v33 = vpop.f32.mrb[20].mxu0 }
 0x7db   :  { %v897_v35 = vpack.c.bf16 %v891_v33, %v845_v17  ;;  %v3247_v37 = vpop.f32.mrb[21].mxu0  ;;  %v1218_v17 = vsel %vm903_vm5, %v1213_v30, 0 }
 0x7dc   :  { %v894_v38 = vpop.f32.mrb[22].mxu0 }
 0x7dd   :  { %v3248_v36 = vpop.f32.mrb[23].mxu0  ;;  %3252 = vmatmul.mubr.msk.bf16.vlgmr.msra.gmra.mrb[16].mxu1 %vm465_vm3, %v897_v35 }
 0x7de   :  { %3262 = vmatpush3.bf16.xpose.msra.mxu1 %v1003_v34  ;;  %3263 = vmatprep.mubr.msk.bf16.mxu1 %vm3855_vm2, %v3854_v46 }
 0x7df   :  { %3273 = vmatprep.subr.bf16.mxu1 %v3854_v46 }
 0x7e2   :  { %v988_v39 = vpop.f32.mrb[24].mxu0 }
 0x7e3   :  { %v3259_v40 = vpop.f32.mrb[25].mxu0 }
 0x7e4   :  { %v991_v42 = vpop.f32.mrb[26].mxu0 }
 0x7e5   :  { %v3260_v43 = vpop.f32.mrb[27].mxu0  ;;  %3264 = vmatmul.mubr.msk.bf16.vlgmr.msra.gmra.mrb[20].mxu1 %vm465_vm3, %v996_v41 }
 0x7e6   :  { %3275 = vmatprep.mubr.msk.bf16.mxu1 %vm3855_vm2, %v3854_v46 }
 0x7eb   :  { %v1089_v44 = vpop.f32.mrb[28].mxu0 }
 0x7ec   :  { %v3271_v45 = vpop.f32.mrb[29].mxu0  ;;  %v1098_v47 = vsel %vm558_vm4, %v1089_v44, -inf }
 0x7ed   :  { %1099 = vmax.xlane.f32.xlu1 %v1098_v47  ;;  %v1092_v48 = vpop.f32.mrb[30].mxu0 }
 0x7ee   :  { %v3272_v49 = vpop.f32.mrb[31].mxu0 }
 0x7fe   :  { %1165 = vrot.lane.b32.xlu1 %v4194_v50, %s3860_s8 }
 0x802   :  { %1265 = vrot.lane.b32.xlu1 %v4196_v51, %s3861_s21 }
 0x806   :  { %1315 = vrot.lane.b32.xlu1 %v4194_v50, %s3861_s21 }
 0x80a   :  { %1313 = vrot.lane.b32.xlu1 %v4206_v1, %s3861_s21 }
 0x87a   :  { %v1100_v52 = vpop.xlane.xlu1 %1099 }
 0x87b   :  { %v1102_v54 = vsub.f32 %v1089_v44, %v1100_v52 }
 0x87d   :  { %v1105_v55 = vmul.f32 1.442695, %v1102_v54 }
 0x87e   :  { %v1166_v53 = vpop.permute.xlu1 %1165 }
 0x87f   :  { %3280 = vmatpush3.bf16.msra.mxu0 %v1166_v53  ;;  %3549 = vpow2.f32 %v1105_v55 }
 0x880   :  { %3291 = vmatprep.subr.bf16.mxu0 %v3854_v46 }
 0x882   :  { %v1266_v18 = vpop.permute.xlu1 %1265 }
 0x883   :  { %v1271_v20 = vsel %vm465_vm3, %v1266_v18, 0 }
 0x886   :  { %v1316_v37 = vpop.permute.xlu1 %1315 }
 0x887   :  { %v1321_v40 = vsel %vm465_vm3, %v1316_v37, 0 }
 0x889   :  { %v3550_v3 = vpop.eup %3549 }
 0x88a   :  { %v1110_v6 = vsel %vm558_vm4, %v3550_v3, 0.0 }
 0x8b0   :  { %v941_v56 = vpop.f32.mrb[16].mxu1 }
 0x8b1   :  { %v4313_v57 = vadd.f32 %v988_v39, %v941_v56  ;;  %v3253_v58 = vpop.f32.mrb[17].mxu1 }
 0x8b2   :  { %v944_v59 = vpop.f32.mrb[18].mxu1 }
 0x8b3   :  { %v4315_v60 = vadd.f32 %v991_v42, %v944_v59  ;;  %v3254_v61 = vpop.f32.mrb[19].mxu1  ;;  %v1314_v42 = vpop.permute.xlu1 %1313 }
 0x8b8   :  { %v1039_v63 = vpop.f32.mrb[20].mxu1 }
 0x8b9   :  { %v3265_v2 = vpop.f32.mrb[21].mxu1  ;;  %v1095_v1 = vsel %vm558_vm4, %v1039_v63, -inf }
 0x8ba   :  { %1096 = vmax.xlane.f32.xlu0 %v1095_v1  ;;  %v1042_v4 = vpop.f32.mrb[22].mxu1 }
 0x8bb   :  { %v3266_v5 = vpop.f32.mrb[23].mxu1 }
 0x8be   :  { %1111 = vadd.xlane.f32.xlu0 %v1110_v6 }
 0x947   :  { %v1097_v7 = vpop.xlane.xlu0 %1096 }
 0x948   :  { %v1101_v9 = vsub.f32 %v1039_v63, %v1097_v7 }
 0x94a   :  { %v1103_v10 = vmul.f32 1.442695, %v1101_v9 }
 0x94b   :  { %v1112_v11 = vpop.xlane.xlu0 %1111 }
 0x94c   :  { %3551 = vpow2.f32 %v1103_v10 }
 0x94d   :  { %3553 = vrcp.f32 %v1112_v11 }
 0x956   :  { %v3552_v12 = vpop.eup %3551 }
 0x957   :  { %v3554_v13 = vpop.eup %3553  ;;  %v1107_v14 = vsel %vm558_vm4, %v3552_v12, 0.0 }
 0x958   :  { %v1116_v15 = vmul.f32 %v3554_v13, %v3550_v3  ;;  %1108 = vadd.xlane.f32.xlu0 %v1107_v14 }
 0x95a   :  { %v1118_v19 = vpack.c.bf16 %v1116_v15, %v1116_v15 }
 0x95c   :  { %3282 = vmatmul.mubr.msk.bf16.vlgmr.msra.gmra.mrb[32].mxu0 %vm558_vm4, %v1118_v19 }
 0x95d   :  { %3292 = vmatpush3.bf16.xpose.msra.mxu0 %v1271_v20  ;;  %3293 = vmatprep.mubr.msk.bf16.mxu0 %vm3855_vm2, %v3854_v46 }
 0x95e   :  { %3303 = vmatprep.subr.bf16.mxu0 %v3854_v46 }
 0x96e   :  { %1119 = vrot.lane.b32.xlu0 %v4196_v51, %s3860_s8 }
 0x972   :  { %1263 = vrot.lane.b32.xlu0 %v4204_v62, %s3861_s21 }
 0x9e5   :  { %v1109_v16 = vpop.xlane.xlu0 %1108 }
 0x9e6   :  { %3555 = vrcp.f32 %v1109_v16 }
 0x9e9   :  { %v1120_v21 = vpop.permute.xlu0 %1119 }
 0x9ea   :  { %3274 = vmatpush3.bf16.msra.mxu1 %v1120_v21 }
 0x9eb   :  { %3285 = vmatprep.subr.bf16.mxu1 %v3854_v46 }
 0x9ed   :  { %v1264_v22 = vpop.permute.xlu0 %1263 }
 0x9ee   :  { %3294 = vmatmul.mubr.msk.bf16.vlgmr.msra.gmra.mrb[36].mxu0 %vm465_vm3, %v1264_v22 }
 0x9ef   :  { %3305 = vmatprep.mubr.msk.bf16.mxu0 %vm3855_vm2, %v3854_v46 }
 0x9f0   :  { %v3556_v23 = vpop.eup %3555 }
 0x9f1   :  { %v1115_v26 = vmul.f32 %v3556_v23, %v3552_v12 }
 0x9f3   :  { %v1117_v27 = vpack.c.bf16 %v1115_v26, %v1115_v26 }
 0x9f5   :  { %3276 = vmatmul.mubr.msk.bf16.vlgmr.msra.gmra.mrb[24].mxu1 %vm558_vm4, %v1117_v27 }
 0x9f6   :  { %3287 = vmatprep.mubr.msk.bf16.mxu1 %vm3855_vm2, %v3854_v46  ;;  %3286 = vmatpush3.bf16.msra.mxu1 %v1218_v17  ;;  %v3609_v17 = vld [vmem:[%s4702_s25] sm:$0xff] }
 0x9f7   :  { %3297 = vmatprep.subr.bf16.mxu1 %v3854_v46 }
 0xa2f   :  { %v1205_v62 = vpop.f32.mrb[32].mxu0 }
 0xa30   :  { %v3283_v28 = vpop.f32.mrb[33].mxu0 }
 0xa31   :  { %v1208_v29 = vpop.f32.mrb[34].mxu0 }
 0xa32   :  { %v3284_v24 = vpop.f32.mrb[35].mxu0 }
 0xa33   :  { %v3035_v24 = vld [vmem:[#allocation11] ss:$0 sm:$0xff] }
 0xac1   :  { %v1307_v31 = vpop.f32.mrb[36].mxu0 }
 0xac2   :  { %v3295_v32 = vpop.f32.mrb[37].mxu0  ;;  %v1363_v25 = vsel %vm558_vm4, %v1307_v31, -inf }
 0xac3   :  { %1364 = vmax.xlane.f32.xlu0 %v1363_v25  ;;  %v1310_v33 = vpop.f32.mrb[38].mxu0 }
 0xac4   :  { %v3296_v35 = vpop.f32.mrb[39].mxu0 }
 0xac5   :  { %v3610_v35 = vld [vmem:[%s4702_s25 + $0x8] sm:$0xff] }
 0xac8   :  { %v1159_v38 = vpop.f32.mrb[24].mxu1 }
 0xac9   :  { %v1211_v34 = vpack.c.bf16 %v1205_v62, %v1159_v38  ;;  %v3277_v36 = vpop.f32.mrb[25].mxu1 }
 0xaca   :  { %v1162_v39 = vpop.f32.mrb[26].mxu1 }
 0xacb   :  { %v3278_v41 = vpop.f32.mrb[27].mxu1  ;;  %3288 = vmatmul.mubr.msk.bf16.vlgmr.msra.gmra.mrb[28].mxu1 %vm465_vm3, %v1211_v34 }
 0xacc   :  { %3298 = vmatpush3.bf16.xpose.msra.mxu1 %v1321_v40  ;;  %3299 = vmatprep.mubr.msk.bf16.mxu1 %vm3855_vm2, %v3854_v46 }
 0xacd   :  { %3309 = vmatprep.subr.bf16.mxu1 %v3854_v46 }
 0xad3   :  { %3300 = vmatmul.mubr.msk.bf16.vlgmr.msra.gmra.mrb[32].mxu1 %vm465_vm3, %v1314_v42 }
 0xad4   :  { %3311 = vmatprep.mubr.msk.bf16.mxu1 %vm3855_vm2, %v3854_v46 }
 0xb50   :  { %v1365_v43 = vpop.xlane.xlu0 %1364 }
 0xb51   :  { %v1369_v44 = vsub.f32 %v1307_v31, %v1365_v43 }
 0xb53   :  { %v1371_v45 = vmul.f32 1.442695, %v1369_v44 }
 0xb55   :  { %3557 = vpow2.f32 %v1371_v45 }
 0xb5f   :  { %v3558_v47 = vpop.eup %3557 }
 0xb60   :  { %v1375_v48 = vsel %vm558_vm4, %v3558_v47, 0.0 }
 0xb61   :  { %1376 = vadd.xlane.f32.xlu0 %v1375_v48 }
 0xb9e   :  { %v1254_v49 = vpop.f32.mrb[28].mxu1 }
 0xb9f   :  { %v1261_v52 = vadd.f32 %v1254_v49, %v4313_v57  ;;  %v3289_v53 = vpop.f32.mrb[29].mxu1 }
 0xba0   :  { %v1257_v54 = vpop.f32.mrb[30].mxu1  ;;  %v3510_v53 = vld [vmem:[%s4681_s11 + $0x8] sm:$0xff]  }
 0xba1   :  { %v1262_v55 = vadd.f32 %v1257_v54, %v4315_v60  ;;  %v3290_v56 = vpop.f32.mrb[31].mxu1 }
 0xba6   :  { %v1357_v58 = vpop.f32.mrb[32].mxu1 }
 0xba7   :  { %v3301_v59 = vpop.f32.mrb[33].mxu1  ;;  %v1366_v61 = vsel %vm558_vm4, %v1357_v58, -inf }
 0xba8   :  { %1367 = vmax.xlane.f32.xlu1 %v1366_v61  ;;  %v1360_v63 = vpop.f32.mrb[34].mxu1 }
 0xba9   :  { %v3302_v2 = vpop.f32.mrb[35].mxu1  ;;  %v1542_v63 = vld [vmem:[#allocation13] sm:$0x3] }
 0xbaa   :  { %v1572_v2 = vrot.slane %v1542_v63, %v4168_v0 }
 0xbb9   :  { %1433 = vrot.lane.b32.xlu1 %v4194_v50, %s3862_s2 }
 0xbee   :  { %v1377_v6 = vpop.xlane.xlu0 %1376 }
 0xc35   :  { %v1368_v1 = vpop.xlane.xlu1 %1367 }
 0xc36   :  { %v1370_v3 = vsub.f32 %v1357_v58, %v1368_v1 }
 0xc38   :  { %v1373_v4 = vmul.f32 1.442695, %v1370_v3 }
 0xc39   :  { %v1434_v57 = vpop.permute.xlu1 %1433 }
 0xc3a   :  { %3559 = vpow2.f32 %v1373_v4  ;;  %3310 = vmatpush3.bf16.msra.mxu1 %v1434_v57 }
 0xc3b   :  { %3321 = vmatprep.subr.bf16.mxu1 %v3854_v46  ;;  %3561 = vrcp.f32 %v1377_v6 }
 0xc44   :  { %v3560_v60 = vpop.eup %3559 }
 0xc45   :  { %v1378_v5 = vsel %vm558_vm4, %v3560_v60, 0.0  ;;  %v3562_v7 = vpop.eup %3561 }
 0xc46   :  { %1379 = vadd.xlane.f32.xlu0 %v1378_v5  ;;  %v1383_v50 = vmul.f32 %v3562_v7, %v3558_v47  ;;  %v1578_v5 = vrot.slane %v1542_v63, %v4172_v8 }
 0xc48   :  { %v1385_v11 = vpack.c.bf16 %v1383_v50, %v1383_v50 }
 0xc5c   :  { %1387 = vrot.lane.b32.xlu0 %v4196_v51, %s3862_s2  ;;  %v1481_v51 = vld [vmem:[#allocation10 + $0xc] sm:$0xf] }
 0xc5d   :  { %v1486_v15 = vsel %vm903_vm5, %v1481_v51, 0 }
 0xcd3   :  { %v1380_v9 = vpop.xlane.xlu0 %1379 }
 0xcd4   :  { %3563 = vrcp.f32 %v1380_v9 }
 0xcd7   :  { %v1388_v10 = vpop.permute.xlu0 %1387 }
 0xcd8   :  { %3304 = vmatpush3.bf16.msra.mxu0 %v1388_v10  ;;  %v3036_v10 = vld [vmem:[#allocation14] ss:$0 sm:$0xff] }
 0xcd9   :  { %3315 = vmatprep.subr.bf16.mxu0 %v3854_v46 }
 0xcdb   :  { %3306 = vmatmul.mubr.msk.bf16.vlgmr.msra.gmra.mrb[40].mxu0 %vm558_vm4, %v1385_v11 }
 0xcdc   :  { %3317 = vmatprep.mubr.msk.bf16.mxu0 %vm3855_vm2, %v3854_v46  ;;  %3316 = vmatpush3.bf16.msra.mxu0 %v1486_v15 }
 0xcdd   :  { %3329 = vmatprep.subr.bf16.mxu0 %v3854_v46 }
 0xcde   :  { %v3564_v12 = vpop.eup %3563 }
 0xcdf   :  { %v1384_v13 = vmul.f32 %v3564_v12, %v3560_v60 }
 0xce1   :  { %v1386_v14 = vpack.c.bf16 %v1384_v13, %v1384_v13 }
 0xce3   :  { %3312 = vmatmul.mubr.msk.bf16.vlgmr.msra.gmra.mrb[36].mxu1 %vm558_vm4, %v1386_v14 }
 0xce4   :  { %3325 = vmatprep.mubr.msk.bf16.mxu1 %vm3855_vm2, %v3854_v46 }
 0xdae   :  { %v1427_v18 = vpop.f32.mrb[40].mxu0 }
 0xdaf   :  { %v3307_v19 = vpop.f32.mrb[41].mxu0 }
 0xdb0   :  { %v1430_v20 = vpop.f32.mrb[42].mxu0 }
 0xdb1   :  { %v3308_v16 = vpop.f32.mrb[43].mxu0 }
 0xdb6   :  { %v1473_v21 = vpop.f32.mrb[36].mxu1 }
 0xdb7   :  { %v1479_v22 = vpack.c.bf16 %v1473_v21, %v1427_v18  ;;  %v3313_v23 = vpop.f32.mrb[37].mxu1 }
 0xdb8   :  { %v1476_v26 = vpop.f32.mrb[38].mxu1 }
 0xdb9   :  { %v3314_v27 = vpop.f32.mrb[39].mxu1  ;;  %3318 = vmatmul.mubr.msk.bf16.vlgmr.msra.gmra.mrb[44].mxu0 %vm465_vm3, %v1479_v22 }
 0xdba   :  { %3331 = vmatprep.mubr.msk.bf16.mxu0 %vm3855_vm2, %v3854_v46 }
 0xe8c   :  { %v1522_v62 = vpop.f32.mrb[44].mxu0 }
 0xe8d   :  { %v1529_v28 = vadd.f32 %v1522_v62, %v1261_v52  ;;  %v3319_v29 = vpop.f32.mrb[45].mxu0  ;;  %v3509_v52 = vld [vmem:[%s4681_s11] sm:$0xff]   ;;  %s3863_s11 = smov 56  }
 0xe8e   :  { %v1525_v30 = vpop.f32.mrb[46].mxu0  ;;  %3322 = vmatpush3.bf16.msra.mxu1 %v3509_v52 }
 0xe8f   :  { %v1531_v31 = vadd.f32 %v3609_v17, %v1529_v28  ;;  %v1530_v32 = vadd.f32 %v1525_v30, %v1262_v55  ;;  %v3320_v25 = vpop.f32.mrb[47].mxu0  ;;  %3323 = vmatprep.subr.bf16.mxu1 %v3854_v46 }
 0xe91   :  { %v4372_v33 = vadd.f32 %v3035_v24, %v1531_v31  ;;  %v1532_v37 = vadd.f32 %v3610_v35, %v1530_v32 }
 0xe92   :  { %3324 = vmatpush3.bf16.msra.mxu1 %v3510_v53 }
 0xe93   :  { %v4377_v38 = vadd.f32 %v3035_v24, %v1532_v37  ;;  %v1543_v34 = vsel %vm351_vm1, %v4372_v33, 0.0  ;;  %3335 = vmatprep.subr.bf16.mxu1 %v3854_v46 }
 0xe94   :  { %1544 = vadd.xlane.f32.xlu1 %v1543_v34 }
 0xe95   :  { %v1546_v36 = vsel %vm351_vm1, %v4377_v38, 0.0 }
 0xe96   :  { %1547 = vadd.xlane.f32.xlu0 %v1546_v36 }
 0xf21   :  { %v1545_v39 = vpop.xlane.xlu1 %1544 }
 0xf22   :  { %v1549_v40 = vmul.f32 0.03125, %v1545_v39 }
 0xf23   :  { %v1548_v41 = vpop.xlane.xlu0 %1547 }
 0xf24   :  { %v1551_v42 = vsub.f32 %v4372_v33, %v1549_v40  ;;  %v1550_v43 = vmul.f32 0.03125, %v1548_v41 }
 0xf26   :  { %v1552_v44 = vsub.f32 %v4377_v38, %v1550_v43  ;;  %v1553_v45 = vmul.f32 %v1551_v42, %v1551_v42 }
 0xf28   :  { %v1555_v47 = vsel %vm351_vm1, %v1553_v45, 0.0  ;;  %v1554_v48 = vmul.f32 %v1552_v44, %v1552_v44 }
 0xf29   :  { %1556 = vadd.xlane.f32.xlu0 %v1555_v47 }
 0xf2a   :  { %v1558_v49 = vsel %vm351_vm1, %v1554_v48, 0.0 }
 0xf2b   :  { %1559 = vadd.xlane.f32.xlu1 %v1558_v49 }
 0xfb6   :  { %v1557_v54 = vpop.xlane.xlu0 %1556 }
 0xfb7   :  { %v1561_v55 = vmul.f32 0.03125, %v1557_v54 }
 0xfb8   :  { %v1560_v56 = vpop.xlane.xlu1 %1559 }
 0xfb9   :  { %v1563_v58 = vadd.f32 1e-05, %v1561_v55  ;;  %v1562_v59 = vmul.f32 0.03125, %v1560_v56 }
 0xfbb   :  { %3565 = vrsqrt.f32 %v1563_v58  ;;  %v1564_v61 = vadd.f32 1e-05, %v1562_v59 }
 0xfbd   :  { %3567 = vrsqrt.f32 %v1564_v61 }
 0xfc5   :  { %v3566_v1 = vpop.eup %3565 }
 0xfc6   :  { %v1567_v3 = vmul.f32 %v3566_v1, %v1551_v42 }
 0xfc7   :  { %v3568_v4 = vpop.eup %3567 }
 0xfc8   :  { %v1573_v57 = vmul.f32 %v1572_v2, %v1567_v3  ;;  %v1568_v60 = vmul.f32 %v3568_v4, %v1552_v44 }
 0xfca   :  { %v1574_v6 = vmul.f32 %v1572_v2, %v1568_v60  ;;  %v1579_v7 = vadd.f32 %v1578_v5, %v1573_v57 }
 0xfcc   :  { %v1580_v9 = vadd.f32 %v1578_v5, %v1574_v6 }
 0xfce   :  { %v1585_v50 = vpack.c.bf16 %v1580_v9, %v1579_v7 }
 0xfd0   :  { %3326 = vmatmul.mubr.msk.bf16.vlgmr.msra.gmra.mrb[40].mxu1 %vm351_vm1, %v1585_v50 }
 0xfd1   :  { %3337 = vmatprep.mubr.msk.bf16.mxu1 %vm3855_vm2, %v3854_v46 }
0x10a3   :  { %v1642_v11 = vpop.f32.mrb[40].mxu1 }
0x10a4   :  { %v1643_v12 = vadd.f32 %v3036_v10, %v1642_v11  ;;  %v3327_v13 = vpop.f32.mrb[41].mxu1 }
0x10a5   :  { %v1645_v14 = vpop.f32.mrb[42].mxu1 }
0x10a6   :  { %v4400_v51 = vpack.c.bf16 %v1643_v12, %v1643_v12  ;;  %v1646_v15 = vadd.f32 %v3036_v10, %v1645_v14  ;;  %v3328_v18 = vpop.f32.mrb[43].mxu1  ;;  %v1649_v22 = vmul.f32 0.35355338, %v1643_v12 }
0x10a8   :  { %v4402_v19 = vpack.c.bf16 %v1646_v15, %v1646_v15  ;;  %1656 = vrot.lane.b32.xlu0 %v4400_v51, %s3856_s0  ;;  %v1650_v26 = vmul.f32 0.35355338, %v1646_v15  ;;  %v4412_v27 = vpack.c.bf16 %v1649_v22, %v1649_v22 }
0x10aa   :  { %1705 = vrot.lane.b32.xlu1 %v4402_v19, %s3856_s0  ;;  %v4414_v62 = vpack.c.bf16 %v1650_v26, %v1650_v26 }
0x111a   :  { %v1657_v20 = vpop.permute.xlu0 %1656 }
0x111b   :  { %v1662_v16 = vsel %vm465_vm3, %v1657_v20, 0 }
0x111c   :  { %3330 = vmatpush3.bf16.xpose.msra.mxu0 %v1662_v16  ;;  %v1706_v21 = vpop.permute.xlu1 %1705 }
0x111d   :  { %v1711_v23 = vsel %vm465_vm3, %v1706_v21, 0  ;;  %3341 = vmatprep.subr.bf16.mxu0 %v3854_v46 }
0x111e   :  { %3336 = vmatpush3.bf16.xpose.msra.mxu1 %v1711_v23 }
0x111f   :  { %3347 = vmatprep.subr.bf16.mxu1 %v3854_v46 }
0x1123   :  { %3332 = vmatmul.mubr.msk.bf16.vlgmr.msra.gmra.mrb[48].mxu0 %vm465_vm3, %v4412_v27 }
0x1124   :  { %3343 = vmatprep.mubr.msk.bf16.mxu0 %vm3855_vm2, %v3854_v46 }
0x1125   :  { %3338 = vmatmul.mubr.msk.bf16.vlgmr.msra.gmra.mrb[44].mxu1 %vm465_vm3, %v4414_v62 }
0x1126   :  { %3349 = vmatprep.mubr.msk.bf16.mxu1 %vm3855_vm2, %v3854_v46 }
0x11f6   :  { %v1698_v28 = vpop.f32.mrb[48].mxu0 }
0x11f7   :  { %v3333_v29 = vpop.f32.mrb[49].mxu0  ;;  %v1753_v24 = vsel %vm465_vm3, %v1698_v28, -inf }
0x11f8   :  { %v1747_v30 = vpop.f32.mrb[44].mxu1  ;;  %1754 = vmax.xlane.f32.xlu1 %v1753_v24  ;;  %v1701_v17 = vpop.f32.mrb[50].mxu0 }
0x11f9   :  { %v3334_v31 = vpop.f32.mrb[51].mxu0  ;;  %v3339_v32 = vpop.f32.mrb[45].mxu1  ;;  %v1756_v25 = vsel %vm465_vm3, %v1747_v30, -inf }
0x11fa   :  { %1757 = vmax.xlane.f32.xlu0 %v1756_v25  ;;  %v1750_v35 = vpop.f32.mrb[46].mxu1 }
0x11fb   :  { %v3340_v37 = vpop.f32.mrb[47].mxu1 }
0x1209   :  { %1825 = vrot.lane.b32.xlu1 %v4402_v19, %s3849_s26 }
0x120d   :  { %1878 = vrot.lane.b32.xlu1 %v4400_v51, %s3858_s5 }
0x1285   :  { %v1755_v34 = vpop.xlane.xlu1 %1754 }
0x1286   :  { %v1759_v36 = vsub.f32 %v1698_v28, %v1755_v34 }
0x1287   :  { %v1758_v39 = vpop.xlane.xlu0 %1757 }
0x1288   :  { %v1761_v40 = vmul.f32 1.442695, %v1759_v36  ;;  %v1760_v41 = vsub.f32 %v1747_v30, %v1758_v39 }
0x1289   :  { %v1826_v42 = vpop.permute.xlu1 %1825 }
0x128a   :  { %3569 = vpow2.f32 %v1761_v40  ;;  %v1763_v43 = vmul.f32 1.442695, %v1760_v41  ;;  %v1831_v44 = vsel %vm903_vm5, %v1826_v42, 0 }
0x128b   :  { %3348 = vmatpush3.bf16.msra.mxu1 %v1831_v44 }
0x128c   :  { %3571 = vpow2.f32 %v1763_v43  ;;  %3359 = vmatprep.subr.bf16.mxu1 %v3854_v46 }
0x128d   :  { %v1879_v52 = vpop.permute.xlu1 %1878 }
0x128e   :  { %v1884_v3 = vsel %vm465_vm3, %v1879_v52, 0 }
0x1294   :  { %v3570_v45 = vpop.eup %3569 }
0x1295   :  { %v1765_v47 = vsel %vm465_vm3, %v3570_v45, 0.0 }
0x1296   :  { %v3572_v48 = vpop.eup %3571  ;;  %1766 = vadd.xlane.f32.xlu0 %v1765_v47  ;;  %v3048_v47 = vld [vmem:[%s4683_s13 + $0x4] sm:$0xf] }
0x1297   :  { %v1768_v49 = vsel %vm465_vm3, %v3572_v48, 0.0  ;;  %v2104_v52 = vsel %vm903_vm5, %v3048_v47, 0 }
0x1298   :  { %1769 = vadd.xlane.f32.xlu1 %v1768_v49 }
0x12a9   :  { %1929 = vrot.lane.b32.xlu1 %v4402_v19, %s3858_s5 }
0x12ac   :  { %1777 = vrot.lane.b32.xlu0 %v4400_v51, %s3849_s26 }
0x12ad   :  { %1927 = vrot.lane.b32.xlu1 %v4414_v62, %s3857_s16 }
0x12b0   :  { %1876 = vrot.lane.b32.xlu0 %v4412_v27, %s3857_s16 }
0x1323   :  { %v1767_v53 = vpop.xlane.xlu0 %1766 }
0x1324   :  { %3573 = vrcp.f32 %v1767_v53 }
0x1325   :  { %v1770_v54 = vpop.xlane.xlu1 %1769 }
0x1326   :  { %3575 = vrcp.f32 %v1770_v54  ;;  %v1874_v54 = vld [vmem:[%s4683_s13] sm:$0xf] }
0x1327   :  { %v1778_v55 = vpop.permute.xlu0 %1777 }
0x1328   :  { %v1783_v56 = vsel %vm903_vm5, %v1778_v55, 0 }
0x1329   :  { %3342 = vmatpush3.bf16.msra.mxu0 %v1783_v56  ;;  %v1930_v1 = vpop.permute.xlu1 %1929 }
0x132a   :  { %3353 = vmatprep.subr.bf16.mxu0 %v3854_v46  ;;  %v1935_v57 = vsel %vm465_vm3, %v1930_v1, 0 }
0x132b   :  { %v1877_v60 = vpop.permute.xlu0 %1876 }
0x132d   :  { %v1928_v5 = vpop.permute.xlu1 %1927 }
0x132e   :  { %v3574_v58 = vpop.eup %3573 }
0x132f   :  { %v1773_v59 = vmul.f32 %v3574_v58, %v3570_v45  ;;  %v2151_v58 = vsel %vm903_vm5, %v1874_v54, 0 }
0x1330   :  { %v3576_v61 = vpop.eup %3575 }
0x1331   :  { %v1774_v63 = vmul.f32 %v3576_v61, %v3572_v48  ;;  %v1775_v2 = vpack.c.bf16 %v1773_v59, %v1773_v59 }
0x1333   :  { %3344 = vmatmul.mubr.msk.bf16.vlgmr.msra.gmra.mrb[52].mxu0 %vm465_vm3, %v1775_v2  ;;  %v1776_v4 = vpack.c.bf16 %v1774_v63, %v1774_v63 }
0x1334   :  { %3354 = vmatpush3.bf16.xpose.msra.mxu0 %v1884_v3  ;;  %3355 = vmatprep.mubr.msk.bf16.mxu0 %vm3855_vm2, %v3854_v46 }
0x1335   :  { %3350 = vmatmul.mubr.msk.bf16.vlgmr.msra.gmra.mrb[48].mxu1 %vm465_vm3, %v1776_v4  ;;  %3365 = vmatprep.subr.bf16.mxu0 %v3854_v46 }
0x1336   :  { %3360 = vmatpush3.bf16.xpose.msra.mxu1 %v1935_v57  ;;  %3361 = vmatprep.mubr.msk.bf16.mxu1 %vm3855_vm2, %v3854_v46 }
0x1337   :  { %3371 = vmatprep.subr.bf16.mxu1 %v3854_v46 }
0x133b   :  { %3356 = vmatmul.mubr.msk.bf16.vlgmr.msra.gmra.mrb[56].mxu0 %vm465_vm3, %v1877_v60 }
0x133c   :  { %3367 = vmatprep.mubr.msk.bf16.mxu0 %vm3855_vm2, %v3854_v46 }
0x133d   :  { %3362 = vmatmul.mubr.msk.bf16.vlgmr.msra.gmra.mrb[52].mxu1 %vm465_vm3, %v1928_v5 }
0x133e   :  { %3373 = vmatprep.mubr.msk.bf16.mxu1 %vm3855_vm2, %v3854_v46 }
0x1406   :  { %v4460_v6 = vpop.f32.mrb[52].mxu0 }
0x1407   :  { %v3345_v7 = vpop.f32.mrb[53].mxu0 }
0x1408   :  { %v1822_v9 = vpop.f32.mrb[54].mxu0  ;;  %v4462_v50 = vpop.f32.mrb[48].mxu1 }
0x1409   :  { %v1873_v10 = vpack.c.bf16 %v4462_v50, %v4460_v6  ;;  %v3346_v11 = vpop.f32.mrb[55].mxu0  ;;  %v3351_v12 = vpop.f32.mrb[49].mxu1 }
0x140a   :  { %v1870_v13 = vpop.f32.mrb[50].mxu1 }
0x140b   :  { %v3352_v14 = vpop.f32.mrb[51].mxu1 }
0x140e   :  { %v1920_v15 = vpop.f32.mrb[56].mxu0 }
0x140f   :  { %v3357_v18 = vpop.f32.mrb[57].mxu0  ;;  %v1977_v20 = vsel %vm465_vm3, %v1920_v15, -inf }
0x1410   :  { %v1971_v16 = vpop.f32.mrb[52].mxu1  ;;  %1978 = vmax.xlane.f32.xlu0 %v1977_v20  ;;  %v1923_v21 = vpop.f32.mrb[58].mxu0 }
0x1411   :  { %v3358_v22 = vpop.f32.mrb[59].mxu0  ;;  %v3363_v23 = vpop.f32.mrb[53].mxu1  ;;  %v1980_v26 = vsel %vm465_vm3, %v1971_v16, -inf }
0x1412   :  { %1981 = vmax.xlane.f32.xlu1 %v1980_v26  ;;  %v1974_v28 = vpop.f32.mrb[54].mxu1 }
0x1413   :  { %v3364_v29 = vpop.f32.mrb[55].mxu1 }
0x1423   :  { %2049 = vrot.lane.b32.xlu1 %v4402_v19, %s3863_s11 }
0x1427   :  { %2196 = vrot.lane.b32.xlu1 %v4400_v51, %s3860_s8 }
0x142b   :  { %2246 = vrot.lane.b32.xlu1 %v4402_v19, %s3860_s8 }
0x142f   :  { %2244 = vrot.lane.b32.xlu1 %v4414_v62, %s3859_s23 }
0x149d   :  { %v1979_v24 = vpop.xlane.xlu0 %1978 }
0x149e   :  { %v1983_v30 = vsub.f32 %v1920_v15, %v1979_v24 }
0x149f   :  { %v1982_v17 = vpop.xlane.xlu1 %1981 }
0x14a0   :  { %v1985_v31 = vmul.f32 1.442695, %v1983_v30  ;;  %v1984_v32 = vsub.f32 %v1971_v16, %v1982_v17 }
0x14a2   :  { %3577 = vpow2.f32 %v1985_v31  ;;  %v1987_v25 = vmul.f32 1.442695, %v1984_v32 }
0x14a3   :  { %v2050_v35 = vpop.permute.xlu1 %2049 }
0x14a4   :  { %3579 = vpow2.f32 %v1987_v25  ;;  %v2055_v37 = vsel %vm903_vm5, %v2050_v35, 0 }
0x14a5   :  { %3372 = vmatpush3.bf16.msra.mxu1 %v2055_v37 }
0x14a6   :  { %3383 = vmatprep.subr.bf16.mxu1 %v3854_v46 }
0x14a7   :  { %v2197_v59 = vpop.permute.xlu1 %2196 }
0x14a8   :  { %v2202_v9 = vsel %vm465_vm3, %v2197_v59, 0 }
0x14ab   :  { %v2247_v61 = vpop.permute.xlu1 %2246 }
0x14ac   :  { %v3578_v34 = vpop.eup %3577  ;;  %v2252_v63 = vsel %vm465_vm3, %v2247_v61, 0 }
0x14ad   :  { %v1989_v36 = vsel %vm465_vm3, %v3578_v34, 0.0 }
0x14ae   :  { %v3580_v39 = vpop.eup %3579  ;;  %1990 = vadd.xlane.f32.xlu0 %v1989_v36 }
0x14af   :  { %v1992_v40 = vsel %vm465_vm3, %v3580_v39, 0.0  ;;  %v2245_v2 = vpop.permute.xlu1 %2244 }
0x14b2   :  { %1993 = vadd.xlane.f32.xlu0 %v1992_v40 }
0x14c8   :  { %2001 = vrot.lane.b32.xlu0 %v4400_v51, %s3863_s11 }
0x14cc   :  { %2194 = vrot.lane.b32.xlu0 %v4412_v27, %s3859_s23 }
0x153b   :  { %v1991_v41 = vpop.xlane.xlu0 %1990 }
0x153c   :  { %3581 = vrcp.f32 %v1991_v41 }
0x153f   :  { %v1994_v42 = vpop.xlane.xlu0 %1993 }
0x1540   :  { %3583 = vrcp.f32 %v1994_v42 }
0x1543   :  { %v2002_v43 = vpop.permute.xlu0 %2001 }
0x1544   :  { %v2007_v44 = vsel %vm903_vm5, %v2002_v43, 0 }
0x1545   :  { %3366 = vmatpush3.bf16.msra.mxu0 %v2007_v44 }
0x1546   :  { %v3582_v45 = vpop.eup %3581  ;;  %3377 = vmatprep.subr.bf16.mxu0 %v3854_v46 }
0x1547   :  { %v1997_v48 = vmul.f32 %v3582_v45, %v3578_v34  ;;  %v2195_v12 = vpop.permute.xlu0 %2194 }
0x1549   :  { %v1999_v49 = vpack.c.bf16 %v1997_v48, %v1997_v48 }
0x154a   :  { %v3584_v53 = vpop.eup %3583 }
0x154b   :  { %v1998_v55 = vmul.f32 %v3584_v53, %v3580_v39  ;;  %3368 = vmatmul.mubr.msk.bf16.vlgmr.msra.gmra.mrb[60].mxu0 %vm465_vm3, %v1999_v49 }
0x154c   :  { %3378 = vmatpush3.bf16.msra.mxu0 %v2104_v52  ;;  %3379 = vmatprep.mubr.msk.bf16.mxu0 %vm3855_vm2, %v3854_v46 }
0x154d   :  { %v2000_v56 = vpack.c.bf16 %v1998_v55, %v1998_v55  ;;  %3389 = vmatprep.subr.bf16.mxu0 %v3854_v46 }
0x154f   :  { %3374 = vmatmul.mubr.msk.bf16.vlgmr.msra.gmra.mrb[56].mxu1 %vm465_vm3, %v2000_v56 }
0x1550   :  { %3384 = vmatpush3.bf16.msra.mxu1 %v2151_v58  ;;  %3385 = vmatprep.mubr.msk.bf16.mxu1 %vm3855_vm2, %v3854_v46 }
0x1551   :  { %3395 = vmatprep.subr.bf16.mxu1 %v3854_v46 }
0x1557   :  { %3386 = vmatmul.mubr.msk.bf16.vlgmr.msra.gmra.mrb[60].mxu1 %vm465_vm3, %v1873_v10 }
0x1558   :  { %3397 = vmatprep.mubr.msk.bf16.mxu1 %vm3855_vm2, %v3854_v46 }
0x1559   :  { %3396 = vmatpush3.bf16.xpose.msra.mxu1 %v2252_v63 }
0x155a   :  { %3407 = vmatprep.subr.bf16.mxu1 %v3854_v46 }
0x1560   :  { %3398 = vmatmul.mubr.msk.bf16.vlgmr.msra.gmra.mrb[64].mxu1 %vm465_vm3, %v2245_v2 }
0x1561   :  { %3409 = vmatprep.mubr.msk.bf16.mxu1 %vm3855_vm2, %v3854_v46 }
0x161e   :  { %v2043_v1 = vpop.f32.mrb[60].mxu0 }
0x161f   :  { %v3369_v3 = vpop.f32.mrb[61].mxu0 }
0x1620   :  { %v2046_v4 = vpop.f32.mrb[62].mxu0 }
0x1621   :  { %v3370_v57 = vpop.f32.mrb[63].mxu0 }
0x1622   :  { %v2091_v60 = vpop.f32.mrb[56].mxu1  ;;  %v3055_v57 = vld [vmem:[%s4683_s13 + $0x8] sm:$0xf] }
0x1623   :  { %v2097_v5 = vpack.c.bf16 %v2091_v60, %v2043_v1  ;;  %v3375_v6 = vpop.f32.mrb[57].mxu1  ;;  %v2421_v60 = vsel %vm903_vm5, %v3055_v57, 0 }
0x1624   :  { %v2094_v7 = vpop.f32.mrb[58].mxu1 }
0x1625   :  { %v3376_v50 = vpop.f32.mrb[59].mxu1  ;;  %3380 = vmatmul.mubr.msk.bf16.vlgmr.msra.gmra.mrb[64].mxu0 %vm465_vm3, %v2097_v5 }
0x1626   :  { %3390 = vmatpush3.bf16.xpose.msra.mxu0 %v2202_v9  ;;  %3391 = vmatprep.mubr.msk.bf16.mxu0 %vm3855_vm2, %v3854_v46 }
0x1627   :  { %3401 = vmatprep.subr.bf16.mxu0 %v3854_v46 }
0x162a   :  { %v2187_v10 = vpop.f32.mrb[60].mxu1 }
0x162b   :  { %v3387_v11 = vpop.f32.mrb[61].mxu1 }
0x162c   :  { %v2190_v13 = vpop.f32.mrb[62].mxu1 }
0x162d   :  { %v3388_v14 = vpop.f32.mrb[63].mxu1  ;;  %3392 = vmatmul.mubr.msk.bf16.vlgmr.msra.gmra.mrb[68].mxu0 %vm465_vm3, %v2195_v12 }
0x162e   :  { %3403 = vmatprep.mubr.msk.bf16.mxu0 %vm3855_vm2, %v3854_v46 }
0x1633   :  { %v2288_v15 = vpop.f32.mrb[64].mxu1 }
0x1634   :  { %v3399_v18 = vpop.f32.mrb[65].mxu1  ;;  %v2297_v20 = vsel %vm465_vm3, %v2288_v15, -inf }
0x1635   :  { %2298 = vmax.xlane.f32.xlu1 %v2297_v20  ;;  %v2291_v16 = vpop.f32.mrb[66].mxu1 }
0x1636   :  { %v3400_v21 = vpop.f32.mrb[67].mxu1 }
0x1646   :  { %2366 = vrot.lane.b32.xlu1 %v4402_v19, %s3864_s22 }
0x164a   :  { %2468 = vrot.lane.b32.xlu1 %v4400_v51, %s3862_s2 }
0x164e   :  { %2518 = vrot.lane.b32.xlu1 %v4402_v19, %s3862_s2 }
0x1652   :  { %2516 = vrot.lane.b32.xlu1 %v4414_v62, %s3861_s21 }
0x16c2   :  { %v2299_v22 = vpop.xlane.xlu1 %2298 }
0x16c3   :  { %v2301_v28 = vsub.f32 %v2288_v15, %v2299_v22 }
0x16c5   :  { %v2304_v29 = vmul.f32 1.442695, %v2301_v28 }
0x16c6   :  { %v2367_v23 = vpop.permute.xlu1 %2366 }
0x16c7   :  { %v2372_v26 = vsel %vm903_vm5, %v2367_v23, 0  ;;  %3585 = vpow2.f32 %v2304_v29 }
0x16c8   :  { %3408 = vmatpush3.bf16.msra.mxu1 %v2372_v26 }
0x16c9   :  { %3419 = vmatprep.subr.bf16.mxu1 %v3854_v46 }
0x16ca   :  { %v2469_v52 = vpop.permute.xlu1 %2468 }
0x16cb   :  { %v2474_v54 = vsel %vm465_vm3, %v2469_v52, 0 }
0x16d1   :  { %v3586_v34 = vpop.eup %3585 }
0x16d2   :  { %v2309_v40 = vsel %vm465_vm3, %v3586_v34, 0.0 }
0x16f8   :  { %v2140_v24 = vpop.f32.mrb[64].mxu0 }
0x16f9   :  { %v4530_v30 = vadd.f32 %v2187_v10, %v2140_v24  ;;  %v3381_v17 = vpop.f32.mrb[65].mxu0  ;;  %v2519_v10 = vpop.permute.xlu1 %2518 }
0x16fa   :  { %v2143_v31 = vpop.f32.mrb[66].mxu0  ;;  %v2524_v15 = vsel %vm465_vm3, %v2519_v10, 0 }
0x16fb   :  { %v4532_v32 = vadd.f32 %v2190_v13, %v2143_v31  ;;  %v3382_v25 = vpop.f32.mrb[67].mxu0 }
0x16fd   :  { %v2517_v20 = vpop.permute.xlu1 %2516 }
0x1700   :  { %v2238_v35 = vpop.f32.mrb[68].mxu0 }
0x1701   :  { %v3393_v62 = vpop.f32.mrb[69].mxu0  ;;  %v2294_v37 = vsel %vm465_vm3, %v2238_v35, -inf }
0x1702   :  { %2295 = vmax.xlane.f32.xlu0 %v2294_v37  ;;  %v2241_v36 = vpop.f32.mrb[70].mxu0 }
0x1703   :  { %v3394_v39 = vpop.f32.mrb[71].mxu0 }
0x1706   :  { %2310 = vadd.xlane.f32.xlu0 %v2309_v40 }
0x178f   :  { %v2296_v41 = vpop.xlane.xlu0 %2295 }
0x1790   :  { %v2300_v42 = vsub.f32 %v2238_v35, %v2296_v41 }
0x1792   :  { %v2302_v43 = vmul.f32 1.442695, %v2300_v42 }
0x1793   :  { %v2311_v44 = vpop.xlane.xlu0 %2310 }
0x1794   :  { %3587 = vpow2.f32 %v2302_v43 }
0x1795   :  { %3589 = vrcp.f32 %v2311_v44 }
0x179e   :  { %v3588_v45 = vpop.eup %3587 }
0x179f   :  { %v3590_v47 = vpop.eup %3589  ;;  %v2306_v48 = vsel %vm465_vm3, %v3588_v45, 0.0 }
0x17a0   :  { %v2315_v49 = vmul.f32 %v3590_v47, %v3586_v34  ;;  %2307 = vadd.xlane.f32.xlu0 %v2306_v48 }
0x17a2   :  { %v2317_v53 = vpack.c.bf16 %v2315_v49, %v2315_v49 }
0x17a4   :  { %3410 = vmatmul.mubr.msk.bf16.vlgmr.msra.gmra.mrb[68].mxu1 %vm465_vm3, %v2317_v53 }
0x17a5   :  { %3420 = vmatpush3.bf16.xpose.msra.mxu1 %v2474_v54  ;;  %3421 = vmatprep.mubr.msk.bf16.mxu1 %vm3855_vm2, %v3854_v46 }
0x17a6   :  { %3431 = vmatprep.subr.bf16.mxu1 %v3854_v46 }
0x17b6   :  { %2318 = vrot.lane.b32.xlu0 %v4400_v51, %s3864_s22 }
0x17ba   :  { %2466 = vrot.lane.b32.xlu0 %v4412_v27, %s3861_s21 }
0x182d   :  { %v2308_v55 = vpop.xlane.xlu0 %2307 }
0x182e   :  { %3591 = vrcp.f32 %v2308_v55  ;;  %v3061_v55 = vld [vmem:[%s4683_s13 + $0xc] sm:$0xf] }
0x1831   :  { %v2319_v56 = vpop.permute.xlu0 %2318 }
0x1832   :  { %v2324_v58 = vsel %vm903_vm5, %v2319_v56, 0  ;;  %v2693_v56 = vsel %vm903_vm5, %v3061_v55, 0 }
0x1833   :  { %3402 = vmatpush3.bf16.msra.mxu0 %v2324_v58 }
0x1834   :  { %3413 = vmatprep.subr.bf16.mxu0 %v3854_v46 }
0x1835   :  { %v2467_v59 = vpop.permute.xlu0 %2466 }
0x1836   :  { %3422 = vmatmul.mubr.msk.bf16.vlgmr.msra.gmra.mrb[72].mxu1 %vm465_vm3, %v2467_v59 }
0x1837   :  { %3433 = vmatprep.mubr.msk.bf16.mxu1 %vm3855_vm2, %v3854_v46 }
0x1838   :  { %v3592_v61 = vpop.eup %3591 }
0x1839   :  { %v2314_v63 = vmul.f32 %v3592_v61, %v3588_v45 }
0x183b   :  { %v2316_v2 = vpack.c.bf16 %v2314_v63, %v2314_v63 }
0x183d   :  { %3404 = vmatmul.mubr.msk.bf16.vlgmr.msra.gmra.mrb[72].mxu0 %vm465_vm3, %v2316_v2 }
0x183e   :  { %3415 = vmatprep.mubr.msk.bf16.mxu0 %vm3855_vm2, %v3854_v46  ;;  %3414 = vmatpush3.bf16.msra.mxu0 %v2421_v60 }
0x183f   :  { %3425 = vmatprep.subr.bf16.mxu0 %v3854_v46 }
0x1877   :  { %v2408_v27 = vpop.f32.mrb[68].mxu1 }
0x1878   :  { %v3411_v1 = vpop.f32.mrb[69].mxu1 }
0x1879   :  { %v2411_v3 = vpop.f32.mrb[70].mxu1 }
0x187a   :  { %v3412_v4 = vpop.f32.mrb[71].mxu1 }
0x1909   :  { %v2510_v5 = vpop.f32.mrb[72].mxu1 }
0x190a   :  { %v3423_v6 = vpop.f32.mrb[73].mxu1  ;;  %v2566_v7 = vsel %vm465_vm3, %v2510_v5, -inf }
0x190b   :  { %2567 = vmax.xlane.f32.xlu0 %v2566_v7  ;;  %v2513_v9 = vpop.f32.mrb[74].mxu1  ;;  %v3063_v6 = vld [vmem:[%s4684_s14] ss:$0 sm:$0xff] }
0x190c   :  { %v3424_v50 = vpop.f32.mrb[75].mxu1 }
0x1910   :  { %v2360_v11 = vpop.f32.mrb[72].mxu0 }
0x1911   :  { %v2414_v12 = vpack.c.bf16 %v2408_v27, %v2360_v11  ;;  %v3405_v13 = vpop.f32.mrb[73].mxu0 }
0x1912   :  { %v2363_v14 = vpop.f32.mrb[74].mxu0 }
0x1913   :  { %v3406_v18 = vpop.f32.mrb[75].mxu0  ;;  %3416 = vmatmul.mubr.msk.bf16.vlgmr.msra.gmra.mrb[76].mxu0 %vm465_vm3, %v2414_v12 }
0x1914   :  { %3426 = vmatpush3.bf16.xpose.msra.mxu0 %v2524_v15  ;;  %3427 = vmatprep.mubr.msk.bf16.mxu0 %vm3855_vm2, %v3854_v46 }
0x1915   :  { %3437 = vmatprep.subr.bf16.mxu0 %v3854_v46 }
0x191b   :  { %3428 = vmatmul.mubr.msk.bf16.vlgmr.msra.gmra.mrb[80].mxu0 %vm465_vm3, %v2517_v20 }
0x191c   :  { %3439 = vmatprep.mubr.msk.bf16.mxu0 %vm3855_vm2, %v3854_v46 }
0x1998   :  { %v2568_v16 = vpop.xlane.xlu0 %2567 }
0x1999   :  { %v2572_v21 = vsub.f32 %v2510_v5, %v2568_v16 }
0x199b   :  { %v2574_v22 = vmul.f32 1.442695, %v2572_v21 }
0x199d   :  { %3593 = vpow2.f32 %v2574_v22 }
0x19a7   :  { %v3594_v23 = vpop.eup %3593 }
0x19a8   :  { %v2578_v26 = vsel %vm465_vm3, %v3594_v23, 0.0 }
0x19a9   :  { %2579 = vadd.xlane.f32.xlu0 %v2578_v26 }
0x19e6   :  { %v2457_v28 = vpop.f32.mrb[76].mxu0 }
0x19e7   :  { %v2464_v29 = vadd.f32 %v2457_v28, %v4530_v30  ;;  %v3417_v24 = vpop.f32.mrb[77].mxu0 }
0x19e8   :  { %v2460_v17 = vpop.f32.mrb[78].mxu0  ;;  %v3512_v24 = vld [vmem:[#allocation16 + $0x8] sm:$0xff]  }
0x19e9   :  { %v2465_v31 = vadd.f32 %v2460_v17, %v4532_v32  ;;  %v3418_v25 = vpop.f32.mrb[79].mxu0  ;;  %v3513_v17 = vld [vmem:[%s4688_s18] sm:$0xff]  }
0x19ee   :  { %v2560_v35 = vpop.f32.mrb[80].mxu0 }
0x19ef   :  { %v3429_v62 = vpop.f32.mrb[81].mxu0  ;;  %v2569_v37 = vsel %vm465_vm3, %v2560_v35, -inf }
0x19f0   :  { %2570 = vmax.xlane.f32.xlu1 %v2569_v37  ;;  %v2563_v34 = vpop.f32.mrb[82].mxu0 }
0x19f1   :  { %v3430_v36 = vpop.f32.mrb[83].mxu0 }
0x1a01   :  { %2638 = vrot.lane.b32.xlu1 %v4402_v19, %s3865_s1 }
0x1a36   :  { %v2580_v44 = vpop.xlane.xlu0 %2579 }
0x1a7d   :  { %v2571_v39 = vpop.xlane.xlu1 %2570 }
0x1a7e   :  { %v2573_v40 = vsub.f32 %v2560_v35, %v2571_v39  ;;  %v2749_v39 = vld [vmem:[%s4685_s15] sm:$0x3] }
0x1a80   :  { %v2576_v41 = vmul.f32 1.442695, %v2573_v40  ;;  %v2779_v40 = vrot.slane %v2749_v39, %v4168_v0  ;;  %v3516_v0 = vld [vmem:[%s4688_s18 + $0x18] sm:$0xff]  }
0x1a81   :  { %v2639_v42 = vpop.permute.xlu1 %2638 }
0x1a82   :  { %3595 = vpow2.f32 %v2576_v41  ;;  %v2644_v30 = vsel %vm903_vm5, %v2639_v42, 0 }
0x1a83   :  { %3438 = vmatpush3.bf16.msra.mxu0 %v2644_v30  ;;  %3597 = vrcp.f32 %v2580_v44  ;;  %v2785_v44 = vrot.slane %v2749_v39, %v4172_v8  ;;  %v3517_v8 = vld [vmem:[%s4688_s18 + $0x20] sm:$0xff]  }
0x1a84   :  { %3449 = vmatprep.subr.bf16.mxu0 %v3854_v46 }
0x1a8c   :  { %v3596_v32 = vpop.eup %3595 }
0x1a8d   :  { %v2581_v43 = vsel %vm465_vm3, %v3596_v32, 0.0  ;;  %v3598_v45 = vpop.eup %3597 }
0x1a8e   :  { %2582 = vadd.xlane.f32.xlu0 %v2581_v43  ;;  %v2586_v47 = vmul.f32 %v3598_v45, %v3594_v23 }
0x1a90   :  { %v2588_v52 = vpack.c.bf16 %v2586_v47, %v2586_v47 }
0x1aa4   :  { %2590 = vrot.lane.b32.xlu0 %v4400_v51, %s3865_s1  ;;  %s3809_s1 = scalar_lea.vmem %s2989_s30, 256 }
0x1aa5   :  { %p3810_p2 = scmp.ne.s32.totalorder %s2989_s30, %s3809_s1  ;;  %p3815_p4 = scmp.lt.s32.totalorder %s3809_s1, %s3809_s1 }
0x1aa7   :  { %p3816_p5 = por %p3815_p4, %p3814_p3 }
0x1aa9   :  { %p3817_p6 = pnand %p3816_p5, %p3810_p2 }
0x1b1b   :  { %v2583_v19 = vpop.xlane.xlu0 %2582 }
0x1b1c   :  { %3599 = vrcp.f32 %v2583_v19 }
0x1b1f   :  { %v2591_v48 = vpop.permute.xlu0 %2590 }
0x1b20   :  { %v2596_v49 = vsel %vm903_vm5, %v2591_v48, 0 }
0x1b21   :  { %3432 = vmatpush3.bf16.msra.mxu1 %v2596_v49  ;;  %v3515_v49 = vld [vmem:[%s4688_s18 + $0x10] sm:$0xff]  }
0x1b22   :  { %3443 = vmatprep.subr.bf16.mxu1 %v3854_v46 }
0x1b24   :  { %3434 = vmatmul.mubr.msk.bf16.vlgmr.msra.gmra.mrb[76].mxu1 %vm465_vm3, %v2588_v52  ;;  %v3518_v52 = vld [vmem:[%s4688_s18 + $0x28] sm:$0xff]  }
0x1b25   :  { %3445 = vmatprep.mubr.msk.bf16.mxu1 %vm3855_vm2, %v3854_v46  ;;  %3444 = vmatpush3.bf16.msra.mxu1 %v2693_v56 }
0x1b26   :  { %v3600_v53 = vpop.eup %3599  ;;  %3457 = vmatprep.subr.bf16.mxu1 %v3854_v46 }
0x1b27   :  { %v2587_v51 = vmul.f32 %v3600_v53, %v3596_v32  ;;  %v3519_v53 = vld [vmem:[%s4688_s18 + $0x30] sm:$0xff]  }
0x1b29   :  { %v2589_v54 = vpack.c.bf16 %v2587_v51, %v2587_v51  ;;  %v3520_v51 = vld [vmem:[%s4688_s18 + $0x38] sm:$0xff]  }
0x1b2b   :  { %3440 = vmatmul.mubr.msk.bf16.vlgmr.msra.gmra.mrb[84].mxu0 %vm465_vm3, %v2589_v54  ;;  %v3064_v54 = vld [vmem:[%s4687_s17] ss:$0 sm:$0xff] }
0x1b2c   :  { %3453 = vmatprep.mubr.msk.bf16.mxu0 %vm3855_vm2, %v3854_v46 }
0x1bf7   :  { %v2632_v58 = vpop.f32.mrb[76].mxu1 }
0x1bf8   :  { %v3435_v59 = vpop.f32.mrb[77].mxu1 }
0x1bf9   :  { %v2635_v61 = vpop.f32.mrb[78].mxu1 }
0x1bfa   :  { %v3436_v63 = vpop.f32.mrb[79].mxu1 }
0x1bfe   :  { %v2680_v2 = vpop.f32.mrb[84].mxu0 }
0x1bff   :  { %v2686_v27 = vpack.c.bf16 %v2680_v2, %v2632_v58  ;;  %v3441_v1 = vpop.f32.mrb[85].mxu0 }
0x1c00   :  { %v2683_v3 = vpop.f32.mrb[86].mxu0 }
0x1c01   :  { %v3442_v4 = vpop.f32.mrb[87].mxu0  ;;  %3446 = vmatmul.mubr.msk.bf16.vlgmr.msra.gmra.mrb[80].mxu1 %vm465_vm3, %v2686_v27 }
0x1c02   :  { %3473 = vmatprep.mubr.msk.bf16.mxu1 %vm3855_vm2, %v3854_v46  ;;  %3458 = vmatpush3.bf16.msra.mxu1 %v3513_v17 }
0x1c03   :  { %3459 = vmatprep.subr.bf16.mxu1 %v3854_v46 }
0x1cd4   :  { %v2729_v57 = vpop.f32.mrb[80].mxu1 }
0x1cd5   :  { %v2736_v60 = vadd.f32 %v2729_v57, %v2464_v29  ;;  %v3447_v5 = vpop.f32.mrb[81].mxu1  ;;  %v3511_v29 = vld [vmem:[#allocation16] sm:$0xff]  }
0x1cd6   :  { %v2732_v7 = vpop.f32.mrb[82].mxu1  ;;  %3450 = vmatpush3.bf16.msra.mxu0 %v3511_v29 }
0x1cd7   :  { %v2738_v9 = vadd.f32 %v2736_v60, %v4372_v33  ;;  %v2737_v50 = vadd.f32 %v2732_v7, %v2465_v31  ;;  %v3448_v10 = vpop.f32.mrb[83].mxu1  ;;  %3451 = vmatprep.subr.bf16.mxu0 %v3854_v46  ;;  %v3514_v31 = vld [vmem:[%s4688_s18 + $0x8] sm:$0xff]  }
0x1cd8   :  { %3460 = vmatpush3.bf16.msra.mxu1 %v3514_v31 }
0x1cd9   :  { %v4597_v11 = vadd.f32 %v3063_v6, %v2738_v9  ;;  %v2739_v12 = vadd.f32 %v2737_v50, %v4377_v38  ;;  %3461 = vmatprep.subr.bf16.mxu1 %v3854_v46  ;;  %v3068_v9 = vld [vmem:[%s4689_s19] ss:$0 sm:$0xff] }
0x1cda   :  { %3452 = vmatpush3.bf16.msra.mxu0 %v3512_v24 }
0x1cdb   :  { %v4600_v13 = vadd.f32 %v3063_v6, %v2739_v12  ;;  %v2750_v14 = vsel %vm351_vm1, %v4597_v11, 0.0 }
0x1cdc   :  { %2751 = vadd.xlane.f32.xlu1 %v2750_v14  ;;  %3462 = vmatpush3.bf16.msra.mxu1 %v3515_v49 }
0x1cdd   :  { %v2753_v15 = vsel %vm351_vm1, %v4600_v13, 0.0  ;;  %3463 = vmatprep.subr.bf16.mxu1 %v3854_v46 }
0x1cde   :  { %2754 = vadd.xlane.f32.xlu0 %v2753_v15 }
0x1ce0   :  { %3464 = vmatpush3.bf16.msra.mxu1 %v3516_v0 }
0x1ce1   :  { %3465 = vmatprep.subr.bf16.mxu1 %v3854_v46 }
0x1ce4   :  { %3466 = vmatpush3.bf16.msra.mxu1 %v3517_v8 }
0x1ce5   :  { %3467 = vmatprep.subr.bf16.mxu1 %v3854_v46 }
0x1ce8   :  { %3468 = vmatpush3.bf16.msra.mxu1 %v3518_v52 }
0x1ce9   :  { %3469 = vmatprep.subr.bf16.mxu1 %v3854_v46 }
0x1cec   :  { %3470 = vmatpush3.bf16.msra.mxu1 %v3519_v53 }
0x1ced   :  { %3471 = vmatprep.subr.bf16.mxu1 %v3854_v46 }
0x1cf0   :  { %3472 = vmatpush3.bf16.msra.mxu1 %v3520_v51 }
0x1d69   :  { %v2752_v18 = vpop.xlane.xlu1 %2751 }
0x1d6a   :  { %v2756_v20 = vmul.f32 0.03125, %v2752_v18 }
0x1d6b   :  { %v2755_v16 = vpop.xlane.xlu0 %2754 }
0x1d6c   :  { %v2758_v33 = vsub.f32 %v4597_v11, %v2756_v20  ;;  %v2757_v21 = vmul.f32 0.03125, %v2755_v16 }
0x1d6e   :  { %v2759_v22 = vsub.f32 %v4600_v13, %v2757_v21  ;;  %v2760_v23 = vmul.f32 %v2758_v33, %v2758_v33 }
0x1d70   :  { %v2762_v38 = vsel %vm351_vm1, %v2760_v23, 0.0  ;;  %v2761_v26 = vmul.f32 %v2759_v22, %v2759_v22 }
0x1d71   :  { %2763 = vadd.xlane.f32.xlu0 %v2762_v38 }
0x1d72   :  { %v2765_v28 = vsel %vm351_vm1, %v2761_v26, 0.0 }
0x1d73   :  { %2766 = vadd.xlane.f32.xlu1 %v2765_v28 }
0x1dfe   :  { %v2764_v25 = vpop.xlane.xlu0 %2763 }
0x1dff   :  { %v2768_v35 = vmul.f32 0.03125, %v2764_v25 }
0x1e00   :  { %v2767_v62 = vpop.xlane.xlu1 %2766 }
0x1e01   :  { %v2770_v37 = vadd.f32 1e-05, %v2768_v35  ;;  %v2769_v34 = vmul.f32 0.03125, %v2767_v62 }
0x1e03   :  { %3601 = vrsqrt.f32 %v2770_v37  ;;  %v2771_v36 = vadd.f32 1e-05, %v2769_v34 }
0x1e05   :  { %3603 = vrsqrt.f32 %v2771_v36 }
0x1e0d   :  { %v3602_v41 = vpop.eup %3601 }
0x1e0e   :  { %v2774_v42 = vmul.f32 %v3602_v41, %v2758_v33 }
0x1e0f   :  { %v3604_v30 = vpop.eup %3603 }
0x1e10   :  { %v2780_v32 = vmul.f32 %v2779_v40, %v2774_v42  ;;  %v2775_v43 = vmul.f32 %v3604_v30, %v2759_v22 }
0x1e12   :  { %v2781_v45 = vmul.f32 %v2779_v40, %v2775_v43  ;;  %v2786_v19 = vadd.f32 %v2785_v44, %v2780_v32 }
0x1e14   :  { %v2787_v47 = vadd.f32 %v2785_v44, %v2781_v45 }
0x1e16   :  { %v2792_v48 = vpack.c.bf16 %v2787_v47, %v2786_v19 }
0x1e18   :  { %3454 = vmatmul.mubr.msk.bf16.vlgmr.msra.gmra.mrb[88].mxu0 %vm351_vm1, %v2792_v48 }
0x1eeb   :  { %v2849_v55 = vpop.f32.mrb[88].mxu0 }
0x1eec   :  { %v2850_v56 = vadd.f32 %v3064_v54, %v2849_v55  ;;  %v3455_v58 = vpop.f32.mrb[89].mxu0 }
0x1eed   :  { %v2852_v59 = vpop.f32.mrb[90].mxu0 }
0x1eee   :  { %v2858_v61 = vmul.f32 0.70710677, %v2850_v56  ;;  %v2853_v63 = vadd.f32 %v3064_v54, %v2852_v59  ;;  %v3456_v2 = vpop.f32.mrb[91].mxu0  ;;  %v2856_v4 = vmul.f32 0.5, %v2850_v56 }
0x1ef0   :  { %3605 = verf.f32 %v2858_v61  ;;  %v2859_v27 = vmul.f32 0.70710677, %v2853_v63  ;;  %v2857_v57 = vmul.f32 0.5, %v2853_v63 }
0x1ef2   :  { %3607 = verf.f32 %v2859_v27 }
0x1efa   :  { %v3606_v46 = vpop.eup %3605 }
0x1efb   :  { %v2862_v1 = vadd.f32 1.0, %v3606_v46 }
0x1efc   :  { %v3608_v3 = vpop.eup %3607 }
0x1efd   :  { %v2863_v60 = vadd.f32 1.0, %v3608_v3  ;;  %v2864_v5 = vmul.f32 %v2862_v1, %v2856_v4 }
0x1eff   :  { %v2865_v6 = vmul.f32 %v2863_v60, %v2857_v57 }
0x1f01   :  { %v2882_v7 = vpack.c.bf16 %v2865_v6, %v2864_v5 }
0x1f03   :  { %3474 = vmatmul.mubr.bf16.vlgmr.msra.gmra.mrb[84].mxu1 %v2882_v7 }
0x1fd6   :  { %v2972_v50 = vpop.f32.mrb[84].mxu1 }
0x1fd7   :  { %v2973_v10 = vadd.f32 %v3068_v9, %v2972_v50  ;;  %v3475_v12 = vpop.f32.mrb[85].mxu1 }
0x1fd8   :  { %v2975_v14 = vpop.f32.mrb[86].mxu1 }
0x1fd9   :  { %v2979_v15 = vadd.f32 %v2973_v10, %v4597_v11  ;;  %v2976_v18 = vadd.f32 %v3068_v9, %v2975_v14  ;;  %v3476_v20 = vpop.f32.mrb[87].mxu1 }
0x1fdb   :  { %2981 = vst.msk [vmem:[#allocation17] sm:$0xff] %vm351_vm1, %v2979_v15  ;;  %v2980_v16 = vadd.f32 %v2976_v18, %v4600_v13 }
0x1fdd   :  { %2982 = vst.msk [vmem:[#allocation17 + $0x8] sm:$0xff] %vm351_vm1, %v2980_v16 }
0x1fde   :  { %3820 = shalt.err (!%p3817_p6)
}
0x1fdf   :  { %s3821_s16 = scalar_lea.hbm %s4690_s20, 256 }
0x1fe0   :  { %p3822_p7 = scmp.ne.s32.totalorder %s4690_s20, %s3821_s16  ;;  %p3825_p8 = scmp.lt.u32.totalorder %s3821_s16, %s4690_s20 }
0x1fe2   :  { %p3827_p9 = pnand %p3825_p8, %p3822_p7 }
0x1fe4   :  { %3830 = shalt.err (!%p3827_p9)
}
0x1fe5   :  { %s3867_s8 = smov 128   ;;  %s3868_s21 = smov 8  }
0x1fe6   :  { %2994 = dma.vmem_to_hbm [thread:$0]  %s2989_s30, 256, %s4690_s20, [#allocation4], %s3867_s8, %s3867_s8, %s3868_s21  }
0x1fe7   :  { %3841 = dma.done.wait [#allocation4], 256  }
0x1fe8   :  { %3842 = vsyncadd [#allocation4], 4294967040 }
0x1fe9   :  { %2998 = vsyncpa [#allocation3], 1 }
0x1fea   :  { %2999 = vsyncpa [#allocation6], 1 }
0x1feb   :  { %3000 = vsyncpa [#allocation9], 1 }
0x1fec   :  { %3001 = vsyncpa [#allocation12], 1 }
0x1fed   :  { %3002 = vsyncpa [#allocation15], 1 }
0x1fee   :  { %3003 = vsyncpa [#allocation4], 1 }

</bundles_post_ra>
